<compile_context>
chip_gen: v5e
topology: v5e:2x2
jax: 0.10.0
libtpu: 0.0.40
codegen_flags: <defaults>
</compile_context>

<pallas_src>
import jax
import jax.numpy as jnp
from jax.experimental import pallas as pl
from jax.experimental.pallas import tpu as pltpu

BN_EPS = 1e-5


def _bn_scale_shift(bn):
    scale = bn["gamma"] / jnp.sqrt(bn["var"] + BN_EPS)
    shift = bn["beta"] - bn["mean"] * scale
    return scale.astype(jnp.float32), shift.astype(jnp.float32)


def _conv_geom(L, K, s):
    Lout = -(-L // s)                                   # ceil(L / stride)
    p = max(0, (Lout - 1) * s + K - L)                  # Conv1dPadSame total pad
    return Lout, p, p // 2


# ----------------------------------------------------------------------------
# Whole-network fused forward (inference mode)
# ----------------------------------------------------------------------------
def resnet1d_forward(params, x):
    # input massaging exactly as in the PyTorch forward (NCL), then channels-last
    if x.ndim == 2:
        x = x[:, :, None]
    elif x.ndim == 1:
        x = x.reshape(1, -1, 1)
    xl = jnp.transpose(x, (0, 2, 1)).astype(jnp.float32)    # (B, L, Cin)
    B, L0, C0 = xl.shape
    n_classes = params["dense_w"].shape[0]

    operands = [xl]
    in_specs = [pl.BlockSpec((None, L0, C0), lambda i: (i, 0, 0))]
    scratch_shapes = []
    program = []                                            # static per-layer plan

    def _add_operand(arr):
        shape = tuple(arr.shape)
        nd = len(shape)
        operands.append(arr)
        # constant index_map -> weights / BN vectors stay resident across the batch grid
        in_specs.append(pl.BlockSpec(shape, lambda i, _n=nd: (0,) * _n))

    def _add_conv(L, Cin, w, b, stride, pre_bn=None, post_bn=None):
        Cout, Cin_w, K = w.shape
        assert Cin_w == Cin, "groups != 1 not supported"    # TODO(synk): grouped conv
        Lout, p, pad_l = _conv_geom(L, K, stride)
        # im2col weight: row index = k*Cin + ci  ->  W2[k*Cin+ci, co] = w[co, ci, k]
        _add_operand(jnp.transpose(w, (2, 1, 0)).reshape(K * Cin, Cout)
                     .astype(jnp.bfloat16))
        _add_operand(b.reshape(1, Cout).astype(jnp.float32))
        if pre_bn is not None:
            s_, t_ = _bn_scale_shift(pre_bn)
            _add_operand(s_.reshape(1, Cin))
            _add_operand(t_.reshape(1, Cin))
        if post_bn is not None:
            s_, t_ = _bn_scale_shift(post_bn)
            _add_operand(s_.reshape(1, Cout))
            _add_operand(t_.reshape(1, Cout))
        scratch_shapes.append(pltpu.VMEM((L + p, Cin), jnp.float32))  # padded input
        program.append(dict(op="conv", L=L, Cin=Cin, Cout=Cout, K=K, s=stride,
                            Lout=Lout, p=p, pad_l=pad_l,
                            has_pre=pre_bn is not None, has_post=post_bn is not None))
        return Lout, Cout

    # ---- build the static network program & operand list --------------------
    L, C = L0, C0
    L, C = _add_conv(L, C, params["first_conv_w"], params["first_conv_b"],
                     stride=1, post_bn=params["first_bn"])          # conv + bn + relu

    for blk in params["blocks"]:
        program.append(dict(op="save"))                              # identity snapshot
        L_id, C_id = L, C
        L, C = _add_conv(L, C, blk["conv1_w"], blk["conv1_b"], stride=blk["stride"],
                         pre_bn=None if blk["is_first_block"] else blk["bn1"])
        L, C = _add_conv(L, C, blk["conv2_w"], blk["conv2_b"], stride=1,
                         pre_bn=blk["bn2"])
        pool_k = blk["stride"] if blk["downsample"] else 1
        if pool_k > 1:
            Lrp = L_id + pool_k - 1                                  # maxpool 0-pad
            assert (Lrp - pool_k) // pool_k + 1 == L
            scratch_shapes.append(pltpu.VMEM((Lrp, C_id), jnp.float32))
        else:
            assert L_id == L
        ch1 = (C - C_id) // 2
        ch2 = C - C_id - ch1
        program.append(dict(op="residual", pool_k=pool_k, Lout=L, L_id=L_id,
                            C_id=C_id, ch1=ch1, ch2=ch2))

    fs, ft = _bn_scale_shift(params["final_bn"])
    _add_operand(fs.reshape(1, C))
    _add_operand(ft.reshape(1, C))
    _add_operand(params["dense_w"].T.astype(jnp.bfloat16))           # (C, n_classes)
    _add_operand(params["dense_b"].reshape(1, n_classes).astype(jnp.float32))
    program.append(dict(op="head"))

    n_in = len(operands)

    # ---- the single fused kernel (one sample per grid step) -----------------
    def kernel(*refs):
        in_refs = refs[:n_in]
        o_ref = refs[n_in]
        scr_refs = refs[n_in + 1:]
        opit = iter(in_refs[1:])
        scrit = iter(scr_refs)

        h = in_refs[0][...]                                # (L0, C0) f32 activation
        identity = None

        for step in program:
            op = step["op"]

            if op == "save":
                identity = h                               # pre-BN block input

            elif op == "conv":
                w_ref = next(opit); b_ref = next(opit)
                if step["has_pre"]:                        # bn+relu prologue (f32)
                    ps_ref = next(opit); pt_ref = next(opit)
                    h = jnp.maximum(h * ps_ref[...] + pt_ref[...], 0.0)
                if step["has_post"]:
                    qs_ref = next(opit); qt_ref = next(opit)
                scr = next(scrit)
                Lc, K, s = step["L"], step["K"], step["s"]
                Lout, p, pad_l = step["Lout"], step["p"], step["pad_l"]
                # SAME padding done entirely in VMEM (no XLA-side pad copies)
                if p > 0:
                    scr[...] = jnp.zeros_like(scr)
                    scr[pad_l:pad_l + Lc, :] = h
                else:
                    scr[...] = h
                # K shifted windows -> one (Lout, K*Cin) im2col LHS, cast once
                taps = []
                for k in range(K):
                    if s == 1:
                        taps.append(scr[k:k + Lout, :])
                    else:
                        taps.append(scr[pl.ds(k, Lout, stride=s), :])
                lhs = (jnp.concatenate(taps, axis=-1) if K > 1 else taps[0])
                lhs = lhs.astype(jnp.bfloat16)
                h = jnp.dot(lhs, w_ref[...],
                            preferred_element_type=jnp.float32) + b_ref[...]
                if step["has_post"]:                       # bn+relu epilogue (f32)
                    h = jnp.maximum(h * qs_ref[...] + qt_ref[...], 0.0)

            elif op == "residual":
                pool_k, Lout = step["pool_k"], step["Lout"]
                if pool_k > 1:                             # fused MyMaxPool1dPadSame
                    scr = next(scrit)
                    L_id = step["L_id"]
                    ppl = (pool_k - 1) // 2
                    scr[...] = jnp.zeros_like(scr)         # 0-pad like the reference F.pad
                    scr[ppl:ppl + L_id, :] = identity
                    ident = scr[pl.ds(0, Lout, stride=pool_k), :]
                    for j in range(1, pool_k):
                        ident = jnp.maximum(
                            ident, scr[pl.ds(j, Lout, stride=pool_k), :])
                else:
                    ident = identity
                ch1, ch2 = step["ch1"], step["ch2"]
                if ch1 or ch2:                             # zero channel padding
                    parts = []
                    if ch1:
                        parts.append(jnp.zeros((Lout, ch1), jnp.float32))
                    parts.append(ident)
                    if ch2:
                        parts.append(jnp.zeros((Lout, ch2), jnp.float32))
                    ident = jnp.concatenate(parts, axis=-1)
                h = h + ident                              # residual add (f32)

            else:  # head: final BN + ReLU + mean over length + dense
                fs_ref = next(opit); ft_ref = next(opit)
                wd_ref = next(opit); bd_ref = next(opit)
                y = jnp.maximum(h * fs_ref[...] + ft_ref[...], 0.0)
                pooled = jnp.mean(y, axis=0, keepdims=True)          # (1, C) reduction
                h = jnp.dot(pooled.astype(jnp.bfloat16), wd_ref[...],
                            preferred_element_type=jnp.float32) + bd_ref[...]

        o_ref[...] = h                                     # (1, n_classes)

    out = pl.pallas_call(
        kernel,
        out_shape=jax.ShapeDtypeStruct((B, 1, n_classes), jnp.float32),
        grid=(B,),
        in_specs=in_specs,
        out_specs=pl.BlockSpec((None, 1, n_classes), lambda i: (i, 0, 0)),
        scratch_shapes=scratch_shapes,
        compiler_params=pltpu.CompilerParams(dimension_semantics=("parallel",)),
    )(*operands)
    return out.reshape(B, n_classes)


# ----------------------------------------------------------------------------
# Parameter construction (deterministic, mirrors ResNet1D.__init__ shape logic)
# ----------------------------------------------------------------------------
def _block_configs(base_filters, n_block, downsample_gap, increasefilter_gap):
    cfgs = []
    for i_block in range(n_block):
        is_first = i_block == 0
        downsample = (i_block % downsample_gap == 1)
        if is_first:
            in_ch = base_filters
            out_ch = in_ch
        else:
            in_ch = int(base_filters * 2 ** ((i_block - 1) // increasefilter_gap))
            if i_block % increasefilter_gap == 0 and i_block != 0:
                out_ch = in_ch * 2
            else:
                out_ch = in_ch
        cfgs.append(dict(in_channels=in_ch, out_channels=out_ch,
                         is_first_block=is_first, downsample=downsample))
    return cfgs


def _init_bn(key, c):
    k1, k2, k3, k4 = jax.random.split(key, 4)
    return dict(
        gamma=1.0 + 0.1 * jax.random.normal(k1, (c,), jnp.float32),
        beta=0.1 * jax.random.normal(k2, (c,), jnp.float32),
        mean=0.05 * jax.random.normal(k3, (c,), jnp.float32),
        var=1.0 + 0.1 * jax.random.uniform(k4, (c,), jnp.float32),
    )


def _init_conv(key, cout, cin, k):
    k1, k2 = jax.random.split(key)
    return (0.1 * jax.random.normal(k1, (cout, cin, k), jnp.float32),
            0.05 * jax.random.normal(k2, (cout,), jnp.float32))


def init_resnet1d(key, in_channels, base_filters, kernel_size, stride,
                  n_block, n_classes, downsample_gap=2, increasefilter_gap=4):
    keys = jax.random.split(key, 4 + 4 * n_block)
    ki = iter(keys)
    params = {}
    params["first_conv_w"], params["first_conv_b"] = _init_conv(
        next(ki), base_filters, in_channels, kernel_size)
    params["first_bn"] = _init_bn(next(ki), base_filters)

    cfgs = _block_configs(base_filters, n_block, downsample_gap, increasefilter_gap)
    blocks = []
    for cfg in cfgs:
        in_ch, out_ch = cfg["in_channels"], cfg["out_channels"]
        blk = dict(cfg)
        blk["stride"] = stride if cfg["downsample"] else 1
        blk["bn1"] = _init_bn(next(ki), in_ch)
        blk["conv1_w"], blk["conv1_b"] = _init_conv(next(ki), out_ch, in_ch, kernel_size)
        blk["bn2"] = _init_bn(next(ki), out_ch)
        blk["conv2_w"], blk["conv2_b"] = _init_conv(next(ki), out_ch, out_ch, kernel_size)
        blocks.append(blk)
    params["blocks"] = blocks

    final_ch = cfgs[-1]["out_channels"]
    params["final_bn"] = _init_bn(next(ki), final_ch)
    kd1, kd2 = jax.random.split(next(ki))
    params["dense_w"] = 0.1 * jax.random.normal(kd1, (n_classes, final_ch), jnp.float32)
    params["dense_b"] = 0.05 * jax.random.normal(kd2, (n_classes,), jnp.float32)
    return params


# ----------------------------------------------------------------------------
if __name__ == "__main__":
    key = jax.random.PRNGKey(0)
    k_param, k_x = jax.random.split(key)

    # ResNet1D(in_channels=4, base_filters=8, kernel_size=3, stride=2, groups=1,
    #          n_block=5, n_classes=5)
    in_channels, base_filters, kernel_size, stride = 4, 8, 3, 2
    n_block, n_classes = 5, 5
    batch, length = 2, 16

    params = init_resnet1d(k_param, in_channels, base_filters, kernel_size, stride,
                           n_block, n_classes)
    x = jax.random.normal(k_x, (batch, in_channels, length), jnp.float32)

    fwd = jax.jit(lambda xx: resnet1d_forward(params, xx))
    logits = jax.block_until_ready(fwd(x))
    assert logits.shape == (batch, n_classes), logits.shape
    assert bool(jnp.all(jnp.isfinite(logits)))
    print("KERNEL_OK")
</pallas_src>

<mosaic_0001>
module attributes {stable_mosaic.version = 11 : i64} {
  func.func @kernel(%arg0: i32, %arg1: memref<1x16x4xf32, #tpu.memory_space<vmem>>, %arg2: memref<12x8xbf16, #tpu.memory_space<vmem>>, %arg3: memref<1x8xf32, #tpu.memory_space<vmem>>, %arg4: memref<1x8xf32, #tpu.memory_space<vmem>>, %arg5: memref<1x8xf32, #tpu.memory_space<vmem>>, %arg6: memref<24x8xbf16, #tpu.memory_space<vmem>>, %arg7: memref<1x8xf32, #tpu.memory_space<vmem>>, %arg8: memref<24x8xbf16, #tpu.memory_space<vmem>>, %arg9: memref<1x8xf32, #tpu.memory_space<vmem>>, %arg10: memref<1x8xf32, #tpu.memory_space<vmem>>, %arg11: memref<1x8xf32, #tpu.memory_space<vmem>>, %arg12: memref<24x8xbf16, #tpu.memory_space<vmem>>, %arg13: memref<1x8xf32, #tpu.memory_space<vmem>>, %arg14: memref<1x8xf32, #tpu.memory_space<vmem>>, %arg15: memref<1x8xf32, #tpu.memory_space<vmem>>, %arg16: memref<24x8xbf16, #tpu.memory_space<vmem>>, %arg17: memref<1x8xf32, #tpu.memory_space<vmem>>, %arg18: memref<1x8xf32, #tpu.memory_space<vmem>>, %arg19: memref<1x8xf32, #tpu.memory_space<vmem>>, %arg20: memref<24x8xbf16, #tpu.memory_space<vmem>>, %arg21: memref<1x8xf32, #tpu.memory_space<vmem>>, %arg22: memref<1x8xf32, #tpu.memory_space<vmem>>, %arg23: memref<1x8xf32, #tpu.memory_space<vmem>>, %arg24: memref<24x8xbf16, #tpu.memory_space<vmem>>, %arg25: memref<1x8xf32, #tpu.memory_space<vmem>>, %arg26: memref<1x8xf32, #tpu.memory_space<vmem>>, %arg27: memref<1x8xf32, #tpu.memory_space<vmem>>, %arg28: memref<24x8xbf16, #tpu.memory_space<vmem>>, %arg29: memref<1x8xf32, #tpu.memory_space<vmem>>, %arg30: memref<1x8xf32, #tpu.memory_space<vmem>>, %arg31: memref<1x8xf32, #tpu.memory_space<vmem>>, %arg32: memref<24x8xbf16, #tpu.memory_space<vmem>>, %arg33: memref<1x8xf32, #tpu.memory_space<vmem>>, %arg34: memref<1x8xf32, #tpu.memory_space<vmem>>, %arg35: memref<1x8xf32, #tpu.memory_space<vmem>>, %arg36: memref<24x16xbf16, #tpu.memory_space<vmem>>, %arg37: memref<1x16xf32, #tpu.memory_space<vmem>>, %arg38: memref<1x8xf32, #tpu.memory_space<vmem>>, %arg39: memref<1x8xf32, #tpu.memory_space<vmem>>, %arg40: memref<48x16xbf16, #tpu.memory_space<vmem>>, %arg41: memref<1x16xf32, #tpu.memory_space<vmem>>, %arg42: memref<1x16xf32, #tpu.memory_space<vmem>>, %arg43: memref<1x16xf32, #tpu.memory_space<vmem>>, %arg44: memref<1x16xf32, #tpu.memory_space<vmem>>, %arg45: memref<1x16xf32, #tpu.memory_space<vmem>>, %arg46: memref<16x5xbf16, #tpu.memory_space<vmem>>, %arg47: memref<1x5xf32, #tpu.memory_space<vmem>>, %arg48: memref<1x1x5xf32, #tpu.memory_space<vmem>>, %arg49: memref<18x4xf32, #tpu.memory_space<vmem>>, %arg50: memref<18x8xf32, #tpu.memory_space<vmem>>, %arg51: memref<18x8xf32, #tpu.memory_space<vmem>>, %arg52: memref<17x8xf32, #tpu.memory_space<vmem>>, %arg53: memref<10x8xf32, #tpu.memory_space<vmem>>, %arg54: memref<17x8xf32, #tpu.memory_space<vmem>>, %arg55: memref<10x8xf32, #tpu.memory_space<vmem>>, %arg56: memref<10x8xf32, #tpu.memory_space<vmem>>, %arg57: memref<9x8xf32, #tpu.memory_space<vmem>>, %arg58: memref<6x8xf32, #tpu.memory_space<vmem>>, %arg59: memref<9x8xf32, #tpu.memory_space<vmem>>, %arg60: memref<6x8xf32, #tpu.memory_space<vmem>>, %arg61: memref<6x16xf32, #tpu.memory_space<vmem>>) attributes {dimension_semantics = [#tpu.dimension_semantics<parallel>], iteration_bounds = array<i64: 2>, scalar_prefetch = 0 : i64, scratch_operands = 13 : i64, tpu.core_type = #tpu.core_type<tc>, window_params = [{transform_indices = @transform_0, window_bounds = array<i64: 1, 16, 4>}, {pipeline_mode = #tpu.pipeline_mode<synchronous>, transform_indices = @transform_1, window_bounds = array<i64: 12, 8>}, {pipeline_mode = #tpu.pipeline_mode<synchronous>, transform_indices = @transform_2, window_bounds = array<i64: 1, 8>}, {pipeline_mode = #tpu.pipeline_mode<synchronous>, transform_indices = @transform_3, window_bounds = array<i64: 1, 8>}, {pipeline_mode = #tpu.pipeline_mode<synchronous>, transform_indices = @transform_4, window_bounds = array<i64: 1, 8>}, {pipeline_mode = #tpu.pipeline_mode<synchronous>, transform_indices = @transform_5, window_bounds = array<i64: 24, 8>}, {pipeline_mode = #tpu.pipeline_mode<synchronous>, transform_indices = @transform_6, window_bounds = array<i64: 1, 8>}, {pipeline_mode = #tpu.pipeline_mode<synchronous>, transform_indices = @transform_7, window_bounds = array<i64: 24, 8>}, {pipeline_mode = #tpu.pipeline_mode<synchronous>, transform_indices = @transform_8, window_bounds = array<i64: 1, 8>}, {pipeline_mode = #tpu.pipeline_mode<synchronous>, transform_indices = @transform_9, window_bounds = array<i64: 1, 8>}, {pipeline_mode = #tpu.pipeline_mode<synchronous>, transform_indices = @transform_10, window_bounds = array<i64: 1, 8>}, {pipeline_mode = #tpu.pipeline_mode<synchronous>, transform_indices = @transform_11, window_bounds = array<i64: 24, 8>}, {pipeline_mode = #tpu.pipeline_mode<synchronous>, transform_indices = @transform_12, window_bounds = array<i64: 1, 8>}, {pipeline_mode = #tpu.pipeline_mode<synchronous>, transform_indices = @transform_13, window_bounds = array<i64: 1, 8>}, {pipeline_mode = #tpu.pipeline_mode<synchronous>, transform_indices = @transform_14, window_bounds = array<i64: 1, 8>}, {pipeline_mode = #tpu.pipeline_mode<synchronous>, transform_indices = @transform_15, window_bounds = array<i64: 24, 8>}, {pipeline_mode = #tpu.pipeline_mode<synchronous>, transform_indices = @transform_16, window_bounds = array<i64: 1, 8>}, {pipeline_mode = #tpu.pipeline_mode<synchronous>, transform_indices = @transform_17, window_bounds = array<i64: 1, 8>}, {pipeline_mode = #tpu.pipeline_mode<synchronous>, transform_indices = @transform_18, window_bounds = array<i64: 1, 8>}, {pipeline_mode = #tpu.pipeline_mode<synchronous>, transform_indices = @transform_19, window_bounds = array<i64: 24, 8>}, {pipeline_mode = #tpu.pipeline_mode<synchronous>, transform_indices = @transform_20, window_bounds = array<i64: 1, 8>}, {pipeline_mode = #tpu.pipeline_mode<synchronous>, transform_indices = @transform_21, window_bounds = array<i64: 1, 8>}, {pipeline_mode = #tpu.pipeline_mode<synchronous>, transform_indices = @transform_22, window_bounds = array<i64: 1, 8>}, {pipeline_mode = #tpu.pipeline_mode<synchronous>, transform_indices = @transform_23, window_bounds = array<i64: 24, 8>}, {pipeline_mode = #tpu.pipeline_mode<synchronous>, transform_indices = @transform_24, window_bounds = array<i64: 1, 8>}, {pipeline_mode = #tpu.pipeline_mode<synchronous>, transform_indices = @transform_25, window_bounds = array<i64: 1, 8>}, {pipeline_mode = #tpu.pipeline_mode<synchronous>, transform_indices = @transform_26, window_bounds = array<i64: 1, 8>}, {pipeline_mode = #tpu.pipeline_mode<synchronous>, transform_indices = @transform_27, window_bounds = array<i64: 24, 8>}, {pipeline_mode = #tpu.pipeline_mode<synchronous>, transform_indices = @transform_28, window_bounds = array<i64: 1, 8>}, {pipeline_mode = #tpu.pipeline_mode<synchronous>, transform_indices = @transform_29, window_bounds = array<i64: 1, 8>}, {pipeline_mode = #tpu.pipeline_mode<synchronous>, transform_indices = @transform_30, window_bounds = array<i64: 1, 8>}, {pipeline_mode = #tpu.pipeline_mode<synchronous>, transform_indices = @transform_31, window_bounds = array<i64: 24, 8>}, {pipeline_mode = #tpu.pipeline_mode<synchronous>, transform_indices = @transform_32, window_bounds = array<i64: 1, 8>}, {pipeline_mode = #tpu.pipeline_mode<synchronous>, transform_indices = @transform_33, window_bounds = array<i64: 1, 8>}, {pipeline_mode = #tpu.pipeline_mode<synchronous>, transform_indices = @transform_34, window_bounds = array<i64: 1, 8>}, {pipeline_mode = #tpu.pipeline_mode<synchronous>, transform_indices = @transform_35, window_bounds = array<i64: 24, 16>}, {pipeline_mode = #tpu.pipeline_mode<synchronous>, transform_indices = @transform_36, window_bounds = array<i64: 1, 16>}, {pipeline_mode = #tpu.pipeline_mode<synchronous>, transform_indices = @transform_37, window_bounds = array<i64: 1, 8>}, {pipeline_mode = #tpu.pipeline_mode<synchronous>, transform_indices = @transform_38, window_bounds = array<i64: 1, 8>}, {pipeline_mode = #tpu.pipeline_mode<synchronous>, transform_indices = @transform_39, window_bounds = array<i64: 48, 16>}, {pipeline_mode = #tpu.pipeline_mode<synchronous>, transform_indices = @transform_40, window_bounds = array<i64: 1, 16>}, {pipeline_mode = #tpu.pipeline_mode<synchronous>, transform_indices = @transform_41, window_bounds = array<i64: 1, 16>}, {pipeline_mode = #tpu.pipeline_mode<synchronous>, transform_indices = @transform_42, window_bounds = array<i64: 1, 16>}, {pipeline_mode = #tpu.pipeline_mode<synchronous>, transform_indices = @transform_43, window_bounds = array<i64: 1, 16>}, {pipeline_mode = #tpu.pipeline_mode<synchronous>, transform_indices = @transform_44, window_bounds = array<i64: 1, 16>}, {pipeline_mode = #tpu.pipeline_mode<synchronous>, transform_indices = @transform_45, window_bounds = array<i64: 16, 5>}, {pipeline_mode = #tpu.pipeline_mode<synchronous>, transform_indices = @transform_46, window_bounds = array<i64: 1, 5>}, {transform_indices = @transform_47, window_bounds = array<i64: 1, 1, 5>}]} {
    %c0 = arith.constant 0 : index
    %c0_0 = arith.constant 0 : index
    %c0_1 = arith.constant 0 : index
    %0 = vector.load %arg1[%c0, %c0_0, %c0_1] : memref<1x16x4xf32, #tpu.memory_space<vmem>>, vector<1x16x4xf32>
    %1 = vector.shape_cast %0 : vector<1x16x4xf32> to vector<16x4xf32>
    %cst = arith.constant 0.000000e+00 : f32
    %2 = vector.broadcast %cst : f32 to vector<18x4xf32>
    %c0_2 = arith.constant 0 : index
    %c0_3 = arith.constant 0 : index
    %3 = vector.load %arg49[%c0_2, %c0_3] : memref<18x4xf32, #tpu.memory_space<vmem>>, vector<18x4xf32>
    tpu.vector_store %arg49[%c0_2, %c0_3], %2 {strides = array<i32>} : memref<18x4xf32, #tpu.memory_space<vmem>>, vector<18x4xf32>,
    %c1 = arith.constant 1 : index
    %c0_4 = arith.constant 0 : index
    %4 = vector.load %arg49[%c1, %c0_4] : memref<18x4xf32, #tpu.memory_space<vmem>>, vector<16x4xf32>
    tpu.vector_store %arg49[%c1, %c0_4], %1 {strides = array<i32>} : memref<18x4xf32, #tpu.memory_space<vmem>>, vector<16x4xf32>,
    %c0_5 = arith.constant 0 : index
    %c0_6 = arith.constant 0 : index
    %5 = vector.load %arg49[%c0_5, %c0_6] : memref<18x4xf32, #tpu.memory_space<vmem>>, vector<16x4xf32>
    %c1_7 = arith.constant 1 : index
    %c0_8 = arith.constant 0 : index
    %6 = vector.load %arg49[%c1_7, %c0_8] : memref<18x4xf32, #tpu.memory_space<vmem>>, vector<16x4xf32>
    %c2 = arith.constant 2 : index
    %c0_9 = arith.constant 0 : index
    %7 = vector.load %arg49[%c2, %c0_9] : memref<18x4xf32, #tpu.memory_space<vmem>>, vector<16x4xf32>
    %8 = tpu.concatenate %5, %6, %7 in 1 : vector<16x4xf32>, vector<16x4xf32>, vector<16x4xf32> -> vector<16x12xf32>
    %9 = arith.truncf %8 : vector<16x12xf32> to vector<16x12xbf16>
    %c0_10 = arith.constant 0 : index
    %c0_11 = arith.constant 0 : index
    %10 = vector.load %arg2[%c0_10, %c0_11] : memref<12x8xbf16, #tpu.memory_space<vmem>>, vector<12x8xbf16>
    %cst_12 = arith.constant dense<0.000000e+00> : vector<16x8xf32>
    %11 = tpu.matmul %9, %10, %cst_12 {dimension_numbers = #tpu.dot_dimension_numbers<[1], [0], [0], [1], [0, 0, 1, 1], [], []>} : vector<16x12xbf16>, vector<12x8xbf16>, vector<16x8xf32> -> vector<16x8xf32>
    %c0_13 = arith.constant 0 : index
    %c0_14 = arith.constant 0 : index
    %12 = vector.load %arg3[%c0_13, %c0_14] : memref<1x8xf32, #tpu.memory_space<vmem>>, vector<1x8xf32>
    %13 = vector.broadcast %12 : vector<1x8xf32> to vector<16x8xf32>
    %14 = arith.addf %11, %13 : vector<16x8xf32>
    %c0_15 = arith.constant 0 : index
    %c0_16 = arith.constant 0 : index
    %15 = vector.load %arg4[%c0_15, %c0_16] : memref<1x8xf32, #tpu.memory_space<vmem>>, vector<1x8xf32>
    %16 = vector.broadcast %15 : vector<1x8xf32> to vector<16x8xf32>
    %17 = arith.mulf %14, %16 : vector<16x8xf32>
    %c0_17 = arith.constant 0 : index
    %c0_18 = arith.constant 0 : index
    %18 = vector.load %arg5[%c0_17, %c0_18] : memref<1x8xf32, #tpu.memory_space<vmem>>, vector<1x8xf32>
    %19 = vector.broadcast %18 : vector<1x8xf32> to vector<16x8xf32>
    %20 = arith.addf %17, %19 : vector<16x8xf32>
    %cst_19 = arith.constant 0.000000e+00 : f32
    %21 = vector.broadcast %cst_19 : f32 to vector<16x8xf32>
    %22 = arith.maximumf %20, %21 : vector<16x8xf32>
    %cst_20 = arith.constant 0.000000e+00 : f32
    %23 = vector.broadcast %cst_20 : f32 to vector<18x8xf32>
    %c0_21 = arith.constant 0 : index
    %c0_22 = arith.constant 0 : index
    %24 = vector.load %arg50[%c0_21, %c0_22] : memref<18x8xf32, #tpu.memory_space<vmem>>, vector<18x8xf32>
    tpu.vector_store %arg50[%c0_21, %c0_22], %23 {strides = array<i32>} : memref<18x8xf32, #tpu.memory_space<vmem>>, vector<18x8xf32>,
    %c1_23 = arith.constant 1 : index
    %c0_24 = arith.constant 0 : index
    %25 = vector.load %arg50[%c1_23, %c0_24] : memref<18x8xf32, #tpu.memory_space<vmem>>, vector<16x8xf32>
    tpu.vector_store %arg50[%c1_23, %c0_24], %22 {strides = array<i32>} : memref<18x8xf32, #tpu.memory_space<vmem>>, vector<16x8xf32>,
    %c0_25 = arith.constant 0 : index
    %c0_26 = arith.constant 0 : index
    %26 = vector.load %arg50[%c0_25, %c0_26] : memref<18x8xf32, #tpu.memory_space<vmem>>, vector<16x8xf32>
    %c1_27 = arith.constant 1 : index
    %c0_28 = arith.constant 0 : index
    %27 = vector.load %arg50[%c1_27, %c0_28] : memref<18x8xf32, #tpu.memory_space<vmem>>, vector<16x8xf32>
    %c2_29 = arith.constant 2 : index
    %c0_30 = arith.constant 0 : index
    %28 = vector.load %arg50[%c2_29, %c0_30] : memref<18x8xf32, #tpu.memory_space<vmem>>, vector<16x8xf32>
    %29 = tpu.concatenate %26, %27, %28 in 1 : vector<16x8xf32>, vector<16x8xf32>, vector<16x8xf32> -> vector<16x24xf32>
    %30 = arith.truncf %29 : vector<16x24xf32> to vector<16x24xbf16>
    %c0_31 = arith.constant 0 : index
    %c0_32 = arith.constant 0 : index
    %31 = vector.load %arg6[%c0_31, %c0_32] : memref<24x8xbf16, #tpu.memory_space<vmem>>, vector<24x8xbf16>
    %cst_33 = arith.constant dense<0.000000e+00> : vector<16x8xf32>
    %32 = tpu.matmul %30, %31, %cst_33 {dimension_numbers = #tpu.dot_dimension_numbers<[1], [0], [0], [1], [0, 0, 1, 1], [], []>} : vector<16x24xbf16>, vector<24x8xbf16>, vector<16x8xf32> -> vector<16x8xf32>
    %c0_34 = arith.constant 0 : index
    %c0_35 = arith.constant 0 : index
    %33 = vector.load %arg7[%c0_34, %c0_35] : memref<1x8xf32, #tpu.memory_space<vmem>>, vector<1x8xf32>
    %34 = vector.broadcast %33 : vector<1x8xf32> to vector<16x8xf32>
    %35 = arith.addf %32, %34 : vector<16x8xf32>
    %c0_36 = arith.constant 0 : index
    %c0_37 = arith.constant 0 : index
    %36 = vector.load %arg10[%c0_36, %c0_37] : memref<1x8xf32, #tpu.memory_space<vmem>>, vector<1x8xf32>
    %37 = vector.broadcast %36 : vector<1x8xf32> to vector<16x8xf32>
    %38 = arith.mulf %35, %37 : vector<16x8xf32>
    %c0_38 = arith.constant 0 : index
    %c0_39 = arith.constant 0 : index
    %39 = vector.load %arg11[%c0_38, %c0_39] : memref<1x8xf32, #tpu.memory_space<vmem>>, vector<1x8xf32>
    %40 = vector.broadcast %39 : vector<1x8xf32> to vector<16x8xf32>
    %41 = arith.addf %38, %40 : vector<16x8xf32>
    %cst_40 = arith.constant 0.000000e+00 : f32
    %42 = vector.broadcast %cst_40 : f32 to vector<16x8xf32>
    %43 = arith.maximumf %41, %42 : vector<16x8xf32>
    %cst_41 = arith.constant 0.000000e+00 : f32
    %44 = vector.broadcast %cst_41 : f32 to vector<18x8xf32>
    %c0_42 = arith.constant 0 : index
    %c0_43 = arith.constant 0 : index
    %45 = vector.load %arg51[%c0_42, %c0_43] : memref<18x8xf32, #tpu.memory_space<vmem>>, vector<18x8xf32>
    tpu.vector_store %arg51[%c0_42, %c0_43], %44 {strides = array<i32>} : memref<18x8xf32, #tpu.memory_space<vmem>>, vector<18x8xf32>,
    %c1_44 = arith.constant 1 : index
    %c0_45 = arith.constant 0 : index
    %46 = vector.load %arg51[%c1_44, %c0_45] : memref<18x8xf32, #tpu.memory_space<vmem>>, vector<16x8xf32>
    tpu.vector_store %arg51[%c1_44, %c0_45], %43 {strides = array<i32>} : memref<18x8xf32, #tpu.memory_space<vmem>>, vector<16x8xf32>,
    %c0_46 = arith.constant 0 : index
    %c0_47 = arith.constant 0 : index
    %47 = vector.load %arg51[%c0_46, %c0_47] : memref<18x8xf32, #tpu.memory_space<vmem>>, vector<16x8xf32>
    %c1_48 = arith.constant 1 : index
    %c0_49 = arith.constant 0 : index
    %48 = vector.load %arg51[%c1_48, %c0_49] : memref<18x8xf32, #tpu.memory_space<vmem>>, vector<16x8xf32>
    %c2_50 = arith.constant 2 : index
    %c0_51 = arith.constant 0 : index
    %49 = vector.load %arg51[%c2_50, %c0_51] : memref<18x8xf32, #tpu.memory_space<vmem>>, vector<16x8xf32>
    %50 = tpu.concatenate %47, %48, %49 in 1 : vector<16x8xf32>, vector<16x8xf32>, vector<16x8xf32> -> vector<16x24xf32>
    %51 = arith.truncf %50 : vector<16x24xf32> to vector<16x24xbf16>
    %c0_52 = arith.constant 0 : index
    %c0_53 = arith.constant 0 : index
    %52 = vector.load %arg8[%c0_52, %c0_53] : memref<24x8xbf16, #tpu.memory_space<vmem>>, vector<24x8xbf16>
    %cst_54 = arith.constant dense<0.000000e+00> : vector<16x8xf32>
    %53 = tpu.matmul %51, %52, %cst_54 {dimension_numbers = #tpu.dot_dimension_numbers<[1], [0], [0], [1], [0, 0, 1, 1], [], []>} : vector<16x24xbf16>, vector<24x8xbf16>, vector<16x8xf32> -> vector<16x8xf32>
    %c0_55 = arith.constant 0 : index
    %c0_56 = arith.constant 0 : index
    %54 = vector.load %arg9[%c0_55, %c0_56] : memref<1x8xf32, #tpu.memory_space<vmem>>, vector<1x8xf32>
    %55 = vector.broadcast %54 : vector<1x8xf32> to vector<16x8xf32>
    %56 = arith.addf %53, %55 : vector<16x8xf32>
    %57 = arith.addf %56, %22 : vector<16x8xf32>
    %c0_57 = arith.constant 0 : index
    %c0_58 = arith.constant 0 : index
    %58 = vector.load %arg14[%c0_57, %c0_58] : memref<1x8xf32, #tpu.memory_space<vmem>>, vector<1x8xf32>
    %59 = vector.broadcast %58 : vector<1x8xf32> to vector<16x8xf32>
    %60 = arith.mulf %57, %59 : vector<16x8xf32>
    %c0_59 = arith.constant 0 : index
    %c0_60 = arith.constant 0 : index
    %61 = vector.load %arg15[%c0_59, %c0_60] : memref<1x8xf32, #tpu.memory_space<vmem>>, vector<1x8xf32>
    %62 = vector.broadcast %61 : vector<1x8xf32> to vector<16x8xf32>
    %63 = arith.addf %60, %62 : vector<16x8xf32>
    %cst_61 = arith.constant 0.000000e+00 : f32
    %64 = vector.broadcast %cst_61 : f32 to vector<16x8xf32>
    %65 = arith.maximumf %63, %64 : vector<16x8xf32>
    %cst_62 = arith.constant 0.000000e+00 : f32
    %66 = vector.broadcast %cst_62 : f32 to vector<17x8xf32>
    %c0_63 = arith.constant 0 : index
    %c0_64 = arith.constant 0 : index
    %67 = vector.load %arg52[%c0_63, %c0_64] : memref<17x8xf32, #tpu.memory_space<vmem>>, vector<17x8xf32>
    tpu.vector_store %arg52[%c0_63, %c0_64], %66 {strides = array<i32>} : memref<17x8xf32, #tpu.memory_space<vmem>>, vector<17x8xf32>,
    %c0_65 = arith.constant 0 : index
    %c0_66 = arith.constant 0 : index
    %68 = vector.load %arg52[%c0_65, %c0_66] : memref<17x8xf32, #tpu.memory_space<vmem>>, vector<16x8xf32>
    tpu.vector_store %arg52[%c0_65, %c0_66], %65 {strides = array<i32>} : memref<17x8xf32, #tpu.memory_space<vmem>>, vector<16x8xf32>,
    %c0_67 = arith.constant 0 : index
    %c0_68 = arith.constant 0 : index
    %69 = tpu.strided_load %arg52[%c0_67, %c0_68] {strides = array<i32: 2, 1>} : memref<17x8xf32, #tpu.memory_space<vmem>>, vector<8x8xf32>
    %c1_69 = arith.constant 1 : index
    %c0_70 = arith.constant 0 : index
    %70 = tpu.strided_load %arg52[%c1_69, %c0_70] {strides = array<i32: 2, 1>} : memref<17x8xf32, #tpu.memory_space<vmem>>, vector<8x8xf32>
    %c2_71 = arith.constant 2 : index
    %c0_72 = arith.constant 0 : index
    %71 = tpu.strided_load %arg52[%c2_71, %c0_72] {strides = array<i32: 2, 1>} : memref<17x8xf32, #tpu.memory_space<vmem>>, vector<8x8xf32>
    %72 = tpu.concatenate %69, %70, %71 in 1 : vector<8x8xf32>, vector<8x8xf32>, vector<8x8xf32> -> vector<8x24xf32>
    %73 = arith.truncf %72 : vector<8x24xf32> to vector<8x24xbf16>
    %c0_73 = arith.constant 0 : index
    %c0_74 = arith.constant 0 : index
    %74 = vector.load %arg12[%c0_73, %c0_74] : memref<24x8xbf16, #tpu.memory_space<vmem>>, vector<24x8xbf16>
    %cst_75 = arith.constant dense<0.000000e+00> : vector<8x8xf32>
    %75 = tpu.matmul %73, %74, %cst_75 {dimension_numbers = #tpu.dot_dimension_numbers<[1], [0], [0], [1], [0, 0, 1, 1], [], []>} : vector<8x24xbf16>, vector<24x8xbf16>, vector<8x8xf32> -> vector<8x8xf32>
    %c0_76 = arith.constant 0 : index
    %c0_77 = arith.constant 0 : index
    %76 = vector.load %arg13[%c0_76, %c0_77] : memref<1x8xf32, #tpu.memory_space<vmem>>, vector<1x8xf32>
    %77 = vector.broadcast %76 : vector<1x8xf32> to vector<8x8xf32>
    %78 = arith.addf %75, %77 : vector<8x8xf32>
    %c0_78 = arith.constant 0 : index
    %c0_79 = arith.constant 0 : index
    %79 = vector.load %arg18[%c0_78, %c0_79] : memref<1x8xf32, #tpu.memory_space<vmem>>, vector<1x8xf32>
    %80 = vector.broadcast %79 : vector<1x8xf32> to vector<8x8xf32>
    %81 = arith.mulf %78, %80 : vector<8x8xf32>
    %c0_80 = arith.constant 0 : index
    %c0_81 = arith.constant 0 : index
    %82 = vector.load %arg19[%c0_80, %c0_81] : memref<1x8xf32, #tpu.memory_space<vmem>>, vector<1x8xf32>
    %83 = vector.broadcast %82 : vector<1x8xf32> to vector<8x8xf32>
    %84 = arith.addf %81, %83 : vector<8x8xf32>
    %cst_82 = arith.constant 0.000000e+00 : f32
    %85 = vector.broadcast %cst_82 : f32 to vector<8x8xf32>
    %86 = arith.maximumf %84, %85 : vector<8x8xf32>
    %cst_83 = arith.constant 0.000000e+00 : f32
    %87 = vector.broadcast %cst_83 : f32 to vector<10x8xf32>
    %c0_84 = arith.constant 0 : index
    %c0_85 = arith.constant 0 : index
    %88 = vector.load %arg53[%c0_84, %c0_85] : memref<10x8xf32, #tpu.memory_space<vmem>>, vector<10x8xf32>
    tpu.vector_store %arg53[%c0_84, %c0_85], %87 {strides = array<i32>} : memref<10x8xf32, #tpu.memory_space<vmem>>, vector<10x8xf32>,
    %c1_86 = arith.constant 1 : index
    %c0_87 = arith.constant 0 : index
    %89 = vector.load %arg53[%c1_86, %c0_87] : memref<10x8xf32, #tpu.memory_space<vmem>>, vector<8x8xf32>
    tpu.vector_store %arg53[%c1_86, %c0_87], %86 {strides = array<i32>} : memref<10x8xf32, #tpu.memory_space<vmem>>, vector<8x8xf32>,
    %c0_88 = arith.constant 0 : index
    %c0_89 = arith.constant 0 : index
    %90 = vector.load %arg53[%c0_88, %c0_89] : memref<10x8xf32, #tpu.memory_space<vmem>>, vector<8x8xf32>
    %c1_90 = arith.constant 1 : index
    %c0_91 = arith.constant 0 : index
    %91 = vector.load %arg53[%c1_90, %c0_91] : memref<10x8xf32, #tpu.memory_space<vmem>>, vector<8x8xf32>
    %c2_92 = arith.constant 2 : index
    %c0_93 = arith.constant 0 : index
    %92 = vector.load %arg53[%c2_92, %c0_93] : memref<10x8xf32, #tpu.memory_space<vmem>>, vector<8x8xf32>
    %93 = tpu.concatenate %90, %91, %92 in 1 : vector<8x8xf32>, vector<8x8xf32>, vector<8x8xf32> -> vector<8x24xf32>
    %94 = arith.truncf %93 : vector<8x24xf32> to vector<8x24xbf16>
    %c0_94 = arith.constant 0 : index
    %c0_95 = arith.constant 0 : index
    %95 = vector.load %arg16[%c0_94, %c0_95] : memref<24x8xbf16, #tpu.memory_space<vmem>>, vector<24x8xbf16>
    %cst_96 = arith.constant dense<0.000000e+00> : vector<8x8xf32>
    %96 = tpu.matmul %94, %95, %cst_96 {dimension_numbers = #tpu.dot_dimension_numbers<[1], [0], [0], [1], [0, 0, 1, 1], [], []>} : vector<8x24xbf16>, vector<24x8xbf16>, vector<8x8xf32> -> vector<8x8xf32>
    %c0_97 = arith.constant 0 : index
    %c0_98 = arith.constant 0 : index
    %97 = vector.load %arg17[%c0_97, %c0_98] : memref<1x8xf32, #tpu.memory_space<vmem>>, vector<1x8xf32>
    %98 = vector.broadcast %97 : vector<1x8xf32> to vector<8x8xf32>
    %99 = arith.addf %96, %98 : vector<8x8xf32>
    %cst_99 = arith.constant 0.000000e+00 : f32
    %100 = vector.broadcast %cst_99 : f32 to vector<17x8xf32>
    %c0_100 = arith.constant 0 : index
    %c0_101 = arith.constant 0 : index
    %101 = vector.load %arg54[%c0_100, %c0_101] : memref<17x8xf32, #tpu.memory_space<vmem>>, vector<17x8xf32>
    tpu.vector_store %arg54[%c0_100, %c0_101], %100 {strides = array<i32>} : memref<17x8xf32, #tpu.memory_space<vmem>>, vector<17x8xf32>,
    %c0_102 = arith.constant 0 : index
    %c0_103 = arith.constant 0 : index
    %102 = vector.load %arg54[%c0_102, %c0_103] : memref<17x8xf32, #tpu.memory_space<vmem>>, vector<16x8xf32>
    tpu.vector_store %arg54[%c0_102, %c0_103], %57 {strides = array<i32>} : memref<17x8xf32, #tpu.memory_space<vmem>>, vector<16x8xf32>,
    %c0_104 = arith.constant 0 : index
    %c0_105 = arith.constant 0 : index
    %103 = tpu.strided_load %arg54[%c0_104, %c0_105] {strides = array<i32: 2, 1>} : memref<17x8xf32, #tpu.memory_space<vmem>>, vector<8x8xf32>
    %c1_106 = arith.constant 1 : index
    %c0_107 = arith.constant 0 : index
    %104 = tpu.strided_load %arg54[%c1_106, %c0_107] {strides = array<i32: 2, 1>} : memref<17x8xf32, #tpu.memory_space<vmem>>, vector<8x8xf32>
    %105 = arith.maximumf %103, %104 : vector<8x8xf32>
    %106 = arith.addf %99, %105 : vector<8x8xf32>
    %c0_108 = arith.constant 0 : index
    %c0_109 = arith.constant 0 : index
    %107 = vector.load %arg22[%c0_108, %c0_109] : memref<1x8xf32, #tpu.memory_space<vmem>>, vector<1x8xf32>
    %108 = vector.broadcast %107 : vector<1x8xf32> to vector<8x8xf32>
    %109 = arith.mulf %106, %108 : vector<8x8xf32>
    %c0_110 = arith.constant 0 : index
    %c0_111 = arith.constant 0 : index
    %110 = vector.load %arg23[%c0_110, %c0_111] : memref<1x8xf32, #tpu.memory_space<vmem>>, vector<1x8xf32>
    %111 = vector.broadcast %110 : vector<1x8xf32> to vector<8x8xf32>
    %112 = arith.addf %109, %111 : vector<8x8xf32>
    %cst_112 = arith.constant 0.000000e+00 : f32
    %113 = vector.broadcast %cst_112 : f32 to vector<8x8xf32>
    %114 = arith.maximumf %112, %113 : vector<8x8xf32>
    %cst_113 = arith.constant 0.000000e+00 : f32
    %115 = vector.broadcast %cst_113 : f32 to vector<10x8xf32>
    %c0_114 = arith.constant 0 : index
    %c0_115 = arith.constant 0 : index
    %116 = vector.load %arg55[%c0_114, %c0_115] : memref<10x8xf32, #tpu.memory_space<vmem>>, vector<10x8xf32>
    tpu.vector_store %arg55[%c0_114, %c0_115], %115 {strides = array<i32>} : memref<10x8xf32, #tpu.memory_space<vmem>>, vector<10x8xf32>,
    %c1_116 = arith.constant 1 : index
    %c0_117 = arith.constant 0 : index
    %117 = vector.load %arg55[%c1_116, %c0_117] : memref<10x8xf32, #tpu.memory_space<vmem>>, vector<8x8xf32>
    tpu.vector_store %arg55[%c1_116, %c0_117], %114 {strides = array<i32>} : memref<10x8xf32, #tpu.memory_space<vmem>>, vector<8x8xf32>,
    %c0_118 = arith.constant 0 : index
    %c0_119 = arith.constant 0 : index
    %118 = vector.load %arg55[%c0_118, %c0_119] : memref<10x8xf32, #tpu.memory_space<vmem>>, vector<8x8xf32>
    %c1_120 = arith.constant 1 : index
    %c0_121 = arith.constant 0 : index
    %119 = vector.load %arg55[%c1_120, %c0_121] : memref<10x8xf32, #tpu.memory_space<vmem>>, vector<8x8xf32>
    %c2_122 = arith.constant 2 : index
    %c0_123 = arith.constant 0 : index
    %120 = vector.load %arg55[%c2_122, %c0_123] : memref<10x8xf32, #tpu.memory_space<vmem>>, vector<8x8xf32>
    %121 = tpu.concatenate %118, %119, %120 in 1 : vector<8x8xf32>, vector<8x8xf32>, vector<8x8xf32> -> vector<8x24xf32>
    %122 = arith.truncf %121 : vector<8x24xf32> to vector<8x24xbf16>
    %c0_124 = arith.constant 0 : index
    %c0_125 = arith.constant 0 : index
    %123 = vector.load %arg20[%c0_124, %c0_125] : memref<24x8xbf16, #tpu.memory_space<vmem>>, vector<24x8xbf16>
    %cst_126 = arith.constant dense<0.000000e+00> : vector<8x8xf32>
    %124 = tpu.matmul %122, %123, %cst_126 {dimension_numbers = #tpu.dot_dimension_numbers<[1], [0], [0], [1], [0, 0, 1, 1], [], []>} : vector<8x24xbf16>, vector<24x8xbf16>, vector<8x8xf32> -> vector<8x8xf32>
    %c0_127 = arith.constant 0 : index
    %c0_128 = arith.constant 0 : index
    %125 = vector.load %arg21[%c0_127, %c0_128] : memref<1x8xf32, #tpu.memory_space<vmem>>, vector<1x8xf32>
    %126 = vector.broadcast %125 : vector<1x8xf32> to vector<8x8xf32>
    %127 = arith.addf %124, %126 : vector<8x8xf32>
    %c0_129 = arith.constant 0 : index
    %c0_130 = arith.constant 0 : index
    %128 = vector.load %arg26[%c0_129, %c0_130] : memref<1x8xf32, #tpu.memory_space<vmem>>, vector<1x8xf32>
    %129 = vector.broadcast %128 : vector<1x8xf32> to vector<8x8xf32>
    %130 = arith.mulf %127, %129 : vector<8x8xf32>
    %c0_131 = arith.constant 0 : index
    %c0_132 = arith.constant 0 : index
    %131 = vector.load %arg27[%c0_131, %c0_132] : memref<1x8xf32, #tpu.memory_space<vmem>>, vector<1x8xf32>
    %132 = vector.broadcast %131 : vector<1x8xf32> to vector<8x8xf32>
    %133 = arith.addf %130, %132 : vector<8x8xf32>
    %cst_133 = arith.constant 0.000000e+00 : f32
    %134 = vector.broadcast %cst_133 : f32 to vector<8x8xf32>
    %135 = arith.maximumf %133, %134 : vector<8x8xf32>
    %cst_134 = arith.constant 0.000000e+00 : f32
    %136 = vector.broadcast %cst_134 : f32 to vector<10x8xf32>
    %c0_135 = arith.constant 0 : index
    %c0_136 = arith.constant 0 : index
    %137 = vector.load %arg56[%c0_135, %c0_136] : memref<10x8xf32, #tpu.memory_space<vmem>>, vector<10x8xf32>
    tpu.vector_store %arg56[%c0_135, %c0_136], %136 {strides = array<i32>} : memref<10x8xf32, #tpu.memory_space<vmem>>, vector<10x8xf32>,
    %c1_137 = arith.constant 1 : index
    %c0_138 = arith.constant 0 : index
    %138 = vector.load %arg56[%c1_137, %c0_138] : memref<10x8xf32, #tpu.memory_space<vmem>>, vector<8x8xf32>
    tpu.vector_store %arg56[%c1_137, %c0_138], %135 {strides = array<i32>} : memref<10x8xf32, #tpu.memory_space<vmem>>, vector<8x8xf32>,
    %c0_139 = arith.constant 0 : index
    %c0_140 = arith.constant 0 : index
    %139 = vector.load %arg56[%c0_139, %c0_140] : memref<10x8xf32, #tpu.memory_space<vmem>>, vector<8x8xf32>
    %c1_141 = arith.constant 1 : index
    %c0_142 = arith.constant 0 : index
    %140 = vector.load %arg56[%c1_141, %c0_142] : memref<10x8xf32, #tpu.memory_space<vmem>>, vector<8x8xf32>
    %c2_143 = arith.constant 2 : index
    %c0_144 = arith.constant 0 : index
    %141 = vector.load %arg56[%c2_143, %c0_144] : memref<10x8xf32, #tpu.memory_space<vmem>>, vector<8x8xf32>
    %142 = tpu.concatenate %139, %140, %141 in 1 : vector<8x8xf32>, vector<8x8xf32>, vector<8x8xf32> -> vector<8x24xf32>
    %143 = arith.truncf %142 : vector<8x24xf32> to vector<8x24xbf16>
    %c0_145 = arith.constant 0 : index
    %c0_146 = arith.constant 0 : index
    %144 = vector.load %arg24[%c0_145, %c0_146] : memref<24x8xbf16, #tpu.memory_space<vmem>>, vector<24x8xbf16>
    %cst_147 = arith.constant dense<0.000000e+00> : vector<8x8xf32>
    %145 = tpu.matmul %143, %144, %cst_147 {dimension_numbers = #tpu.dot_dimension_numbers<[1], [0], [0], [1], [0, 0, 1, 1], [], []>} : vector<8x24xbf16>, vector<24x8xbf16>, vector<8x8xf32> -> vector<8x8xf32>
    %c0_148 = arith.constant 0 : index
    %c0_149 = arith.constant 0 : index
    %146 = vector.load %arg25[%c0_148, %c0_149] : memref<1x8xf32, #tpu.memory_space<vmem>>, vector<1x8xf32>
    %147 = vector.broadcast %146 : vector<1x8xf32> to vector<8x8xf32>
    %148 = arith.addf %145, %147 : vector<8x8xf32>
    %149 = arith.addf %148, %106 : vector<8x8xf32>
    %c0_150 = arith.constant 0 : index
    %c0_151 = arith.constant 0 : index
    %150 = vector.load %arg30[%c0_150, %c0_151] : memref<1x8xf32, #tpu.memory_space<vmem>>, vector<1x8xf32>
    %151 = vector.broadcast %150 : vector<1x8xf32> to vector<8x8xf32>
    %152 = arith.mulf %149, %151 : vector<8x8xf32>
    %c0_152 = arith.constant 0 : index
    %c0_153 = arith.constant 0 : index
    %153 = vector.load %arg31[%c0_152, %c0_153] : memref<1x8xf32, #tpu.memory_space<vmem>>, vector<1x8xf32>
    %154 = vector.broadcast %153 : vector<1x8xf32> to vector<8x8xf32>
    %155 = arith.addf %152, %154 : vector<8x8xf32>
    %cst_154 = arith.constant 0.000000e+00 : f32
    %156 = vector.broadcast %cst_154 : f32 to vector<8x8xf32>
    %157 = arith.maximumf %155, %156 : vector<8x8xf32>
    %cst_155 = arith.constant 0.000000e+00 : f32
    %158 = vector.broadcast %cst_155 : f32 to vector<9x8xf32>
    %c0_156 = arith.constant 0 : index
    %c0_157 = arith.constant 0 : index
    %159 = vector.load %arg57[%c0_156, %c0_157] : memref<9x8xf32, #tpu.memory_space<vmem>>, vector<9x8xf32>
    tpu.vector_store %arg57[%c0_156, %c0_157], %158 {strides = array<i32>} : memref<9x8xf32, #tpu.memory_space<vmem>>, vector<9x8xf32>,
    %c0_158 = arith.constant 0 : index
    %c0_159 = arith.constant 0 : index
    %160 = vector.load %arg57[%c0_158, %c0_159] : memref<9x8xf32, #tpu.memory_space<vmem>>, vector<8x8xf32>
    tpu.vector_store %arg57[%c0_158, %c0_159], %157 {strides = array<i32>} : memref<9x8xf32, #tpu.memory_space<vmem>>, vector<8x8xf32>,
    %c0_160 = arith.constant 0 : index
    %c0_161 = arith.constant 0 : index
    %161 = tpu.strided_load %arg57[%c0_160, %c0_161] {strides = array<i32: 2, 1>} : memref<9x8xf32, #tpu.memory_space<vmem>>, vector<4x8xf32>
    %c1_162 = arith.constant 1 : index
    %c0_163 = arith.constant 0 : index
    %162 = tpu.strided_load %arg57[%c1_162, %c0_163] {strides = array<i32: 2, 1>} : memref<9x8xf32, #tpu.memory_space<vmem>>, vector<4x8xf32>
    %c2_164 = arith.constant 2 : index
    %c0_165 = arith.constant 0 : index
    %163 = tpu.strided_load %arg57[%c2_164, %c0_165] {strides = array<i32: 2, 1>} : memref<9x8xf32, #tpu.memory_space<vmem>>, vector<4x8xf32>
    %164 = tpu.concatenate %161, %162, %163 in 1 : vector<4x8xf32>, vector<4x8xf32>, vector<4x8xf32> -> vector<4x24xf32>
    %165 = arith.truncf %164 : vector<4x24xf32> to vector<4x24xbf16>
    %c0_166 = arith.constant 0 : index
    %c0_167 = arith.constant 0 : index
    %166 = vector.load %arg28[%c0_166, %c0_167] : memref<24x8xbf16, #tpu.memory_space<vmem>>, vector<24x8xbf16>
    %cst_168 = arith.constant dense<0.000000e+00> : vector<4x8xf32>
    %167 = tpu.matmul %165, %166, %cst_168 {dimension_numbers = #tpu.dot_dimension_numbers<[1], [0], [0], [1], [0, 0, 1, 1], [], []>} : vector<4x24xbf16>, vector<24x8xbf16>, vector<4x8xf32> -> vector<4x8xf32>
    %c0_169 = arith.constant 0 : index
    %c0_170 = arith.constant 0 : index
    %168 = vector.load %arg29[%c0_169, %c0_170] : memref<1x8xf32, #tpu.memory_space<vmem>>, vector<1x8xf32>
    %169 = vector.broadcast %168 : vector<1x8xf32> to vector<4x8xf32>
    %170 = arith.addf %167, %169 : vector<4x8xf32>
    %c0_171 = arith.constant 0 : index
    %c0_172 = arith.constant 0 : index
    %171 = vector.load %arg34[%c0_171, %c0_172] : memref<1x8xf32, #tpu.memory_space<vmem>>, vector<1x8xf32>
    %172 = vector.broadcast %171 : vector<1x8xf32> to vector<4x8xf32>
    %173 = arith.mulf %170, %172 : vector<4x8xf32>
    %c0_173 = arith.constant 0 : index
    %c0_174 = arith.constant 0 : index
    %174 = vector.load %arg35[%c0_173, %c0_174] : memref<1x8xf32, #tpu.memory_space<vmem>>, vector<1x8xf32>
    %175 = vector.broadcast %174 : vector<1x8xf32> to vector<4x8xf32>
    %176 = arith.addf %173, %175 : vector<4x8xf32>
    %cst_175 = arith.constant 0.000000e+00 : f32
    %177 = vector.broadcast %cst_175 : f32 to vector<4x8xf32>
    %178 = arith.maximumf %176, %177 : vector<4x8xf32>
    %cst_176 = arith.constant 0.000000e+00 : f32
    %179 = vector.broadcast %cst_176 : f32 to vector<6x8xf32>
    %c0_177 = arith.constant 0 : index
    %c0_178 = arith.constant 0 : index
    %180 = vector.load %arg58[%c0_177, %c0_178] : memref<6x8xf32, #tpu.memory_space<vmem>>, vector<6x8xf32>
    tpu.vector_store %arg58[%c0_177, %c0_178], %179 {strides = array<i32>} : memref<6x8xf32, #tpu.memory_space<vmem>>, vector<6x8xf32>,
    %c1_179 = arith.constant 1 : index
    %c0_180 = arith.constant 0 : index
    %181 = vector.load %arg58[%c1_179, %c0_180] : memref<6x8xf32, #tpu.memory_space<vmem>>, vector<4x8xf32>
    tpu.vector_store %arg58[%c1_179, %c0_180], %178 {strides = array<i32>} : memref<6x8xf32, #tpu.memory_space<vmem>>, vector<4x8xf32>,
    %c0_181 = arith.constant 0 : index
    %c0_182 = arith.constant 0 : index
    %182 = vector.load %arg58[%c0_181, %c0_182] : memref<6x8xf32, #tpu.memory_space<vmem>>, vector<4x8xf32>
    %c1_183 = arith.constant 1 : index
    %c0_184 = arith.constant 0 : index
    %183 = vector.load %arg58[%c1_183, %c0_184] : memref<6x8xf32, #tpu.memory_space<vmem>>, vector<4x8xf32>
    %c2_185 = arith.constant 2 : index
    %c0_186 = arith.constant 0 : index
    %184 = vector.load %arg58[%c2_185, %c0_186] : memref<6x8xf32, #tpu.memory_space<vmem>>, vector<4x8xf32>
    %185 = tpu.concatenate %182, %183, %184 in 1 : vector<4x8xf32>, vector<4x8xf32>, vector<4x8xf32> -> vector<4x24xf32>
    %186 = arith.truncf %185 : vector<4x24xf32> to vector<4x24xbf16>
    %c0_187 = arith.constant 0 : index
    %c0_188 = arith.constant 0 : index
    %187 = vector.load %arg32[%c0_187, %c0_188] : memref<24x8xbf16, #tpu.memory_space<vmem>>, vector<24x8xbf16>
    %cst_189 = arith.constant dense<0.000000e+00> : vector<4x8xf32>
    %188 = tpu.matmul %186, %187, %cst_189 {dimension_numbers = #tpu.dot_dimension_numbers<[1], [0], [0], [1], [0, 0, 1, 1], [], []>} : vector<4x24xbf16>, vector<24x8xbf16>, vector<4x8xf32> -> vector<4x8xf32>
    %c0_190 = arith.constant 0 : index
    %c0_191 = arith.constant 0 : index
    %189 = vector.load %arg33[%c0_190, %c0_191] : memref<1x8xf32, #tpu.memory_space<vmem>>, vector<1x8xf32>
    %190 = vector.broadcast %189 : vector<1x8xf32> to vector<4x8xf32>
    %191 = arith.addf %188, %190 : vector<4x8xf32>
    %cst_192 = arith.constant 0.000000e+00 : f32
    %192 = vector.broadcast %cst_192 : f32 to vector<9x8xf32>
    %c0_193 = arith.constant 0 : index
    %c0_194 = arith.constant 0 : index
    %193 = vector.load %arg59[%c0_193, %c0_194] : memref<9x8xf32, #tpu.memory_space<vmem>>, vector<9x8xf32>
    tpu.vector_store %arg59[%c0_193, %c0_194], %192 {strides = array<i32>} : memref<9x8xf32, #tpu.memory_space<vmem>>, vector<9x8xf32>,
    %c0_195 = arith.constant 0 : index
    %c0_196 = arith.constant 0 : index
    %194 = vector.load %arg59[%c0_195, %c0_196] : memref<9x8xf32, #tpu.memory_space<vmem>>, vector<8x8xf32>
    tpu.vector_store %arg59[%c0_195, %c0_196], %149 {strides = array<i32>} : memref<9x8xf32, #tpu.memory_space<vmem>>, vector<8x8xf32>,
    %c0_197 = arith.constant 0 : index
    %c0_198 = arith.constant 0 : index
    %195 = tpu.strided_load %arg59[%c0_197, %c0_198] {strides = array<i32: 2, 1>} : memref<9x8xf32, #tpu.memory_space<vmem>>, vector<4x8xf32>
    %c1_199 = arith.constant 1 : index
    %c0_200 = arith.constant 0 : index
    %196 = tpu.strided_load %arg59[%c1_199, %c0_200] {strides = array<i32: 2, 1>} : memref<9x8xf32, #tpu.memory_space<vmem>>, vector<4x8xf32>
    %197 = arith.maximumf %195, %196 : vector<4x8xf32>
    %198 = arith.addf %191, %197 : vector<4x8xf32>
    %c0_201 = arith.constant 0 : index
    %c0_202 = arith.constant 0 : index
    %199 = vector.load %arg38[%c0_201, %c0_202] : memref<1x8xf32, #tpu.memory_space<vmem>>, vector<1x8xf32>
    %200 = vector.broadcast %199 : vector<1x8xf32> to vector<4x8xf32>
    %201 = arith.mulf %198, %200 : vector<4x8xf32>
    %c0_203 = arith.constant 0 : index
    %c0_204 = arith.constant 0 : index
    %202 = vector.load %arg39[%c0_203, %c0_204] : memref<1x8xf32, #tpu.memory_space<vmem>>, vector<1x8xf32>
    %203 = vector.broadcast %202 : vector<1x8xf32> to vector<4x8xf32>
    %204 = arith.addf %201, %203 : vector<4x8xf32>
    %cst_205 = arith.constant 0.000000e+00 : f32
    %205 = vector.broadcast %cst_205 : f32 to vector<4x8xf32>
    %206 = arith.maximumf %204, %205 : vector<4x8xf32>
    %cst_206 = arith.constant 0.000000e+00 : f32
    %207 = vector.broadcast %cst_206 : f32 to vector<6x8xf32>
    %c0_207 = arith.constant 0 : index
    %c0_208 = arith.constant 0 : index
    %208 = vector.load %arg60[%c0_207, %c0_208] : memref<6x8xf32, #tpu.memory_space<vmem>>, vector<6x8xf32>
    tpu.vector_store %arg60[%c0_207, %c0_208], %207 {strides = array<i32>} : memref<6x8xf32, #tpu.memory_space<vmem>>, vector<6x8xf32>,
    %c1_209 = arith.constant 1 : index
    %c0_210 = arith.constant 0 : index
    %209 = vector.load %arg60[%c1_209, %c0_210] : memref<6x8xf32, #tpu.memory_space<vmem>>, vector<4x8xf32>
    tpu.vector_store %arg60[%c1_209, %c0_210], %206 {strides = array<i32>} : memref<6x8xf32, #tpu.memory_space<vmem>>, vector<4x8xf32>,
    %c0_211 = arith.constant 0 : index
    %c0_212 = arith.constant 0 : index
    %210 = vector.load %arg60[%c0_211, %c0_212] : memref<6x8xf32, #tpu.memory_space<vmem>>, vector<4x8xf32>
    %c1_213 = arith.constant 1 : index
    %c0_214 = arith.constant 0 : index
    %211 = vector.load %arg60[%c1_213, %c0_214] : memref<6x8xf32, #tpu.memory_space<vmem>>, vector<4x8xf32>
    %c2_215 = arith.constant 2 : index
    %c0_216 = arith.constant 0 : index
    %212 = vector.load %arg60[%c2_215, %c0_216] : memref<6x8xf32, #tpu.memory_space<vmem>>, vector<4x8xf32>
    %213 = tpu.concatenate %210, %211, %212 in 1 : vector<4x8xf32>, vector<4x8xf32>, vector<4x8xf32> -> vector<4x24xf32>
    %214 = arith.truncf %213 : vector<4x24xf32> to vector<4x24xbf16>
    %c0_217 = arith.constant 0 : index
    %c0_218 = arith.constant 0 : index
    %215 = vector.load %arg36[%c0_217, %c0_218] : memref<24x16xbf16, #tpu.memory_space<vmem>>, vector<24x16xbf16>
    %cst_219 = arith.constant dense<0.000000e+00> : vector<4x16xf32>
    %216 = tpu.matmul %214, %215, %cst_219 {dimension_numbers = #tpu.dot_dimension_numbers<[1], [0], [0], [1], [0, 0, 1, 1], [], []>} : vector<4x24xbf16>, vector<24x16xbf16>, vector<4x16xf32> -> vector<4x16xf32>
    %c0_220 = arith.constant 0 : index
    %c0_221 = arith.constant 0 : index
    %217 = vector.load %arg37[%c0_220, %c0_221] : memref<1x16xf32, #tpu.memory_space<vmem>>, vector<1x16xf32>
    %218 = vector.broadcast %217 : vector<1x16xf32> to vector<4x16xf32>
    %219 = arith.addf %216, %218 : vector<4x16xf32>
    %c0_222 = arith.constant 0 : index
    %c0_223 = arith.constant 0 : index
    %220 = vector.load %arg42[%c0_222, %c0_223] : memref<1x16xf32, #tpu.memory_space<vmem>>, vector<1x16xf32>
    %221 = vector.broadcast %220 : vector<1x16xf32> to vector<4x16xf32>
    %222 = arith.mulf %219, %221 : vector<4x16xf32>
    %c0_224 = arith.constant 0 : index
    %c0_225 = arith.constant 0 : index
    %223 = vector.load %arg43[%c0_224, %c0_225] : memref<1x16xf32, #tpu.memory_space<vmem>>, vector<1x16xf32>
    %224 = vector.broadcast %223 : vector<1x16xf32> to vector<4x16xf32>
    %225 = arith.addf %222, %224 : vector<4x16xf32>
    %cst_226 = arith.constant 0.000000e+00 : f32
    %226 = vector.broadcast %cst_226 : f32 to vector<4x16xf32>
    %227 = arith.maximumf %225, %226 : vector<4x16xf32>
    %cst_227 = arith.constant 0.000000e+00 : f32
    %228 = vector.broadcast %cst_227 : f32 to vector<6x16xf32>
    %c0_228 = arith.constant 0 : index
    %c0_229 = arith.constant 0 : index
    %229 = vector.load %arg61[%c0_228, %c0_229] : memref<6x16xf32, #tpu.memory_space<vmem>>, vector<6x16xf32>
    tpu.vector_store %arg61[%c0_228, %c0_229], %228 {strides = array<i32>} : memref<6x16xf32, #tpu.memory_space<vmem>>, vector<6x16xf32>,
    %c1_230 = arith.constant 1 : index
    %c0_231 = arith.constant 0 : index
    %230 = vector.load %arg61[%c1_230, %c0_231] : memref<6x16xf32, #tpu.memory_space<vmem>>, vector<4x16xf32>
    tpu.vector_store %arg61[%c1_230, %c0_231], %227 {strides = array<i32>} : memref<6x16xf32, #tpu.memory_space<vmem>>, vector<4x16xf32>,
    %c0_232 = arith.constant 0 : index
    %c0_233 = arith.constant 0 : index
    %231 = vector.load %arg61[%c0_232, %c0_233] : memref<6x16xf32, #tpu.memory_space<vmem>>, vector<4x16xf32>
    %c1_234 = arith.constant 1 : index
    %c0_235 = arith.constant 0 : index
    %232 = vector.load %arg61[%c1_234, %c0_235] : memref<6x16xf32, #tpu.memory_space<vmem>>, vector<4x16xf32>
    %c2_236 = arith.constant 2 : index
    %c0_237 = arith.constant 0 : index
    %233 = vector.load %arg61[%c2_236, %c0_237] : memref<6x16xf32, #tpu.memory_space<vmem>>, vector<4x16xf32>
    %234 = tpu.concatenate %231, %232, %233 in 1 : vector<4x16xf32>, vector<4x16xf32>, vector<4x16xf32> -> vector<4x48xf32>
    %235 = arith.truncf %234 : vector<4x48xf32> to vector<4x48xbf16>
    %c0_238 = arith.constant 0 : index
    %c0_239 = arith.constant 0 : index
    %236 = vector.load %arg40[%c0_238, %c0_239] : memref<48x16xbf16, #tpu.memory_space<vmem>>, vector<48x16xbf16>
    %cst_240 = arith.constant dense<0.000000e+00> : vector<4x16xf32>
    %237 = tpu.matmul %235, %236, %cst_240 {dimension_numbers = #tpu.dot_dimension_numbers<[1], [0], [0], [1], [0, 0, 1, 1], [], []>} : vector<4x48xbf16>, vector<48x16xbf16>, vector<4x16xf32> -> vector<4x16xf32>
    %c0_241 = arith.constant 0 : index
    %c0_242 = arith.constant 0 : index
    %238 = vector.load %arg41[%c0_241, %c0_242] : memref<1x16xf32, #tpu.memory_space<vmem>>, vector<1x16xf32>
    %239 = vector.broadcast %238 : vector<1x16xf32> to vector<4x16xf32>
    %240 = arith.addf %237, %239 : vector<4x16xf32>
    %cst_243 = arith.constant 0.000000e+00 : f32
    %241 = vector.broadcast %cst_243 : f32 to vector<4x4xf32>
    %cst_244 = arith.constant 0.000000e+00 : f32
    %242 = vector.broadcast %cst_244 : f32 to vector<4x4xf32>
    %243 = tpu.concatenate %241, %198, %242 in 1 : vector<4x4xf32>, vector<4x8xf32>, vector<4x4xf32> -> vector<4x16xf32>
    %244 = arith.addf %240, %243 : vector<4x16xf32>
    %c0_245 = arith.constant 0 : index
    %c0_246 = arith.constant 0 : index
    %245 = vector.load %arg44[%c0_245, %c0_246] : memref<1x16xf32, #tpu.memory_space<vmem>>, vector<1x16xf32>
    %246 = vector.broadcast %245 : vector<1x16xf32> to vector<4x16xf32>
    %247 = arith.mulf %244, %246 : vector<4x16xf32>
    %c0_247 = arith.constant 0 : index
    %c0_248 = arith.constant 0 : index
    %248 = vector.load %arg45[%c0_247, %c0_248] : memref<1x16xf32, #tpu.memory_space<vmem>>, vector<1x16xf32>
    %249 = vector.broadcast %248 : vector<1x16xf32> to vector<4x16xf32>
    %250 = arith.addf %247, %249 : vector<4x16xf32>
    %cst_249 = arith.constant 0.000000e+00 : f32
    %251 = vector.broadcast %cst_249 : f32 to vector<4x16xf32>
    %252 = arith.maximumf %250, %251 : vector<4x16xf32>
    %cst_250 = arith.constant dense<0.000000e+00> : vector<16xf32>
    %253 = vector.multi_reduction <add>, %252, %cst_250 [0] : vector<4x16xf32> to vector<16xf32>
    %254 = vector.shape_cast %253 : vector<16xf32> to vector<1x16xf32>
    %cst_251 = arith.constant 4.000000e+00 : f32
    %255 = vector.broadcast %cst_251 : f32 to vector<1x16xf32>
    %256 = arith.divf %254, %255 : vector<1x16xf32>
    %257 = arith.truncf %256 : vector<1x16xf32> to vector<1x16xbf16>
    %c0_252 = arith.constant 0 : index
    %c0_253 = arith.constant 0 : index
    %258 = vector.load %arg46[%c0_252, %c0_253] : memref<16x5xbf16, #tpu.memory_space<vmem>>, vector<16x5xbf16>
    %cst_254 = arith.constant dense<0.000000e+00> : vector<1x5xf32>
    %259 = tpu.matmul %257, %258, %cst_254 {dimension_numbers = #tpu.dot_dimension_numbers<[1], [0], [0], [1], [0, 0, 1, 1], [], []>} : vector<1x16xbf16>, vector<16x5xbf16>, vector<1x5xf32> -> vector<1x5xf32>
    %c0_255 = arith.constant 0 : index
    %c0_256 = arith.constant 0 : index
    %260 = vector.load %arg47[%c0_255, %c0_256] : memref<1x5xf32, #tpu.memory_space<vmem>>, vector<1x5xf32>
    %261 = arith.addf %259, %260 : vector<1x5xf32>
    %c0_257 = arith.constant 0 : index
    %c0_258 = arith.constant 0 : index
    %c0_259 = arith.constant 0 : index
    %262 = vector.load %arg48[%c0_257, %c0_258, %c0_259] : memref<1x1x5xf32, #tpu.memory_space<vmem>>, vector<1x1x5xf32>
    %263 = vector.shape_cast %262 : vector<1x1x5xf32> to vector<1x5xf32>
    %264 = vector.shape_cast %261 : vector<1x5xf32> to vector<1x1x5xf32>
    tpu.vector_store %arg48[%c0_257, %c0_258, %c0_259], %264 {strides = array<i32>} : memref<1x1x5xf32, #tpu.memory_space<vmem>>, vector<1x1x5xf32>,
    return
  }
  func.func @transform_0(%arg0: i32) -> (i32, i32, i32) {
    %c0_i32 = arith.constant 0 : i32
    %c0_i32_0 = arith.constant 0 : i32
    %c0_i32_1 = arith.constant 0 : i32
    return %arg0, %c0_i32, %c0_i32_0 : i32, i32, i32
  }
  func.func @transform_1(%arg0: i32) -> (i32, i32) {
    %c0_i32 = arith.constant 0 : i32
    %c0_i32_0 = arith.constant 0 : i32
    %c0_i32_1 = arith.constant 0 : i32
    return %c0_i32, %c0_i32_0 : i32, i32
  }
  func.func @transform_2(%arg0: i32) -> (i32, i32) {
    %c0_i32 = arith.constant 0 : i32
    %c0_i32_0 = arith.constant 0 : i32
    %c0_i32_1 = arith.constant 0 : i32
    return %c0_i32, %c0_i32_0 : i32, i32
  }
  func.func @transform_3(%arg0: i32) -> (i32, i32) {
    %c0_i32 = arith.constant 0 : i32
    %c0_i32_0 = arith.constant 0 : i32
    %c0_i32_1 = arith.constant 0 : i32
    return %c0_i32, %c0_i32_0 : i32, i32
  }
  func.func @transform_4(%arg0: i32) -> (i32, i32) {
    %c0_i32 = arith.constant 0 : i32
    %c0_i32_0 = arith.constant 0 : i32
    %c0_i32_1 = arith.constant 0 : i32
    return %c0_i32, %c0_i32_0 : i32, i32
  }
  func.func @transform_5(%arg0: i32) -> (i32, i32) {
    %c0_i32 = arith.constant 0 : i32
    %c0_i32_0 = arith.constant 0 : i32
    %c0_i32_1 = arith.constant 0 : i32
    return %c0_i32, %c0_i32_0 : i32, i32
  }
  func.func @transform_6(%arg0: i32) -> (i32, i32) {
    %c0_i32 = arith.constant 0 : i32
    %c0_i32_0 = arith.constant 0 : i32
    %c0_i32_1 = arith.constant 0 : i32
    return %c0_i32, %c0_i32_0 : i32, i32
  }
  func.func @transform_7(%arg0: i32) -> (i32, i32) {
    %c0_i32 = arith.constant 0 : i32
    %c0_i32_0 = arith.constant 0 : i32
    %c0_i32_1 = arith.constant 0 : i32
    return %c0_i32, %c0_i32_0 : i32, i32
  }
  func.func @transform_8(%arg0: i32) -> (i32, i32) {
    %c0_i32 = arith.constant 0 : i32
    %c0_i32_0 = arith.constant 0 : i32
    %c0_i32_1 = arith.constant 0 : i32
    return %c0_i32, %c0_i32_0 : i32, i32
  }
  func.func @transform_9(%arg0: i32) -> (i32, i32) {
    %c0_i32 = arith.constant 0 : i32
    %c0_i32_0 = arith.constant 0 : i32
    %c0_i32_1 = arith.constant 0 : i32
    return %c0_i32, %c0_i32_0 : i32, i32
  }
  func.func @transform_10(%arg0: i32) -> (i32, i32) {
    %c0_i32 = arith.constant 0 : i32
    %c0_i32_0 = arith.constant 0 : i32
    %c0_i32_1 = arith.constant 0 : i32
    return %c0_i32, %c0_i32_0 : i32, i32
  }
  func.func @transform_11(%arg0: i32) -> (i32, i32) {
    %c0_i32 = arith.constant 0 : i32
    %c0_i32_0 = arith.constant 0 : i32
    %c0_i32_1 = arith.constant 0 : i32
    return %c0_i32, %c0_i32_0 : i32, i32
  }
  func.func @transform_12(%arg0: i32) -> (i32, i32) {
    %c0_i32 = arith.constant 0 : i32
    %c0_i32_0 = arith.constant 0 : i32
    %c0_i32_1 = arith.constant 0 : i32
    return %c0_i32, %c0_i32_0 : i32, i32
  }
  func.func @transform_13(%arg0: i32) -> (i32, i32) {
    %c0_i32 = arith.constant 0 : i32
    %c0_i32_0 = arith.constant 0 : i32
    %c0_i32_1 = arith.constant 0 : i32
    return %c0_i32, %c0_i32_0 : i32, i32
  }
  func.func @transform_14(%arg0: i32) -> (i32, i32) {
    %c0_i32 = arith.constant 0 : i32
    %c0_i32_0 = arith.constant 0 : i32
    %c0_i32_1 = arith.constant 0 : i32
    return %c0_i32, %c0_i32_0 : i32, i32
  }
  func.func @transform_15(%arg0: i32) -> (i32, i32) {
    %c0_i32 = arith.constant 0 : i32
    %c0_i32_0 = arith.constant 0 : i32
    %c0_i32_1 = arith.constant 0 : i32
    return %c0_i32, %c0_i32_0 : i32, i32
  }
  func.func @transform_16(%arg0: i32) -> (i32, i32) {
    %c0_i32 = arith.constant 0 : i32
    %c0_i32_0 = arith.constant 0 : i32
    %c0_i32_1 = arith.constant 0 : i32
    return %c0_i32, %c0_i32_0 : i32, i32
  }
  func.func @transform_17(%arg0: i32) -> (i32, i32) {
    %c0_i32 = arith.constant 0 : i32
    %c0_i32_0 = arith.constant 0 : i32
    %c0_i32_1 = arith.constant 0 : i32
    return %c0_i32, %c0_i32_0 : i32, i32
  }
  func.func @transform_18(%arg0: i32) -> (i32, i32) {
    %c0_i32 = arith.constant 0 : i32
    %c0_i32_0 = arith.constant 0 : i32
    %c0_i32_1 = arith.constant 0 : i32
    return %c0_i32, %c0_i32_0 : i32, i32
  }
  func.func @transform_19(%arg0: i32) -> (i32, i32) {
    %c0_i32 = arith.constant 0 : i32
    %c0_i32_0 = arith.constant 0 : i32
    %c0_i32_1 = arith.constant 0 : i32
    return %c0_i32, %c0_i32_0 : i32, i32
  }
  func.func @transform_20(%arg0: i32) -> (i32, i32) {
    %c0_i32 = arith.constant 0 : i32
    %c0_i32_0 = arith.constant 0 : i32
    %c0_i32_1 = arith.constant 0 : i32
    return %c0_i32, %c0_i32_0 : i32, i32
  }
  func.func @transform_21(%arg0: i32) -> (i32, i32) {
    %c0_i32 = arith.constant 0 : i32
    %c0_i32_0 = arith.constant 0 : i32
    %c0_i32_1 = arith.constant 0 : i32
    return %c0_i32, %c0_i32_0 : i32, i32
  }
  func.func @transform_22(%arg0: i32) -> (i32, i32) {
    %c0_i32 = arith.constant 0 : i32
    %c0_i32_0 = arith.constant 0 : i32
    %c0_i32_1 = arith.constant 0 : i32
    return %c0_i32, %c0_i32_0 : i32, i32
  }
  func.func @transform_23(%arg0: i32) -> (i32, i32) {
    %c0_i32 = arith.constant 0 : i32
    %c0_i32_0 = arith.constant 0 : i32
    %c0_i32_1 = arith.constant 0 : i32
    return %c0_i32, %c0_i32_0 : i32, i32
  }
  func.func @transform_24(%arg0: i32) -> (i32, i32) {
    %c0_i32 = arith.constant 0 : i32
    %c0_i32_0 = arith.constant 0 : i32
    %c0_i32_1 = arith.constant 0 : i32
    return %c0_i32, %c0_i32_0 : i32, i32
  }
  func.func @transform_25(%arg0: i32) -> (i32, i32) {
    %c0_i32 = arith.constant 0 : i32
    %c0_i32_0 = arith.constant 0 : i32
    %c0_i32_1 = arith.constant 0 : i32
    return %c0_i32, %c0_i32_0 : i32, i32
  }
  func.func @transform_26(%arg0: i32) -> (i32, i32) {
    %c0_i32 = arith.constant 0 : i32
    %c0_i32_0 = arith.constant 0 : i32
    %c0_i32_1 = arith.constant 0 : i32
    return %c0_i32, %c0_i32_0 : i32, i32
  }
  func.func @transform_27(%arg0: i32) -> (i32, i32) {
    %c0_i32 = arith.constant 0 : i32
    %c0_i32_0 = arith.constant 0 : i32
    %c0_i32_1 = arith.constant 0 : i32
    return %c0_i32, %c0_i32_0 : i32, i32
  }
  func.func @transform_28(%arg0: i32) -> (i32, i32) {
    %c0_i32 = arith.constant 0 : i32
    %c0_i32_0 = arith.constant 0 : i32
    %c0_i32_1 = arith.constant 0 : i32
    return %c0_i32, %c0_i32_0 : i32, i32
  }
  func.func @transform_29(%arg0: i32) -> (i32, i32) {
    %c0_i32 = arith.constant 0 : i32
    %c0_i32_0 = arith.constant 0 : i32
    %c0_i32_1 = arith.constant 0 : i32
    return %c0_i32, %c0_i32_0 : i32, i32
  }
  func.func @transform_30(%arg0: i32) -> (i32, i32) {
    %c0_i32 = arith.constant 0 : i32
    %c0_i32_0 = arith.constant 0 : i32
    %c0_i32_1 = arith.constant 0 : i32
    return %c0_i32, %c0_i32_0 : i32, i32
  }
  func.func @transform_31(%arg0: i32) -> (i32, i32) {
    %c0_i32 = arith.constant 0 : i32
    %c0_i32_0 = arith.constant 0 : i32
    %c0_i32_1 = arith.constant 0 : i32
    return %c0_i32, %c0_i32_0 : i32, i32
  }
  func.func @transform_32(%arg0: i32) -> (i32, i32) {
    %c0_i32 = arith.constant 0 : i32
    %c0_i32_0 = arith.constant 0 : i32
    %c0_i32_1 = arith.constant 0 : i32
    return %c0_i32, %c0_i32_0 : i32, i32
  }
  func.func @transform_33(%arg0: i32) -> (i32, i32) {
    %c0_i32 = arith.constant 0 : i32
    %c0_i32_0 = arith.constant 0 : i32
    %c0_i32_1 = arith.constant 0 : i32
    return %c0_i32, %c0_i32_0 : i32, i32
  }
  func.func @transform_34(%arg0: i32) -> (i32, i32) {
    %c0_i32 = arith.constant 0 : i32
    %c0_i32_0 = arith.constant 0 : i32
    %c0_i32_1 = arith.constant 0 : i32
    return %c0_i32, %c0_i32_0 : i32, i32
  }
  func.func @transform_35(%arg0: i32) -> (i32, i32) {
    %c0_i32 = arith.constant 0 : i32
    %c0_i32_0 = arith.constant 0 : i32
    %c0_i32_1 = arith.constant 0 : i32
    return %c0_i32, %c0_i32_0 : i32, i32
  }
  func.func @transform_36(%arg0: i32) -> (i32, i32) {
    %c0_i32 = arith.constant 0 : i32
    %c0_i32_0 = arith.constant 0 : i32
    %c0_i32_1 = arith.constant 0 : i32
    return %c0_i32, %c0_i32_0 : i32, i32
  }
  func.func @transform_37(%arg0: i32) -> (i32, i32) {
    %c0_i32 = arith.constant 0 : i32
    %c0_i32_0 = arith.constant 0 : i32
    %c0_i32_1 = arith.constant 0 : i32
    return %c0_i32, %c0_i32_0 : i32, i32
  }
  func.func @transform_38(%arg0: i32) -> (i32, i32) {
    %c0_i32 = arith.constant 0 : i32
    %c0_i32_0 = arith.constant 0 : i32
    %c0_i32_1 = arith.constant 0 : i32
    return %c0_i32, %c0_i32_0 : i32, i32
  }
  func.func @transform_39(%arg0: i32) -> (i32, i32) {
    %c0_i32 = arith.constant 0 : i32
    %c0_i32_0 = arith.constant 0 : i32
    %c0_i32_1 = arith.constant 0 : i32
    return %c0_i32, %c0_i32_0 : i32, i32
  }
  func.func @transform_40(%arg0: i32) -> (i32, i32) {
    %c0_i32 = arith.constant 0 : i32
    %c0_i32_0 = arith.constant 0 : i32
    %c0_i32_1 = arith.constant 0 : i32
    return %c0_i32, %c0_i32_0 : i32, i32
  }
  func.func @transform_41(%arg0: i32) -> (i32, i32) {
    %c0_i32 = arith.constant 0 : i32
    %c0_i32_0 = arith.constant 0 : i32
    %c0_i32_1 = arith.constant 0 : i32
    return %c0_i32, %c0_i32_0 : i32, i32
  }
  func.func @transform_42(%arg0: i32) -> (i32, i32) {
    %c0_i32 = arith.constant 0 : i32
    %c0_i32_0 = arith.constant 0 : i32
    %c0_i32_1 = arith.constant 0 : i32
    return %c0_i32, %c0_i32_0 : i32, i32
  }
  func.func @transform_43(%arg0: i32) -> (i32, i32) {
    %c0_i32 = arith.constant 0 : i32
    %c0_i32_0 = arith.constant 0 : i32
    %c0_i32_1 = arith.constant 0 : i32
    return %c0_i32, %c0_i32_0 : i32, i32
  }
  func.func @transform_44(%arg0: i32) -> (i32, i32) {
    %c0_i32 = arith.constant 0 : i32
    %c0_i32_0 = arith.constant 0 : i32
    %c0_i32_1 = arith.constant 0 : i32
    return %c0_i32, %c0_i32_0 : i32, i32
  }
  func.func @transform_45(%arg0: i32) -> (i32, i32) {
    %c0_i32 = arith.constant 0 : i32
    %c0_i32_0 = arith.constant 0 : i32
    %c0_i32_1 = arith.constant 0 : i32
    return %c0_i32, %c0_i32_0 : i32, i32
  }
  func.func @transform_46(%arg0: i32) -> (i32, i32) {
    %c0_i32 = arith.constant 0 : i32
    %c0_i32_0 = arith.constant 0 : i32
    %c0_i32_1 = arith.constant 0 : i32
    return %c0_i32, %c0_i32_0 : i32, i32
  }
  func.func @transform_47(%arg0: i32) -> (i32, i32, i32) {
    %c0_i32 = arith.constant 0 : i32
    %c0_i32_0 = arith.constant 0 : i32
    %c0_i32_1 = arith.constant 0 : i32
    return %arg0, %c0_i32, %c0_i32_0 : i32, i32, i32
  }
}

</mosaic_0001>

<bundles_post_ra>
// kernel: _lambda_.1
= control target key start
LH: loop header
LB: loop body
LE: loop exit
PB: predicated region body
PF: predicated region fallthrough
CT: control target
= control target key end

     0   :  { %s4844_s6 = smov 1   ;;  %s4845_s10 = smov 2   ;;  %s5887_s0 = inlined_call_operand.smem [shape: u32[48], index: -1, kind: input, shape index: {}] }
   0x1   :  { %s4941_s5 = sld [smem:[%s5887_s0]]   ;;  %s4846_s14 = smov 3  }
   0x2   :  { %s4946_s9 = sld [smem:[%s5887_s0 + %s4844_s6]]   ;;  %s4847_s18 = smov 4  }
   0x3   :  { %s4951_s13 = sld [smem:[%s5887_s0 + %s4845_s10]]   ;;  %s4848_s22 = smov 5  }
   0x4   :  { %s4956_s17 = sld [smem:[%s5887_s0 + %s4846_s14]]   ;;  %s4849_s26 = smov 6  }
   0x5   :  { %s4961_s21 = sld [smem:[%s5887_s0 + %s4847_s18]]   ;;  %s4850_s30 = smov 7  }
   0x6   :  { %s4966_s25 = sld [smem:[%s5887_s0 + %s4848_s22]]   ;;  %s4851_s4 = smov 8  }
   0x7   :  { %5944 = sst [smem:[#allocation88_spill]] %s4941_s5  ;;  %s4852_s10 = smov 9  }
   0x8   :  { %5945 = sst [smem:[#allocation89_spill]] %s4946_s9  ;;  %s4853_s15 = smov 10  }
   0x9   :  { %5946 = sst [smem:[#allocation90_spill]] %s4951_s13  ;;  %s4854_s20 = smov 11  }
   0xa   :  { %5947 = sst [smem:[#allocation91_spill]] %s4956_s17  ;;  %s4856_s1 = smov 13  }
   0xb   :  { %5948 = sst [smem:[#allocation92_spill]] %s4961_s21  ;;  %s4857_s7 = smov 14  }
   0xc   :  { %5949 = sst [smem:[#allocation93_spill]] %s4966_s25  ;;  %s4859_s22 = smov 16  }
   0xd   :  { %s4971_s29 = sld [smem:[%s5887_s0 + %s4849_s26]]   ;;  %s4855_s26 = smov 12  }
   0xe   :  { %s4976_s3 = sld [smem:[%s5887_s0 + %s4850_s30]]   ;;  %s4860_s28 = smov 17  }
   0xf   :  { %s4981_s8 = sld [smem:[%s5887_s0 + %s4851_s4]]  }
  0x10   :  { %s4986_s14 = sld [smem:[%s5887_s0 + %s4852_s10]]  }
  0x11   :  { %s4991_s19 = sld [smem:[%s5887_s0 + %s4853_s15]]   ;;  %s4858_s15 = smov 15  }
  0x12   :  { %s4996_s24 = sld [smem:[%s5887_s0 + %s4854_s20]]  }
  0x13   :  { %5950 = sst [smem:[#allocation94_spill]] %s4971_s29 }
  0x14   :  { %5951 = sst [smem:[#allocation95_spill]] %s4976_s3 }
  0x15   :  { %5952 = sst [smem:[#allocation96_spill]] %s4981_s8 }
  0x16   :  { %5953 = sst [smem:[#allocation97_spill]] %s4986_s14 }
  0x17   :  { %5954 = sst [smem:[#allocation98_spill]] %s4991_s19 }
  0x18   :  { %5955 = sst [smem:[#allocation99_spill]] %s4996_s24 }
  0x19   :  { %s5001_s30 = sld [smem:[%s5887_s0 + %s4855_s26]]  }
  0x1a   :  { %s5006_s6 = sld [smem:[%s5887_s0 + %s4856_s1]]  }
  0x1b   :  { %s5011_s12 = sld [smem:[%s5887_s0 + %s4857_s7]]   ;;  %s4861_s7 = smov 18  }
  0x1c   :  { %s5016_s20 = sld [smem:[%s5887_s0 + %s4858_s15]]   ;;  %s4862_s15 = smov 19  }
  0x1d   :  { %s5021_s27 = sld [smem:[%s5887_s0 + %s4859_s22]]   ;;  %s4863_s22 = smov 20  }
  0x1e   :  { %s5026_s4 = sld [smem:[%s5887_s0 + %s4860_s28]]   ;;  %s4864_s28 = smov 21  }
  0x1f   :  { %5956 = sst [smem:[#allocation100_spill]] %s5001_s30 }
  0x20   :  { %5957 = sst [smem:[#allocation101_spill]] %s5006_s6 }
  0x21   :  { %5958 = sst [smem:[#allocation102_spill]] %s5011_s12 }
  0x22   :  { %s5031_s8 = sld [smem:[%s5887_s0 + %s4861_s7]]   ;;  %s4865_s7 = smov 22  }
  0x23   :  { %5959 = sst [smem:[#allocation103_spill]] %s5021_s27 }
  0x24   :  { %5960 = sst [smem:[#allocation104_spill]] %s5026_s4 }
  0x25   :  { %s5036_s24 = sld [smem:[%s5887_s0 + %s4862_s15]]   ;;  %s4866_s15 = smov 23  }
  0x26   :  { %s5041_s3 = sld [smem:[%s5887_s0 + %s4863_s22]]   ;;  %s4867_s22 = smov 24  }
  0x27   :  { %s5046_s19 = sld [smem:[%s5887_s0 + %s4864_s28]]   ;;  %s4868_s28 = smov 25  }
  0x28   :  { %5961 = sst [smem:[#allocation105_spill]] %s5031_s8 }
  0x29   :  { %s5051_s14 = sld [smem:[%s5887_s0 + %s4865_s7]]   ;;  %s4869_s7 = smov 26  }
  0x2a   :  { %s5056_s29 = sld [smem:[%s5887_s0 + %s4866_s15]]   ;;  %s4870_s15 = smov 27  }
  0x2b   :  { %s5061_s25 = sld [smem:[%s5887_s0 + %s4867_s22]]   ;;  %s4871_s22 = smov 28  }
  0x2c   :  { %5962 = sst [smem:[#allocation106_spill]] %s5041_s3 }
  0x2d   :  { %s5066_s21 = sld [smem:[%s5887_s0 + %s4868_s28]]   ;;  %s4872_s28 = smov 29  }
  0x2e   :  { %s5071_s17 = sld [smem:[%s5887_s0 + %s4869_s7]]   ;;  %s4873_s7 = smov 30  }
  0x2f   :  { %5963 = sst [smem:[#allocation107_spill]] %s5051_s14 }
  0x30   :  { %s5076_s13 = sld [smem:[%s5887_s0 + %s4870_s15]]   ;;  %s4874_s15 = smov 31  }
  0x31   :  { %5964 = sst [smem:[#allocation108_spill]] %s5061_s25 }
  0x32   :  { %s5081_s9 = sld [smem:[%s5887_s0 + %s4871_s22]]   ;;  %s4875_s22 = smov 32  }
  0x33   :  { %s5086_s5 = sld [smem:[%s5887_s0 + %s4872_s28]]   ;;  %s4876_s28 = smov 33  }
  0x34   :  { %5965 = sst [smem:[#allocation109_spill]] %s5071_s17 }
  0x35   :  { %s5091_s17 = sld [smem:[%s5887_s0 + %s4873_s7]]   ;;  %s4877_s7 = smov 34  }
  0x36   :  { %s5096_s25 = sld [smem:[%s5887_s0 + %s4874_s15]]   ;;  %s4878_s15 = smov 35  }
  0x37   :  { %s5106_s14 = sld [smem:[%s5887_s0 + %s4876_s28]]   ;;  %s4880_s28 = smov 37  }
  0x38   :  { %5966 = sst [smem:[#allocation110_spill]] %s5081_s9 }
  0x39   :  { %5967 = sst [smem:[#allocation111_spill]] %s5086_s5 }
  0x3a   :  { %s5101_s9 = sld [smem:[%s5887_s0 + %s4875_s22]]   ;;  %s4879_s22 = smov 36  }
  0x3b   :  { %5968 = sst [smem:[#allocation112_spill]] %s5091_s17 }
  0x3c   :  { %s5111_s17 = sld [smem:[%s5887_s0 + %s4877_s7]]   ;;  %s4881_s7 = smov 38  }
  0x3d   :  { %s5116_s3 = sld [smem:[%s5887_s0 + %s4878_s15]]   ;;  %s4882_s15 = smov 39  }
  0x3e   :  { %s5126_s8 = sld [smem:[%s5887_s0 + %s4880_s28]]   ;;  %s4884_s28 = smov 41  }
  0x3f   :  { %s5136_s27 = sld [smem:[%s5887_s0 + %s4882_s15]]   ;;  %s4886_s15 = smov 43  }
  0x40   :  { %5969 = sst [smem:[#allocation113_spill]] %s5101_s9 }
  0x41   :  { %s5121_s9 = sld [smem:[%s5887_s0 + %s4879_s22]]   ;;  %s4883_s22 = smov 40  }
  0x42   :  { %5970 = sst [smem:[#allocation114_spill]] %s5111_s17 }
  0x43   :  { %5971 = sst [smem:[#allocation115_spill]] %s5116_s3 }
  0x44   :  { %5973 = sst [smem:[#allocation117_spill]] %s5126_s8 }
  0x45   :  { %s5131_s17 = sld [smem:[%s5887_s0 + %s4881_s7]]   ;;  %s4885_s7 = smov 42  }
  0x46   :  { %5975 = sst [smem:[#allocation119_spill]] %s5136_s27 }
  0x47   :  { %5972 = sst [smem:[#allocation116_spill]] %s5121_s9 }
  0x48   :  { %s5141_s9 = sld [smem:[%s5887_s0 + %s4883_s22]]   ;;  %s4887_s22 = smov 44  }
  0x49   :  { %s5146_s12 = sld [smem:[%s5887_s0 + %s4884_s28]]   ;;  %s4888_s28 = smov 45  }
  0x4a   :  { %s5156_s27 = sld [smem:[%s5887_s0 + %s4886_s15]]   ;;  %s4890_s15 = smov 47  }
  0x4b   :  { %5974 = sst [smem:[#allocation118_spill]] %s5131_s17 }
  0x4c   :  { %s5151_s17 = sld [smem:[%s5887_s0 + %s4885_s7]]   ;;  %s4889_s7 = smov 46  }
  0x4d   :  { %s5161_s30 = sld [smem:[%s5887_s0 + %s4887_s22]]  }
  0x4f   :  { %5976 = sst [smem:[#allocation120_spill]] %s5146_s12 }
  0x50   :  { %5978 = sst [smem:[#allocation122_spill]] %s5156_s27 }
  0x51   :  { %s5166_s12 = sld [smem:[%s5887_s0 + %s4888_s28]]  }
  0x52   :  { %5977 = sst [smem:[#allocation121_spill]] %s5151_s17 }
  0x53   :  { %s5171_s17 = sld [smem:[%s5887_s0 + %s4889_s7]]  }
  0x54   :  { %s5176_s27 = sld [smem:[%s5887_s0 + %s4890_s15]]  }
  0x5a   :  { %5979 = sst [smem:[#allocation123_spill]] %s5176_s27 }
  0x5b   :  { %100 = vsyncpa [#allocation16], 0 }
  0x5c   :  { %101 = vsyncpa [#allocation19], 0 }
  0x5d   :  { %102 = vsyncpa [#allocation22], 0 }
  0x5e   :  { %103 = vsyncpa [#allocation25], 0 }
  0x5f   :  { %104 = vsyncpa [#allocation28], 0 }
  0x60   :  { %105 = vsyncpa [#allocation31], 0 }
  0x61   :  { %106 = vsyncpa [#allocation34], 0 }
  0x62   :  { %107 = vsyncpa [#allocation37], 0 }
  0x63   :  { %108 = vsyncpa [#allocation40], 0 }
  0x64   :  { %109 = vsyncpa [#allocation43], 0 }
  0x65   :  { %110 = vsyncpa [#allocation46], 0 }
  0x66   :  { %111 = vsyncpa [#allocation49], 0 }
  0x67   :  { %112 = vsyncpa [#allocation52], 0 }
  0x68   :  { %113 = vsyncpa [#allocation55], 0 }
  0x69   :  { %114 = vsyncpa [#allocation58], 0 }
  0x6a   :  { %115 = vsyncpa [#allocation61], 0 }
  0x6b   :  { %116 = vsyncpa [#allocation64], 0 }
  0x6c   :  { %117 = vsyncpa [#allocation67], 0 }
  0x6d   :  { %118 = vsyncpa [#allocation17], 0 }
  0x6e   :  { %120 = vsyncpa [#allocation17 + $0x1], 0  ;;  %s5178_s0 = smov 0   ;;  %s5180_s22 = smov 0  }
  0x6f   :  { %s5182_s23 = smov 0   ;;  %s5184_s26 = smov 0  }
  0x70 LB: > { %s5980_s8 = sld [smem:[#allocation117_spill]]  ;;  %s5199_s28 = sadd.s32 4294967295, %s4842_s26   ;;  %s4830_s0 = sphi %s5178_s0, %s6039_s0   ;;  %s4842_s26 = sphi %s5184_s26, %s6036_s26   ;;  %s4838_s23 = sphi %s5182_s23, %s6038_s23   ;;  %s4834_s22 = sphi %s5180_s22, %s6040_s22  }
  0x71   : > { %s5981_s6 = sld [smem:[#allocation101_spill]]  ;;  %s3200_s1 = sadd.s32 4294967294, %s4842_s26  }
  0x72   : > { %s5982_s5 = sld [smem:[#allocation111_spill]]  ;;  %s5203_s2 = sadd.s32 1, %s4842_s26  }
  0x73   : > { %s5983_s4 = sld [smem:[#allocation104_spill]]  ;;  %s1125_s7 = sadd.s32 1, %s4838_s23 }
  0x74   : > { %s5984_s3 = sld [smem:[#allocation115_spill]]  ;;  %s1122_s10 = ssub.s32 %s4842_s26, %s5203_s2 }
  0x75   : > { %5985 = sst [smem:[#allocation124_spill]] %s4830_s0  ;;  %p1135_p0 = scmp.ne.s32.totalorder %s4838_s23, %s4834_s22 }
  0x76   : > { %5986 = sst [smem:[#allocation125_spill]] %s4838_s23  ;;  %p1123_p1 = scmp.eq.s32.totalorder %s1122_s10, 0 }
  0x77   : > { %5987 = sst [smem:[#allocation126_spill]] %s4842_s26  ;;  %p1136_p2 = scmp.eq.s32.totalorder %s5199_s28, 1 }
  0x78   : > { %5988 = sst [smem:[#allocation127_spill]] %s5203_s2  ;;  %p1141_p3 = scmp.ne.s32.totalorder %s4834_s22, %s4830_s0 }
  0x79   : > { %p1142_p4 = scmp.eq.s32.totalorder %s3200_s1, 1  ;;  %p5216_p5 = por %p1136_p2, %p1135_p0 }
  0x7a   : > { %s5214_s11 = scalar_select %p1123_p1, %s4838_s23, %s1125_s7  }
  0x7b   : > { %s5990_s15 = scalar_select %p5216_p5, 1, 0 }
  0x7c   : > { %5989 = sst [smem:[#allocation128_spill]] %s5214_s11  ;;  %p5220_p6 = por %p1142_p4, %p1141_p3 }
  0x7d   : > { %5991 = sst [smem:[#allocation129_spill]] %s5990_s15  ;;  %p3201_p7 = scmp.ge.s32.totalorder %s4842_s26, 1 }
  0x7e   : > { %s5992_s16 = scalar_select %p5220_p6, 1, 0 }
  0x7f   : > { %p1149_p8 = scmp.lt.s32.totalorder %s4842_s26, 3 }
  0x80   : > { %5993 = sst [smem:[#allocation130_spill]] %s5992_s16 }
  0x81   : > { %p5226_p9 = pnand %p3201_p7, %p1149_p8 }
  0x82   : > { %p3501_p10 = scmp.eq.s32.totalorder (!%p5226_p9), %s5199_s28, 0  ;;  %s1206_s1 = sshll.u32 (!%p5226_p9), %s5981_s6, 4  ;;  %s1207_s1 = int_to_ptr.hbm [resolvable:$true] %s1206_s1 }
  0x83   : > { %1153 = sbr.rel (%p5226_p9) target bundleno = 578 (0x242), region = 12  ;;  %s4891_s7 = smov (!%p5226_p9), [#allocation18]  }
  0x84   : > { %s1208_s10 = sshll.u32 (!%p5226_p9), %s4891_s7, 4  ;;  %s1229_s11 = sshll.u32 (!%p5226_p9), %s5016_s20, 4  ;;  %s1209_s10 = int_to_ptr.vmem [resolvable:$true] %s1208_s10  ;;  %s5235_s11 = int_to_ptr.hbm [resolvable:$true] %s1229_s11 }
  0x85   : > { %s3756_s23 = sshra.s32 (!%p5226_p9), %s1207_s1, 4  ;;  %s3762_s16 = scalar_lea.hbm (!%p5226_p9), %s5981_s6, 1  ;;  %s3757_s23 = int_to_ptr.hbm [resolvable:$true] %s3756_s23 }
  0x86   : > { %s3758_s2 = scalar_lea.hbm (!%p5226_p9), %s3757_s23, 1  ;;  %p3763_p0 = scmp.lt.s32.totalorder (!%p5226_p9), %s3757_s23, %s5981_s6 }
  0x87   : > { %p3759_p11 = scmp.ne.s32.totalorder (!%p5226_p9), %s3757_s23, %s3758_s2  ;;  %p3764_p1 = scmp.lt.s32.totalorder (!%p5226_p9), %s3762_s16, %s3758_s2 }
  0x89   : > { %p3760_p12 = pnand %p3759_p11, %p3501_p10  ;;  %p3765_p2 = por %p3764_p1, %p3763_p0 }
  0x8b   : > { %p3761_p13 = pneg %p3760_p12 }
  0x8d   : > { %p3766_p3 = pnand %p3765_p2, %p3761_p13 }
  0x8f   : > { %3769 = shalt.err (!%p3766_p3)
}
  0x90   : > { %3362 = dma.hbm_to_vmem [thread:$0]  (%p3501_p10), %s1207_s1, 16, %s1209_s10, [#allocation19]  }
  0x91   : > { %s4892_s7 = smov [#allocation21]   ;;  %s1256_s26 = sshll.u32 %s5983_s4, 4  ;;  %s1257_s26 = int_to_ptr.hbm [resolvable:$true] %s1256_s26 }
  0x92   : > { %s1231_s0 = sshll.u32 %s4892_s7, 4  ;;  %s3784_s15 = sshra.s32 %s5235_s11, 4  ;;  %s1232_s0 = int_to_ptr.vmem [resolvable:$true] %s1231_s0  ;;  %s3785_s15 = int_to_ptr.hbm [resolvable:$true] %s3784_s15 }
  0x93   : > { %s3786_s27 = scalar_lea.hbm %s3785_s15, 12  ;;  %s3790_s23 = scalar_lea.hbm %s5016_s20, 12 }
  0x94   : > { %p3787_p4 = scmp.ne.s32.totalorder %s3785_s15, %s3786_s27  ;;  %p3791_p11 = scmp.lt.s32.totalorder %s3785_s15, %s5016_s20 }
  0x95   : > { %p3792_p12 = scmp.lt.s32.totalorder %s3790_s23, %s3786_s27 }
  0x96   : > { %p3788_p7 = pnand %p3787_p4, %p3501_p10 }
  0x97   : > { %p3793_p13 = por %p3792_p12, %p3791_p11 }
  0x98   : > { %p3789_p8 = pneg %p3788_p7 }
  0x9a   : > { %p3794_p0 = pnand %p3793_p13, %p3789_p8 }
  0x9c   : > { %3797 = shalt.err (!%p3794_p0)
}
  0x9d   : > { %s5919_s2 = smov 64   ;;  %s5921_s16 = smov 4  }
  0x9e   : > { %3366 = dma.hbm_to_vmem [thread:$0]  (%p3501_p10), %s5235_s11, 192, %s1232_s0, [#allocation22], %s5919_s2, %s5919_s2, %s5921_s16  }
  0x9f   : > { %s4895_s1 = smov [#allocation24]   ;;  %s1279_s27 = sshll.u32 %s5036_s24, 4  ;;  %s5256_s27 = int_to_ptr.hbm [resolvable:$true] %s1279_s27 }
  0xa0   : > { %s1258_s15 = sshll.u32 %s4895_s1, 4  ;;  %s3812_s10 = sshra.s32 %s1257_s26, 4  ;;  %s1259_s15 = int_to_ptr.vmem [resolvable:$true] %s1258_s15  ;;  %s3813_s10 = int_to_ptr.hbm [resolvable:$true] %s3812_s10 }
  0xa1   : > { %s3814_s7 = scalar_lea.hbm %s3813_s10, 1  ;;  %s3818_s23 = scalar_lea.hbm %s5983_s4, 1 }
  0xa2   : > { %p3815_p1 = scmp.ne.s32.totalorder %s3813_s10, %s3814_s7  ;;  %p3819_p4 = scmp.lt.s32.totalorder %s3813_s10, %s5983_s4 }
  0xa3   : > { %p3820_p7 = scmp.lt.s32.totalorder %s3818_s23, %s3814_s7 }
  0xa4   : > { %p3816_p2 = pnand %p3815_p1, %p3501_p10 }
  0xa5   : > { %p3821_p8 = por %p3820_p7, %p3819_p4 }
  0xa6   : > { %p3817_p3 = pneg %p3816_p2 }
  0xa8   : > { %p3822_p11 = pnand %p3821_p8, %p3817_p3 }
  0xaa   : > { %3825 = shalt.err (!%p3822_p11)
}
  0xab   : > { %3370 = dma.hbm_to_vmem [thread:$0]  (%p3501_p10), %s1257_s26, 16, %s1259_s15, [#allocation25]  }
  0xac   : > { %s1306_s0 = sshll.u32 %s5046_s19, 4  ;;  %s4896_s11 = smov [#allocation27]   ;;  %s5265_s0 = int_to_ptr.hbm [resolvable:$true] %s1306_s0 }
  0xad   : > { %s1281_s1 = sshll.u32 %s4896_s11, 4  ;;  %s3840_s2 = sshra.s32 %s5256_s27, 4  ;;  %s1282_s1 = int_to_ptr.vmem [resolvable:$true] %s1281_s1  ;;  %s3841_s2 = int_to_ptr.hbm [resolvable:$true] %s3840_s2 }
  0xae   : > { %s3842_s10 = scalar_lea.hbm %s3841_s2, 12  ;;  %s3846_s7 = scalar_lea.hbm %s5036_s24, 12 }
  0xaf   : > { %p3843_p12 = scmp.ne.s32.totalorder %s3841_s2, %s3842_s10  ;;  %p3847_p1 = scmp.lt.s32.totalorder %s3841_s2, %s5036_s24 }
  0xb0   : > { %p3848_p2 = scmp.lt.s32.totalorder %s3846_s7, %s3842_s10 }
  0xb1   : > { %p3844_p13 = pnand %p3843_p12, %p3501_p10 }
  0xb2   : > { %p3849_p3 = por %p3848_p2, %p3847_p1 }
  0xb3   : > { %p3845_p0 = pneg %p3844_p13 }
  0xb5   : > { %p3850_p4 = pnand %p3849_p3, %p3845_p0 }
  0xb7   : > { %3853 = shalt.err (!%p3850_p4)
}
  0xb8   : > { %s5995_s26 = smov 64   ;;  %s4897_s15 = smov [#allocation30]  }
  0xb9   : > { %3374 = dma.hbm_to_vmem [thread:$0]  (%p3501_p10), %s5256_s27, 192, %s1282_s1, [#allocation28], %s5995_s26, %s5995_s26, %s5921_s16  }
  0xba   : > { %s1308_s23 = sshll.u32 %s4897_s15, 4  ;;  %s1329_s11 = sshll.u32 %s5056_s29, 4  ;;  %s1309_s23 = int_to_ptr.vmem [resolvable:$true] %s1308_s23  ;;  %s5279_s11 = int_to_ptr.hbm [resolvable:$true] %s1329_s11 }
  0xbb   : > { %s3868_s2 = sshra.s32 %s5265_s0, 4  ;;  %s3874_s7 = scalar_lea.hbm %s5046_s19, 1  ;;  %s3869_s2 = int_to_ptr.hbm [resolvable:$true] %s3868_s2 }
  0xbc   : > { %s3870_s10 = scalar_lea.hbm %s3869_s2, 1  ;;  %p3875_p12 = scmp.lt.s32.totalorder %s3869_s2, %s5046_s19 }
  0xbd   : > { %p3871_p7 = scmp.ne.s32.totalorder %s3869_s2, %s3870_s10  ;;  %p3876_p13 = scmp.lt.s32.totalorder %s3874_s7, %s3870_s10 }
  0xbf   : > { %p3872_p8 = pnand %p3871_p7, %p3501_p10  ;;  %p3877_p0 = por %p3876_p13, %p3875_p12 }
  0xc1   : > { %p3873_p11 = pneg %p3872_p8 }
  0xc3   : > { %p3878_p1 = pnand %p3877_p0, %p3873_p11 }
  0xc5   : > { %3881 = shalt.err (!%p3878_p1)
}
  0xc6   : > { %3378 = dma.hbm_to_vmem [thread:$0]  (%p3501_p10), %s5265_s0, 16, %s1309_s23, [#allocation31]  }
  0xc7   : > { %s1356_s27 = sshll.u32 %s5066_s21, 4  ;;  %s4898_s1 = smov [#allocation33]   ;;  %s5290_s27 = int_to_ptr.hbm [resolvable:$true] %s1356_s27 }
  0xc8   : > { %s1331_s15 = sshll.u32 %s4898_s1, 4  ;;  %s3896_s2 = sshra.s32 %s5279_s11, 4  ;;  %s1332_s15 = int_to_ptr.vmem [resolvable:$true] %s1331_s15  ;;  %s3897_s2 = int_to_ptr.hbm [resolvable:$true] %s3896_s2 }
  0xc9   : > { %s3898_s10 = scalar_lea.hbm %s3897_s2, 12  ;;  %s3902_s7 = scalar_lea.hbm %s5056_s29, 12 }
  0xca   : > { %p3899_p2 = scmp.ne.s32.totalorder %s3897_s2, %s3898_s10  ;;  %p3903_p7 = scmp.lt.s32.totalorder %s3897_s2, %s5056_s29 }
  0xcb   : > { %p3904_p8 = scmp.lt.s32.totalorder %s3902_s7, %s3898_s10 }
  0xcc   : > { %p3900_p3 = pnand %p3899_p2, %p3501_p10 }
  0xcd   : > { %p3905_p11 = por %p3904_p8, %p3903_p7 }
  0xce   : > { %p3901_p4 = pneg %p3900_p3 }
  0xd0   : > { %p3906_p12 = pnand %p3905_p11, %p3901_p4 }
  0xd2   : > { %3909 = shalt.err (!%p3906_p12)
}
  0xd3   : > { %3382 = dma.hbm_to_vmem [thread:$0]  (%p3501_p10), %s5279_s11, 192, %s1332_s15, [#allocation34], %s5995_s26, %s5995_s26, %s5921_s16  }
  0xd4   : > { %s4899_s0 = smov [#allocation36]   ;;  %s1379_s1 = sshll.u32 %s5076_s13, 4  ;;  %s5304_s1 = int_to_ptr.hbm [resolvable:$true] %s1379_s1 }
  0xd5   : > { %s1358_s23 = sshll.u32 %s4899_s0, 4  ;;  %s3924_s2 = sshra.s32 %s5290_s27, 4  ;;  %s1359_s23 = int_to_ptr.vmem [resolvable:$true] %s1358_s23  ;;  %s3925_s2 = int_to_ptr.hbm [resolvable:$true] %s3924_s2 }
  0xd6   : > { %s3926_s10 = scalar_lea.hbm %s3925_s2, 1  ;;  %s3930_s7 = scalar_lea.hbm %s5066_s21, 1 }
  0xd7   : > { %p3927_p13 = scmp.ne.s32.totalorder %s3925_s2, %s3926_s10  ;;  %p3931_p2 = scmp.lt.s32.totalorder %s3925_s2, %s5066_s21 }
  0xd8   : > { %p3932_p3 = scmp.lt.s32.totalorder %s3930_s7, %s3926_s10 }
  0xd9   : > { %p3928_p0 = pnand %p3927_p13, %p3501_p10 }
  0xda   : > { %p3933_p4 = por %p3932_p3, %p3931_p2 }
  0xdb   : > { %p3929_p1 = pneg %p3928_p0 }
  0xdd   : > { %p3934_p7 = pnand %p3933_p4, %p3929_p1 }
  0xdf   : > { %3937 = shalt.err (!%p3934_p7)
}
  0xe0   : > { %3386 = dma.hbm_to_vmem [thread:$0]  (%p3501_p10), %s5290_s27, 16, %s1359_s23, [#allocation37]  }
  0xe1   : > { %s1406_s11 = sshll.u32 %s5982_s5, 4  ;;  %s4900_s15 = smov [#allocation39]   ;;  %s5315_s11 = int_to_ptr.hbm [resolvable:$true] %s1406_s11 }
  0xe2   : > { %s1381_s0 = sshll.u32 %s4900_s15, 4  ;;  %s3952_s2 = sshra.s32 %s5304_s1, 4  ;;  %s1382_s0 = int_to_ptr.vmem [resolvable:$true] %s1381_s0  ;;  %s3953_s2 = int_to_ptr.hbm [resolvable:$true] %s3952_s2 }
  0xe3   : > { %s3954_s10 = scalar_lea.hbm %s3953_s2, 12  ;;  %s3958_s7 = scalar_lea.hbm %s5076_s13, 12 }
  0xe4   : > { %p3955_p8 = scmp.ne.s32.totalorder %s3953_s2, %s3954_s10  ;;  %p3959_p13 = scmp.lt.s32.totalorder %s3953_s2, %s5076_s13 }
  0xe5   : > { %p3960_p0 = scmp.lt.s32.totalorder %s3958_s7, %s3954_s10 }
  0xe6   : > { %p3956_p11 = pnand %p3955_p8, %p3501_p10 }
  0xe7   : > { %p3961_p1 = por %p3960_p0, %p3959_p13 }
  0xe8   : > { %p3957_p12 = pneg %p3956_p11 }
  0xea   : > { %p3962_p2 = pnand %p3961_p1, %p3957_p12 }
  0xec   : > { %3965 = shalt.err (!%p3962_p2)
}
  0xed   : > { %3390 = dma.hbm_to_vmem [thread:$0]  (%p3501_p10), %s5304_s1, 192, %s1382_s0, [#allocation40], %s5995_s26, %s5995_s26, %s5921_s16  }
  0xee   : > { %s4901_s27 = smov [#allocation42]   ;;  %s1429_s15 = sshll.u32 %s5096_s25, 4  ;;  %s5329_s15 = int_to_ptr.hbm [resolvable:$true] %s1429_s15 }
  0xef   : > { %s1408_s23 = sshll.u32 %s4901_s27, 4  ;;  %s3980_s2 = sshra.s32 %s5315_s11, 4  ;;  %s1409_s23 = int_to_ptr.vmem [resolvable:$true] %s1408_s23  ;;  %s3981_s2 = int_to_ptr.hbm [resolvable:$true] %s3980_s2 }
  0xf0   : > { %s3982_s10 = scalar_lea.hbm %s3981_s2, 1  ;;  %s3986_s7 = scalar_lea.hbm %s5982_s5, 1 }
  0xf1   : > { %p3983_p3 = scmp.ne.s32.totalorder %s3981_s2, %s3982_s10  ;;  %p3987_p8 = scmp.lt.s32.totalorder %s3981_s2, %s5982_s5 }
  0xf2   : > { %p3988_p11 = scmp.lt.s32.totalorder %s3986_s7, %s3982_s10 }
  0xf3   : > { %p3984_p4 = pnand %p3983_p3, %p3501_p10 }
  0xf4   : > { %p3989_p12 = por %p3988_p11, %p3987_p8 }
  0xf5   : > { %p3985_p7 = pneg %p3984_p4 }
  0xf7   : > { %p3990_p13 = pnand %p3989_p12, %p3985_p7 }
  0xf9   : > { %3993 = shalt.err (!%p3990_p13)
}
  0xfa   : > { %3394 = dma.hbm_to_vmem [thread:$0]  (%p3501_p10), %s5315_s11, 16, %s1409_s23, [#allocation43]  }
  0xfb   : > { %s1456_s1 = sshll.u32 %s5106_s14, 4  ;;  %s4902_s0 = smov [#allocation45]   ;;  %s5340_s1 = int_to_ptr.hbm [resolvable:$true] %s1456_s1 }
  0xfc   : > { %s1431_s27 = sshll.u32 %s4902_s0, 4  ;;  %s4008_s2 = sshra.s32 %s5329_s15, 4  ;;  %s1432_s27 = int_to_ptr.vmem [resolvable:$true] %s1431_s27  ;;  %s4009_s2 = int_to_ptr.hbm [resolvable:$true] %s4008_s2 }
  0xfd   : > { %s4010_s10 = scalar_lea.hbm %s4009_s2, 12  ;;  %s4014_s7 = scalar_lea.hbm %s5096_s25, 12 }
  0xfe   : > { %p4011_p0 = scmp.ne.s32.totalorder %s4009_s2, %s4010_s10  ;;  %p4015_p3 = scmp.lt.s32.totalorder %s4009_s2, %s5096_s25 }
  0xff   : > { %p4016_p4 = scmp.lt.s32.totalorder %s4014_s7, %s4010_s10 }
 0x100   : > { %p4012_p1 = pnand %p4011_p0, %p3501_p10 }
 0x101   : > { %p4017_p7 = por %p4016_p4, %p4015_p3 }
 0x102   : > { %p4013_p2 = pneg %p4012_p1 }
 0x104   : > { %p4018_p8 = pnand %p4017_p7, %p4013_p2 }
 0x106   : > { %4021 = shalt.err (!%p4018_p8)
}
 0x107   : > { %3398 = dma.hbm_to_vmem [thread:$0]  (%p3501_p10), %s5329_s15, 192, %s1432_s27, [#allocation46], %s5995_s26, %s5995_s26, %s5921_s16  }
 0x108   : > { %s4903_s11 = smov [#allocation48]   ;;  %s1479_s0 = sshll.u32 %s5984_s3, 4  ;;  %s5354_s0 = int_to_ptr.hbm [resolvable:$true] %s1479_s0 }
 0x109   : > { %s1458_s23 = sshll.u32 %s4903_s11, 4  ;;  %s4036_s2 = sshra.s32 %s5340_s1, 4  ;;  %s1459_s23 = int_to_ptr.vmem [resolvable:$true] %s1458_s23  ;;  %s4037_s2 = int_to_ptr.hbm [resolvable:$true] %s4036_s2 }
 0x10a   : > { %s4038_s10 = scalar_lea.hbm %s4037_s2, 1  ;;  %s4042_s7 = scalar_lea.hbm %s5106_s14, 1 }
 0x10b   : > { %p4039_p11 = scmp.ne.s32.totalorder %s4037_s2, %s4038_s10  ;;  %p4043_p0 = scmp.lt.s32.totalorder %s4037_s2, %s5106_s14 }
 0x10c   : > { %p4044_p1 = scmp.lt.s32.totalorder %s4042_s7, %s4038_s10 }
 0x10d   : > { %p4040_p12 = pnand %p4039_p11, %p3501_p10 }
 0x10e   : > { %p4045_p2 = por %p4044_p1, %p4043_p0 }
 0x10f   : > { %p4041_p13 = pneg %p4040_p12 }
 0x111   : > { %p4046_p3 = pnand %p4045_p2, %p4041_p13 }
 0x113   : > { %4049 = shalt.err (!%p4046_p3)
}
 0x114   : > { %3402 = dma.hbm_to_vmem [thread:$0]  (%p3501_p10), %s5340_s1, 16, %s1459_s23, [#allocation49]  }
 0x115   : > { %s1506_s15 = sshll.u32 %s5980_s8, 4  ;;  %s4904_s27 = smov [#allocation51]   ;;  %s5365_s15 = int_to_ptr.hbm [resolvable:$true] %s1506_s15 }
 0x116   : > { %s1481_s11 = sshll.u32 %s4904_s27, 4  ;;  %s4064_s2 = sshra.s32 %s5354_s0, 4  ;;  %s1482_s11 = int_to_ptr.vmem [resolvable:$true] %s1481_s11  ;;  %s4065_s2 = int_to_ptr.hbm [resolvable:$true] %s4064_s2 }
 0x117   : > { %s4066_s10 = scalar_lea.hbm %s4065_s2, 12  ;;  %s4070_s7 = scalar_lea.hbm %s5984_s3, 12 }
 0x118   : > { %p4067_p4 = scmp.ne.s32.totalorder %s4065_s2, %s4066_s10  ;;  %p4071_p11 = scmp.lt.s32.totalorder %s4065_s2, %s5984_s3 }
 0x119   : > { %p4072_p12 = scmp.lt.s32.totalorder %s4070_s7, %s4066_s10 }
 0x11a   : > { %p4068_p7 = pnand %p4067_p4, %p3501_p10 }
 0x11b   : > { %p4073_p13 = por %p4072_p12, %p4071_p11 }
 0x11c   : > { %p4069_p8 = pneg %p4068_p7 }
 0x11e   : > { %p4074_p0 = pnand %p4073_p13, %p4069_p8 }
 0x120   : > { %4077 = shalt.err (!%p4074_p0)
}
 0x121   : > { %3406 = dma.hbm_to_vmem [thread:$0]  (%p3501_p10), %s5354_s0, 192, %s1482_s11, [#allocation52], %s5995_s26, %s5995_s26, %s5921_s16  }
 0x122   : > { %s4905_s1 = smov [#allocation54]   ;;  %s1533_s27 = sshll.u32 %s5141_s9, 4  ;;  %s5379_s27 = int_to_ptr.hbm [resolvable:$true] %s1533_s27 }
 0x123   : > { %s1508_s23 = sshll.u32 %s4905_s1, 4  ;;  %s4092_s2 = sshra.s32 %s5365_s15, 4  ;;  %s1509_s23 = int_to_ptr.vmem [resolvable:$true] %s1508_s23  ;;  %s4093_s2 = int_to_ptr.hbm [resolvable:$true] %s4092_s2 }
 0x124   : > { %s4094_s10 = scalar_lea.hbm %s4093_s2, 1  ;;  %s4098_s7 = scalar_lea.hbm %s5980_s8, 1 }
 0x125   : > { %p4095_p1 = scmp.ne.s32.totalorder %s4093_s2, %s4094_s10  ;;  %p4099_p4 = scmp.lt.s32.totalorder %s4093_s2, %s5980_s8 }
 0x126   : > { %p4100_p7 = scmp.lt.s32.totalorder %s4098_s7, %s4094_s10 }
 0x127   : > { %p4096_p2 = pnand %p4095_p1, %p3501_p10 }
 0x128   : > { %p4101_p8 = por %p4100_p7, %p4099_p4 }
 0x129   : > { %p4097_p3 = pneg %p4096_p2 }
 0x12b   : > { %p4102_p11 = pnand %p4101_p8, %p4097_p3 }
 0x12d   : > { %4105 = shalt.err (!%p4102_p11)
}
 0x12e   : > { %s5996_s0 = sld [smem:[#allocation121_spill]]  ;;  %s4906_s16 = smov [#allocation57]  }
 0x12f   : > { %3410 = dma.hbm_to_vmem [thread:$0]  (%p3501_p10), %s5365_s15, 16, %s1509_s23, [#allocation55]  }
 0x130   : > { %s1535_s3 = sshll.u32 %s4906_s16, 4  ;;  %s4120_s2 = sshra.s32 %s5379_s27, 4  ;;  %s1536_s3 = int_to_ptr.vmem [resolvable:$true] %s1535_s3  ;;  %s4121_s2 = int_to_ptr.hbm [resolvable:$true] %s4120_s2 }
 0x131   : > { %s4122_s10 = scalar_lea.hbm %s4121_s2, 1  ;;  %s4126_s7 = scalar_lea.hbm %s5141_s9, 1 }
 0x132   : > { %p4123_p12 = scmp.ne.s32.totalorder %s4121_s2, %s4122_s10  ;;  %p4127_p1 = scmp.lt.s32.totalorder %s4121_s2, %s5141_s9 }
 0x133   : > { %p4128_p2 = scmp.lt.s32.totalorder %s4126_s7, %s4122_s10 }
 0x134   : > { %s5997_s11 = smov %s5996_s0  ;;  %s1557_s1 = sshll.u32 %s5996_s0, 4  ;;  %s5390_s1 = int_to_ptr.hbm [resolvable:$true] %s1557_s1 }
 0x135   : > { %p4124_p13 = pnand %p4123_p12, %p3501_p10  ;;  %p4129_p3 = por %p4128_p2, %p4127_p1 }
 0x137   : > { %p4125_p0 = pneg %p4124_p13 }
 0x139   : > { %p4130_p4 = pnand %p4129_p3, %p4125_p0 }
 0x13b   : > { %4133 = shalt.err (!%p4130_p4)
}
 0x13c   : > { %3414 = dma.hbm_to_vmem [thread:$0]  (%p3501_p10), %s5379_s27, 16, %s1536_s3, [#allocation58]  }
 0x13d   : > { %s4907_s16 = smov [#allocation60]   ;;  %s1581_s23 = sshll.u32 %s5161_s30, 4  ;;  %s5401_s23 = int_to_ptr.hbm [resolvable:$true] %s1581_s23 }
 0x13e   : > { %s1559_s15 = sshll.u32 %s4907_s16, 4  ;;  %s4148_s0 = sshra.s32 %s5390_s1, 4  ;;  %s1560_s15 = int_to_ptr.vmem [resolvable:$true] %s1559_s15  ;;  %s4149_s0 = int_to_ptr.hbm [resolvable:$true] %s4148_s0 }
 0x13f   : > { %s4150_s2 = scalar_lea.hbm %s4149_s0, 1  ;;  %s4154_s10 = scalar_lea.hbm %s5997_s11, 1 }
 0x140   : > { %p4151_p7 = scmp.ne.s32.totalorder %s4149_s0, %s4150_s2  ;;  %p4155_p12 = scmp.lt.s32.totalorder %s4149_s0, %s5997_s11 }
 0x141   : > { %p4156_p13 = scmp.lt.s32.totalorder %s4154_s10, %s4150_s2 }
 0x142   : > { %p4152_p8 = pnand %p4151_p7, %p3501_p10 }
 0x143   : > { %p4157_p0 = por %p4156_p13, %p4155_p12 }
 0x144   : > { %p4153_p11 = pneg %p4152_p8 }
 0x146   : > { %p4158_p1 = pnand %p4157_p0, %p4153_p11 }
 0x148   : > { %4161 = shalt.err (!%p4158_p1)
}
 0x149   : > { %s5998_s3 = sld [smem:[#allocation100_spill]]  ;;  %s4908_s27 = smov [#allocation63]  }
 0x14a   : > { %3418 = dma.hbm_to_vmem [thread:$0]  (%p3501_p10), %s5390_s1, 16, %s1560_s15, [#allocation61]  }
 0x14b   : > { %s1583_s7 = sshll.u32 %s4908_s27, 4  ;;  %s4176_s0 = sshra.s32 %s5401_s23, 4  ;;  %s1584_s7 = int_to_ptr.vmem [resolvable:$true] %s1583_s7  ;;  %s4177_s0 = int_to_ptr.hbm [resolvable:$true] %s4176_s0 }
 0x14c   : > { %s4178_s2 = scalar_lea.hbm %s4177_s0, 1  ;;  %s4182_s10 = scalar_lea.hbm %s5161_s30, 1 }
 0x14d   : > { %p4179_p2 = scmp.ne.s32.totalorder %s4177_s0, %s4178_s2  ;;  %p4183_p7 = scmp.lt.s32.totalorder %s4177_s0, %s5161_s30 }
 0x14e   : > { %p4184_p8 = scmp.lt.s32.totalorder %s4182_s10, %s4178_s2 }
 0x14f   : > { %s1194_s16 = sshll.u32 %s5998_s3, 4  ;;  %p4180_p3 = pnand %p4179_p2, %p3501_p10  ;;  %s5412_s16 = int_to_ptr.hbm [resolvable:$true] %s1194_s16 }
 0x150   : > { %p4185_p11 = por %p4184_p8, %p4183_p7 }
 0x151   : > { %p4181_p4 = pneg %p4180_p3 }
 0x153   : > { %p4186_p12 = pnand %p4185_p11, %p4181_p4 }
 0x155   : > { %4189 = shalt.err (!%p4186_p12)
}
 0x156   : > { %s5999_s1 = sld [smem:[#allocation102_spill]]  ;;  %s4909_s27 = smov [#allocation15]  }
 0x157   : > { %3422 = dma.hbm_to_vmem [thread:$0]  (%p3501_p10), %s5401_s23, 16, %s1584_s7, [#allocation64]  }
 0x158   : > { %s1196_s4 = sshll.u32 %s4909_s27, 4  ;;  %s4204_s0 = sshra.s32 %s5412_s16, 4  ;;  %s1197_s4 = int_to_ptr.vmem [resolvable:$true] %s1196_s4  ;;  %s4205_s0 = int_to_ptr.hbm [resolvable:$true] %s4204_s0 }
 0x159   : > { %s4206_s2 = scalar_lea.hbm %s4205_s0, 1  ;;  %s4210_s10 = scalar_lea.hbm %s5998_s3, 1 }
 0x15a   : > { %p4207_p13 = scmp.ne.s32.totalorder %s4205_s0, %s4206_s2  ;;  %p4211_p2 = scmp.lt.s32.totalorder %s4205_s0, %s5998_s3 }
 0x15b   : > { %p4212_p3 = scmp.lt.s32.totalorder %s4210_s10, %s4206_s2 }
 0x15c   : > { %s1218_s15 = sshll.u32 %s5999_s1, 4  ;;  %p4208_p0 = pnand %p4207_p13, %p3501_p10  ;;  %s5423_s15 = int_to_ptr.hbm [resolvable:$true] %s1218_s15 }
 0x15d   : > { %p4213_p4 = por %p4212_p3, %p4211_p2 }
 0x15e   : > { %p4209_p1 = pneg %p4208_p0 }
 0x160   : > { %p4214_p7 = pnand %p4213_p4, %p4209_p1 }
 0x162   : > { %4217 = shalt.err (!%p4214_p7)
}
 0x163   : > { %s6000_s23 = sld [smem:[#allocation103_spill]]  ;;  %s4910_s27 = smov [#allocation20]  }
 0x164   : > { %3360 = dma.hbm_to_vmem [thread:$0]  (%p3501_p10), %s5412_s16, 16, %s1197_s4, [#allocation16]  }
 0x165   : > { %s1220_s5 = sshll.u32 %s4910_s27, 4  ;;  %s4232_s0 = sshra.s32 %s5423_s15, 4  ;;  %s1221_s5 = int_to_ptr.vmem [resolvable:$true] %s1220_s5  ;;  %s4233_s0 = int_to_ptr.hbm [resolvable:$true] %s4232_s0 }
 0x166   : > { %s4234_s2 = scalar_lea.hbm %s4233_s0, 1  ;;  %s4238_s10 = scalar_lea.hbm %s5999_s1, 1 }
 0x167   : > { %p4235_p8 = scmp.ne.s32.totalorder %s4233_s0, %s4234_s2  ;;  %p4239_p13 = scmp.lt.s32.totalorder %s4233_s0, %s5999_s1 }
 0x168   : > { %p4240_p0 = scmp.lt.s32.totalorder %s4238_s10, %s4234_s2 }
 0x169   : > { %s6001_s7 = smov %s6000_s23  ;;  %s1244_s6 = sshll.u32 %s6000_s23, 4  ;;  %s5434_s6 = int_to_ptr.hbm [resolvable:$true] %s1244_s6 }
 0x16a   : > { %p4236_p11 = pnand %p4235_p8, %p3501_p10  ;;  %p4241_p1 = por %p4240_p0, %p4239_p13 }
 0x16c   : > { %p4237_p12 = pneg %p4236_p11 }
 0x16e   : > { %p4242_p2 = pnand %p4241_p1, %p4237_p12 }
 0x170   : > { %4245 = shalt.err (!%p4242_p2)
}
 0x171   : > { %s6002_s4 = sld [smem:[#allocation105_spill]]  ;;  %s4911_s23 = smov [#allocation23]  }
 0x172   : > { %3364 = dma.hbm_to_vmem [thread:$0]  (%p3501_p10), %s5423_s15, 16, %s1221_s5, [#allocation19]  }
 0x173   : > { %s1246_s27 = sshll.u32 %s4911_s23, 4  ;;  %s4260_s0 = sshra.s32 %s5434_s6, 4  ;;  %s1247_s27 = int_to_ptr.vmem [resolvable:$true] %s1246_s27  ;;  %s4261_s0 = int_to_ptr.hbm [resolvable:$true] %s4260_s0 }
 0x174   : > { %s4262_s2 = scalar_lea.hbm %s4261_s0, 1  ;;  %s4266_s10 = scalar_lea.hbm %s6001_s7, 1 }
 0x175   : > { %p4263_p3 = scmp.ne.s32.totalorder %s4261_s0, %s4262_s2  ;;  %p4267_p8 = scmp.lt.s32.totalorder %s4261_s0, %s6001_s7 }
 0x176   : > { %p4268_p11 = scmp.lt.s32.totalorder %s4266_s10, %s4262_s2 }
 0x177   : > { %s1268_s16 = sshll.u32 %s6002_s4, 4  ;;  %p4264_p4 = pnand %p4263_p3, %p3501_p10  ;;  %s5445_s16 = int_to_ptr.hbm [resolvable:$true] %s1268_s16 }
 0x178   : > { %p4269_p12 = por %p4268_p11, %p4267_p8 }
 0x179   : > { %p4265_p7 = pneg %p4264_p4 }
 0x17b   : > { %p4270_p13 = pnand %p4269_p12, %p4265_p7 }
 0x17d   : > { %4273 = shalt.err (!%p4270_p13)
}
 0x17e   : > { %s6003_s5 = sld [smem:[#allocation106_spill]]  ;;  %s4912_s15 = smov [#allocation26]  }
 0x17f   : > { %3368 = dma.hbm_to_vmem [thread:$0]  (%p3501_p10), %s5434_s6, 16, %s1247_s27, [#allocation22]  }
 0x180   : > { %s1270_s23 = sshll.u32 %s4912_s15, 4  ;;  %s4288_s0 = sshra.s32 %s5445_s16, 4  ;;  %s1271_s23 = int_to_ptr.vmem [resolvable:$true] %s1270_s23  ;;  %s4289_s0 = int_to_ptr.hbm [resolvable:$true] %s4288_s0 }
 0x181   : > { %s4290_s2 = scalar_lea.hbm %s4289_s0, 1  ;;  %s4294_s10 = scalar_lea.hbm %s6002_s4, 1 }
 0x182   : > { %p4291_p0 = scmp.ne.s32.totalorder %s4289_s0, %s4290_s2  ;;  %p4295_p3 = scmp.lt.s32.totalorder %s4289_s0, %s6002_s4 }
 0x183   : > { %p4296_p4 = scmp.lt.s32.totalorder %s4294_s10, %s4290_s2 }
 0x184   : > { %s1294_s1 = sshll.u32 %s6003_s5, 4  ;;  %p4292_p1 = pnand %p4291_p0, %p3501_p10  ;;  %s5456_s1 = int_to_ptr.hbm [resolvable:$true] %s1294_s1 }
 0x185   : > { %p4297_p7 = por %p4296_p4, %p4295_p3 }
 0x186   : > { %p4293_p2 = pneg %p4292_p1 }
 0x188   : > { %p4298_p8 = pnand %p4297_p7, %p4293_p2 }
 0x18a   : > { %4301 = shalt.err (!%p4298_p8)
}
 0x18b   : > { %s6004_s6 = sld [smem:[#allocation107_spill]]  ;;  %s4913_s15 = smov [#allocation29]  }
 0x18c   : > { %3372 = dma.hbm_to_vmem [thread:$0]  (%p3501_p10), %s5445_s16, 16, %s1271_s23, [#allocation25]  }
 0x18d   : > { %s1296_s3 = sshll.u32 %s4913_s15, 4  ;;  %s4316_s0 = sshra.s32 %s5456_s1, 4  ;;  %s1297_s3 = int_to_ptr.vmem [resolvable:$true] %s1296_s3  ;;  %s4317_s0 = int_to_ptr.hbm [resolvable:$true] %s4316_s0 }
 0x18e   : > { %s4318_s2 = scalar_lea.hbm %s4317_s0, 1  ;;  %s4322_s10 = scalar_lea.hbm %s6003_s5, 1 }
 0x18f   : > { %p4319_p11 = scmp.ne.s32.totalorder %s4317_s0, %s4318_s2  ;;  %p4323_p0 = scmp.lt.s32.totalorder %s4317_s0, %s6003_s5 }
 0x190   : > { %p4324_p1 = scmp.lt.s32.totalorder %s4322_s10, %s4318_s2 }
 0x191   : > { %s1318_s27 = sshll.u32 %s6004_s6, 4  ;;  %p4320_p12 = pnand %p4319_p11, %p3501_p10  ;;  %s5467_s27 = int_to_ptr.hbm [resolvable:$true] %s1318_s27 }
 0x192   : > { %p4325_p2 = por %p4324_p1, %p4323_p0 }
 0x193   : > { %p4321_p13 = pneg %p4320_p12 }
 0x195   : > { %p4326_p3 = pnand %p4325_p2, %p4321_p13 }
 0x197   : > { %4329 = shalt.err (!%p4326_p3)
}
 0x198   : > { %s6005_s16 = sld [smem:[#allocation108_spill]]  ;;  %s4914_s23 = smov [#allocation32]  }
 0x199   : > { %3376 = dma.hbm_to_vmem [thread:$0]  (%p3501_p10), %s5456_s1, 16, %s1297_s3, [#allocation28]  }
 0x19a   : > { %s1320_s15 = sshll.u32 %s4914_s23, 4  ;;  %s4344_s0 = sshra.s32 %s5467_s27, 4  ;;  %s1321_s15 = int_to_ptr.vmem [resolvable:$true] %s1320_s15  ;;  %s4345_s0 = int_to_ptr.hbm [resolvable:$true] %s4344_s0 }
 0x19b   : > { %s4346_s2 = scalar_lea.hbm %s4345_s0, 1  ;;  %s4350_s10 = scalar_lea.hbm %s6004_s6, 1 }
 0x19c   : > { %p4347_p4 = scmp.ne.s32.totalorder %s4345_s0, %s4346_s2  ;;  %p4351_p11 = scmp.lt.s32.totalorder %s4345_s0, %s6004_s6 }
 0x19d   : > { %p4352_p12 = scmp.lt.s32.totalorder %s4350_s10, %s4346_s2 }
 0x19e   : > { %s1344_s4 = sshll.u32 %s6005_s16, 4  ;;  %p4348_p7 = pnand %p4347_p4, %p3501_p10  ;;  %s5478_s4 = int_to_ptr.hbm [resolvable:$true] %s1344_s4 }
 0x19f   : > { %p4353_p13 = por %p4352_p12, %p4351_p11 }
 0x1a0   : > { %p4349_p8 = pneg %p4348_p7 }
 0x1a2   : > { %p4354_p0 = pnand %p4353_p13, %p4349_p8 }
 0x1a4   : > { %4357 = shalt.err (!%p4354_p0)
}
 0x1a5   : > { %s6006_s3 = sld [smem:[#allocation109_spill]]  ;;  %s4915_s23 = smov [#allocation35]  }
 0x1a6   : > { %3380 = dma.hbm_to_vmem [thread:$0]  (%p3501_p10), %s5467_s27, 16, %s1321_s15, [#allocation31]  }
 0x1a7   : > { %s1346_s5 = sshll.u32 %s4915_s23, 4  ;;  %s4372_s0 = sshra.s32 %s5478_s4, 4  ;;  %s1347_s5 = int_to_ptr.vmem [resolvable:$true] %s1346_s5  ;;  %s4373_s0 = int_to_ptr.hbm [resolvable:$true] %s4372_s0 }
 0x1a8   : > { %s4374_s2 = scalar_lea.hbm %s4373_s0, 1  ;;  %s4378_s10 = scalar_lea.hbm %s6005_s16, 1 }
 0x1a9   : > { %p4375_p1 = scmp.ne.s32.totalorder %s4373_s0, %s4374_s2  ;;  %p4379_p4 = scmp.lt.s32.totalorder %s4373_s0, %s6005_s16 }
 0x1aa   : > { %p4380_p7 = scmp.lt.s32.totalorder %s4378_s10, %s4374_s2 }
 0x1ab   : > { %s1368_s1 = sshll.u32 %s6006_s3, 4  ;;  %p4376_p2 = pnand %p4375_p1, %p3501_p10  ;;  %s5489_s1 = int_to_ptr.hbm [resolvable:$true] %s1368_s1 }
 0x1ac   : > { %p4381_p8 = por %p4380_p7, %p4379_p4 }
 0x1ad   : > { %p4377_p3 = pneg %p4376_p2 }
 0x1af   : > { %p4382_p11 = pnand %p4381_p8, %p4377_p3 }
 0x1b1   : > { %4385 = shalt.err (!%p4382_p11)
}
 0x1b2   : > { %s6007_s27 = sld [smem:[#allocation110_spill]]  ;;  %s4916_s15 = smov [#allocation38]  }
 0x1b3   : > { %3384 = dma.hbm_to_vmem [thread:$0]  (%p3501_p10), %s5478_s4, 16, %s1347_s5, [#allocation34]  }
 0x1b4   : > { %s1370_s23 = sshll.u32 %s4916_s15, 4  ;;  %s4400_s0 = sshra.s32 %s5489_s1, 4  ;;  %s1371_s23 = int_to_ptr.vmem [resolvable:$true] %s1370_s23  ;;  %s4401_s0 = int_to_ptr.hbm [resolvable:$true] %s4400_s0 }
 0x1b5   : > { %s4402_s2 = scalar_lea.hbm %s4401_s0, 1  ;;  %s4406_s10 = scalar_lea.hbm %s6006_s3, 1 }
 0x1b6   : > { %p4403_p12 = scmp.ne.s32.totalorder %s4401_s0, %s4402_s2  ;;  %p4407_p1 = scmp.lt.s32.totalorder %s4401_s0, %s6006_s3 }
 0x1b7   : > { %p4408_p2 = scmp.lt.s32.totalorder %s4406_s10, %s4402_s2 }
 0x1b8   : > { %s1394_s6 = sshll.u32 %s6007_s27, 4  ;;  %p4404_p13 = pnand %p4403_p12, %p3501_p10  ;;  %s5500_s6 = int_to_ptr.hbm [resolvable:$true] %s1394_s6 }
 0x1b9   : > { %p4409_p3 = por %p4408_p2, %p4407_p1 }
 0x1ba   : > { %p4405_p0 = pneg %p4404_p13 }
 0x1bc   : > { %p4410_p4 = pnand %p4409_p3, %p4405_p0 }
 0x1be   : > { %4413 = shalt.err (!%p4410_p4)
}
 0x1bf   : > { %s6008_s4 = sld [smem:[#allocation112_spill]]  ;;  %s4917_s15 = smov [#allocation41]  }
 0x1c0   : > { %3388 = dma.hbm_to_vmem [thread:$0]  (%p3501_p10), %s5489_s1, 16, %s1371_s23, [#allocation37]  }
 0x1c1   : > { %s1396_s7 = sshll.u32 %s4917_s15, 4  ;;  %s4428_s0 = sshra.s32 %s5500_s6, 4  ;;  %s1397_s7 = int_to_ptr.vmem [resolvable:$true] %s1396_s7  ;;  %s4429_s0 = int_to_ptr.hbm [resolvable:$true] %s4428_s0 }
 0x1c2   : > { %s4430_s2 = scalar_lea.hbm %s4429_s0, 1  ;;  %s4434_s10 = scalar_lea.hbm %s6007_s27, 1 }
 0x1c3   : > { %p4431_p7 = scmp.ne.s32.totalorder %s4429_s0, %s4430_s2  ;;  %p4435_p12 = scmp.lt.s32.totalorder %s4429_s0, %s6007_s27 }
 0x1c4   : > { %p4436_p13 = scmp.lt.s32.totalorder %s4434_s10, %s4430_s2 }
 0x1c5   : > { %s1418_s5 = sshll.u32 %s6008_s4, 4  ;;  %p4432_p8 = pnand %p4431_p7, %p3501_p10  ;;  %s5511_s5 = int_to_ptr.hbm [resolvable:$true] %s1418_s5 }
 0x1c6   : > { %p4437_p0 = por %p4436_p13, %p4435_p12 }
 0x1c7   : > { %p4433_p11 = pneg %p4432_p8 }
 0x1c9   : > { %p4438_p1 = pnand %p4437_p0, %p4433_p11 }
 0x1cb   : > { %4441 = shalt.err (!%p4438_p1)
}
 0x1cc   : > { %s6009_s1 = sld [smem:[#allocation113_spill]]  ;;  %s4918_s23 = smov [#allocation44]  }
 0x1cd   : > { %3392 = dma.hbm_to_vmem [thread:$0]  (%p3501_p10), %s5500_s6, 16, %s1397_s7, [#allocation40]  }
 0x1ce   : > { %s1420_s15 = sshll.u32 %s4918_s23, 4  ;;  %s4456_s0 = sshra.s32 %s5511_s5, 4  ;;  %s1421_s15 = int_to_ptr.vmem [resolvable:$true] %s1420_s15  ;;  %s4457_s0 = int_to_ptr.hbm [resolvable:$true] %s4456_s0 }
 0x1cf   : > { %s4458_s2 = scalar_lea.hbm %s4457_s0, 1  ;;  %s4462_s10 = scalar_lea.hbm %s6008_s4, 1 }
 0x1d0   : > { %p4459_p2 = scmp.ne.s32.totalorder %s4457_s0, %s4458_s2  ;;  %p4463_p7 = scmp.lt.s32.totalorder %s4457_s0, %s6008_s4 }
 0x1d1   : > { %p4464_p8 = scmp.lt.s32.totalorder %s4462_s10, %s4458_s2 }
 0x1d2   : > { %s1444_s3 = sshll.u32 %s6009_s1, 4  ;;  %p4460_p3 = pnand %p4459_p2, %p3501_p10  ;;  %s5522_s3 = int_to_ptr.hbm [resolvable:$true] %s1444_s3 }
 0x1d3   : > { %p4465_p11 = por %p4464_p8, %p4463_p7 }
 0x1d4   : > { %p4461_p4 = pneg %p4460_p3 }
 0x1d6   : > { %p4466_p12 = pnand %p4465_p11, %p4461_p4 }
 0x1d8   : > { %4469 = shalt.err (!%p4466_p12)
}
 0x1d9   : > { %s6010_s7 = sld [smem:[#allocation114_spill]]  ;;  %s4919_s23 = smov [#allocation47]  }
 0x1da   : > { %3396 = dma.hbm_to_vmem [thread:$0]  (%p3501_p10), %s5511_s5, 16, %s1421_s15, [#allocation43]  }
 0x1db   : > { %s1446_s8 = sshll.u32 %s4919_s23, 4  ;;  %s4484_s0 = sshra.s32 %s5522_s3, 4  ;;  %s1447_s8 = int_to_ptr.vmem [resolvable:$true] %s1446_s8  ;;  %s4485_s0 = int_to_ptr.hbm [resolvable:$true] %s4484_s0 }
 0x1dc   : > { %s4486_s2 = scalar_lea.hbm %s4485_s0, 1  ;;  %s4490_s10 = scalar_lea.hbm %s6009_s1, 1 }
 0x1dd   : > { %p4487_p13 = scmp.ne.s32.totalorder %s4485_s0, %s4486_s2  ;;  %p4491_p2 = scmp.lt.s32.totalorder %s4485_s0, %s6009_s1 }
 0x1de   : > { %p4492_p3 = scmp.lt.s32.totalorder %s4490_s10, %s4486_s2 }
 0x1df   : > { %s1468_s6 = sshll.u32 %s6010_s7, 4  ;;  %p4488_p0 = pnand %p4487_p13, %p3501_p10  ;;  %s5533_s6 = int_to_ptr.hbm [resolvable:$true] %s1468_s6 }
 0x1e0   : > { %p4493_p4 = por %p4492_p3, %p4491_p2 }
 0x1e1   : > { %p4489_p1 = pneg %p4488_p0 }
 0x1e3   : > { %p4494_p7 = pnand %p4493_p4, %p4489_p1 }
 0x1e5   : > { %4497 = shalt.err (!%p4494_p7)
}
 0x1e6   : > { %s6011_s5 = sld [smem:[#allocation116_spill]]  ;;  %s4920_s15 = smov [#allocation50]  }
 0x1e7   : > { %3400 = dma.hbm_to_vmem [thread:$0]  (%p3501_p10), %s5522_s3, 16, %s1447_s8, [#allocation46]  }
 0x1e8   : > { %s1470_s23 = sshll.u32 %s4920_s15, 4  ;;  %s4512_s0 = sshra.s32 %s5533_s6, 4  ;;  %s1471_s23 = int_to_ptr.vmem [resolvable:$true] %s1470_s23  ;;  %s4513_s0 = int_to_ptr.hbm [resolvable:$true] %s4512_s0 }
 0x1e9   : > { %s4514_s2 = scalar_lea.hbm %s4513_s0, 1  ;;  %s4518_s10 = scalar_lea.hbm %s6010_s7, 1 }
 0x1ea   : > { %p4515_p8 = scmp.ne.s32.totalorder %s4513_s0, %s4514_s2  ;;  %p4519_p13 = scmp.lt.s32.totalorder %s4513_s0, %s6010_s7 }
 0x1eb   : > { %p4520_p0 = scmp.lt.s32.totalorder %s4518_s10, %s4514_s2 }
 0x1ec   : > { %s1494_s4 = sshll.u32 %s6011_s5, 4  ;;  %p4516_p11 = pnand %p4515_p8, %p3501_p10  ;;  %s5544_s4 = int_to_ptr.hbm [resolvable:$true] %s1494_s4 }
 0x1ed   : > { %p4521_p1 = por %p4520_p0, %p4519_p13 }
 0x1ee   : > { %p4517_p12 = pneg %p4516_p11 }
 0x1f0   : > { %p4522_p2 = pnand %p4521_p1, %p4517_p12 }
 0x1f2   : > { %4525 = shalt.err (!%p4522_p2)
}
 0x1f3   : > { %s6012_s8 = sld [smem:[#allocation118_spill]]  ;;  %s4921_s15 = smov [#allocation53]  }
 0x1f4   : > { %3404 = dma.hbm_to_vmem [thread:$0]  (%p3501_p10), %s5533_s6, 16, %s1471_s23, [#allocation49]  }
 0x1f5   : > { %s1496_s1 = sshll.u32 %s4921_s15, 4  ;;  %s4540_s0 = sshra.s32 %s5544_s4, 4  ;;  %s1497_s1 = int_to_ptr.vmem [resolvable:$true] %s1496_s1  ;;  %s4541_s0 = int_to_ptr.hbm [resolvable:$true] %s4540_s0 }
 0x1f6   : > { %s4542_s2 = scalar_lea.hbm %s4541_s0, 1  ;;  %s4546_s10 = scalar_lea.hbm %s6011_s5, 1 }
 0x1f7   : > { %p4543_p3 = scmp.ne.s32.totalorder %s4541_s0, %s4542_s2  ;;  %p4547_p8 = scmp.lt.s32.totalorder %s4541_s0, %s6011_s5 }
 0x1f8   : > { %p4548_p11 = scmp.lt.s32.totalorder %s4546_s10, %s4542_s2 }
 0x1f9   : > { %s1518_s3 = sshll.u32 %s6012_s8, 4  ;;  %p4544_p4 = pnand %p4543_p3, %p3501_p10  ;;  %s5555_s3 = int_to_ptr.hbm [resolvable:$true] %s1518_s3 }
 0x1fa   : > { %p4549_p12 = por %p4548_p11, %p4547_p8 }
 0x1fb   : > { %p4545_p7 = pneg %p4544_p4 }
 0x1fd   : > { %p4550_p13 = pnand %p4549_p12, %p4545_p7 }
 0x1ff   : > { %4553 = shalt.err (!%p4550_p13)
}
 0x200   : > { %s6013_s6 = sld [smem:[#allocation120_spill]]  ;;  %s4922_s23 = smov [#allocation56]  }
 0x201   : > { %3408 = dma.hbm_to_vmem [thread:$0]  (%p3501_p10), %s5544_s4, 16, %s1497_s1, [#allocation52]  }
 0x202   : > { %s1520_s15 = sshll.u32 %s4922_s23, 4  ;;  %s4568_s0 = sshra.s32 %s5555_s3, 4  ;;  %s1521_s15 = int_to_ptr.vmem [resolvable:$true] %s1520_s15  ;;  %s4569_s0 = int_to_ptr.hbm [resolvable:$true] %s4568_s0 }
 0x203   : > { %s4570_s2 = scalar_lea.hbm %s4569_s0, 1  ;;  %s4574_s10 = scalar_lea.hbm %s6012_s8, 1 }
 0x204   : > { %p4571_p0 = scmp.ne.s32.totalorder %s4569_s0, %s4570_s2  ;;  %p4575_p3 = scmp.lt.s32.totalorder %s4569_s0, %s6012_s8 }
 0x205   : > { %p4576_p4 = scmp.lt.s32.totalorder %s4574_s10, %s4570_s2 }
 0x206   : > { %s1545_s7 = sshll.u32 %s6013_s6, 4  ;;  %p4572_p1 = pnand %p4571_p0, %p3501_p10  ;;  %s5566_s7 = int_to_ptr.hbm [resolvable:$true] %s1545_s7 }
 0x207   : > { %p4577_p7 = por %p4576_p4, %p4575_p3 }
 0x208   : > { %p4573_p2 = pneg %p4572_p1 }
 0x20a   : > { %p4578_p8 = pnand %p4577_p7, %p4573_p2 }
 0x20c   : > { %4581 = shalt.err (!%p4578_p8)
}
 0x20d   : > { %s6014_s4 = sld [smem:[#allocation122_spill]]  ;;  %s4923_s23 = smov [#allocation59]  }
 0x20e   : > { %3412 = dma.hbm_to_vmem [thread:$0]  (%p3501_p10), %s5555_s3, 16, %s1521_s15, [#allocation55]  }
 0x20f   : > { %s1547_s5 = sshll.u32 %s4923_s23, 4  ;;  %s4596_s0 = sshra.s32 %s5566_s7, 4  ;;  %s1548_s5 = int_to_ptr.vmem [resolvable:$true] %s1547_s5  ;;  %s4597_s0 = int_to_ptr.hbm [resolvable:$true] %s4596_s0 }
 0x210   : > { %s4598_s2 = scalar_lea.hbm %s4597_s0, 1  ;;  %s4602_s10 = scalar_lea.hbm %s6013_s6, 1 }
 0x211   : > { %p4599_p11 = scmp.ne.s32.totalorder %s4597_s0, %s4598_s2  ;;  %p4603_p0 = scmp.lt.s32.totalorder %s4597_s0, %s6013_s6 }
 0x212   : > { %p4604_p1 = scmp.lt.s32.totalorder %s4602_s10, %s4598_s2 }
 0x213   : > { %s1569_s1 = sshll.u32 %s6014_s4, 4  ;;  %p4600_p12 = pnand %p4599_p11, %p3501_p10  ;;  %s5577_s1 = int_to_ptr.hbm [resolvable:$true] %s1569_s1 }
 0x214   : > { %p4605_p2 = por %p4604_p1, %p4603_p0 }
 0x215   : > { %p4601_p13 = pneg %p4600_p12 }
 0x217   : > { %p4606_p3 = pnand %p4605_p2, %p4601_p13 }
 0x219   : > { %4609 = shalt.err (!%p4606_p3)
}
 0x21a   : > { %3416 = dma.hbm_to_vmem [thread:$0]  (%p3501_p10), %s5566_s7, 16, %s1548_s5, [#allocation58]  }
 0x21b   : > { %s4924_s3 = smov [#allocation62]   ;;  %s1592_s23 = sshll.u32 %s5166_s12, 4  ;;  %s5588_s23 = int_to_ptr.hbm [resolvable:$true] %s1592_s23 }
 0x21c   : > { %s1571_s15 = sshll.u32 %s4924_s3, 4  ;;  %s4624_s0 = sshra.s32 %s5577_s1, 4  ;;  %s1572_s15 = int_to_ptr.vmem [resolvable:$true] %s1571_s15  ;;  %s4625_s0 = int_to_ptr.hbm [resolvable:$true] %s4624_s0 }
 0x21d   : > { %s4626_s2 = scalar_lea.hbm %s4625_s0, 1  ;;  %s4630_s10 = scalar_lea.hbm %s6014_s4, 1 }
 0x21e   : > { %p4627_p4 = scmp.ne.s32.totalorder %s4625_s0, %s4626_s2  ;;  %p4631_p11 = scmp.lt.s32.totalorder %s4625_s0, %s6014_s4 }
 0x21f   : > { %p4632_p12 = scmp.lt.s32.totalorder %s4630_s10, %s4626_s2 }
 0x220   : > { %p4628_p7 = pnand %p4627_p4, %p3501_p10 }
 0x221   : > { %p4633_p13 = por %p4632_p12, %p4631_p11 }
 0x222   : > { %p4629_p8 = pneg %p4628_p7 }
 0x224   : > { %p4634_p0 = pnand %p4633_p13, %p4629_p8 }
 0x226   : > { %4637 = shalt.err (!%p4634_p0)
}
 0x227   : > { %3420 = dma.hbm_to_vmem [thread:$0]  (%p3501_p10), %s5577_s1, 16, %s1572_s15, [#allocation61]  }
 0x228   : > { %s1607_s7 = sshll.u32 %s5171_s17, 4  ;;  %s4925_s5 = smov [#allocation65]   ;;  %s5599_s7 = int_to_ptr.hbm [resolvable:$true] %s1607_s7 }
 0x229   : > { %s1594_s3 = sshll.u32 %s4925_s5, 4  ;;  %s4652_s0 = sshra.s32 %s5588_s23, 4  ;;  %s1595_s3 = int_to_ptr.vmem [resolvable:$true] %s1594_s3  ;;  %s4653_s0 = int_to_ptr.hbm [resolvable:$true] %s4652_s0 }
 0x22a   : > { %s4654_s2 = scalar_lea.hbm %s4653_s0, 8  ;;  %s4658_s10 = scalar_lea.hbm %s5166_s12, 8 }
 0x22b   : > { %p4655_p1 = scmp.ne.s32.totalorder %s4653_s0, %s4654_s2  ;;  %p4659_p4 = scmp.lt.s32.totalorder %s4653_s0, %s5166_s12 }
 0x22c   : > { %p4660_p7 = scmp.lt.s32.totalorder %s4658_s10, %s4654_s2 }
 0x22d   : > { %p4656_p2 = pnand %p4655_p1, %p3501_p10 }
 0x22e   : > { %p4661_p8 = por %p4660_p7, %p4659_p4 }
 0x22f   : > { %p4657_p3 = pneg %p4656_p2 }
 0x231   : > { %p4662_p11 = pnand %p4661_p8, %p4657_p3 }
 0x233   : > { %4665 = shalt.err (!%p4662_p11)
}
 0x234   : > { %s6015_s1 = smov 4   ;;  %s4926_s15 = smov [#allocation66]  }
 0x235   : > { %3424 = dma.hbm_to_vmem [thread:$0]  (%p3501_p10), %s5588_s23, 128, %s1595_s3, [#allocation64], %s5995_s26, %s5995_s26, %s6015_s1  }
 0x236   : > { %s1609_s5 = sshll.u32 %s4926_s15, 4  ;;  %s4680_s4 = sshra.s32 %s5599_s7, 4  ;;  %s1610_s5 = int_to_ptr.vmem [resolvable:$true] %s1609_s5  ;;  %s4681_s4 = int_to_ptr.hbm [resolvable:$true] %s4680_s4 }
 0x237   : > { %s4682_s0 = scalar_lea.hbm %s4681_s4, 1  ;;  %s4686_s2 = scalar_lea.hbm %s5171_s17, 1 }
 0x238   : > { %p4683_p12 = scmp.ne.s32.totalorder %s4681_s4, %s4682_s0  ;;  %p4687_p1 = scmp.lt.s32.totalorder %s4681_s4, %s5171_s17 }
 0x239   : > { %p4688_p2 = scmp.lt.s32.totalorder %s4686_s2, %s4682_s0 }
 0x23a   : > { %p4684_p13 = pnand %p4683_p12, %p3501_p10 }
 0x23b   : > { %p4689_p3 = por %p4688_p2, %p4687_p1 }
 0x23c   : > { %p4685_p0 = pneg %p4684_p13 }
 0x23e   : > { %p4690_p4 = pnand %p4689_p3, %p4685_p0 }
 0x240   : > { %4693 = shalt.err (!%p4690_p4)
}
 0x241   : > { %3426 = dma.hbm_to_vmem [thread:$0]  (%p3501_p10), %s5599_s7, 16, %s1610_s5, [#allocation67]  }
 0x242 PF: > { %1630 = sbr.rel (%p5226_p9) target bundleno = 3729 (0xe91), region = 208  ;;  %p3535_p7 = scmp.eq.s32.totalorder (!%p5226_p9), %s5199_s28, 0 }
 0x247   : > { %4753 = dma.done.wait (%p3535_p7), [#allocation16], 16  }
 0x248   : > { %4755 = vsyncadd (%p3535_p7), [#allocation16], 4294967280 }
 0x249   : > { %4757 = dma.done.wait (%p3535_p7), [#allocation19], 32  }
 0x24a   : > { %4759 = vsyncadd (%p3535_p7), [#allocation19], 4294967264 }
 0x24b   : > { %4761 = dma.done.wait (%p3535_p7), [#allocation22], 208  }
 0x24c   : > { %4763 = vsyncadd (%p3535_p7), [#allocation22], 4294967088 }
 0x24d   : > { %4765 = dma.done.wait (%p3535_p7), [#allocation25], 32  }
 0x24e   : > { %4767 = vsyncadd (%p3535_p7), [#allocation25], 4294967264 }
 0x24f   : > { %4769 = dma.done.wait (%p3535_p7), [#allocation28], 208  }
 0x250   : > { %4771 = vsyncadd (%p3535_p7), [#allocation28], 4294967088 }
 0x251   : > { %4773 = dma.done.wait (%p3535_p7), [#allocation31], 32  }
 0x252   : > { %4775 = vsyncadd (%p3535_p7), [#allocation31], 4294967264 }
 0x253   : > { %4777 = dma.done.wait (%p3535_p7), [#allocation34], 208  }
 0x254   : > { %4779 = vsyncadd (%p3535_p7), [#allocation34], 4294967088 }
 0x255   : > { %4781 = dma.done.wait (%p3535_p7), [#allocation37], 32  }
 0x256   : > { %4783 = vsyncadd (%p3535_p7), [#allocation37], 4294967264 }
 0x257   : > { %4785 = dma.done.wait (%p3535_p7), [#allocation40], 208  }
 0x258   : > { %4787 = vsyncadd (%p3535_p7), [#allocation40], 4294967088 }
 0x259   : > { %4789 = dma.done.wait (%p3535_p7), [#allocation43], 32  }
 0x25a   : > { %4791 = vsyncadd (%p3535_p7), [#allocation43], 4294967264 }
 0x25b   : > { %4793 = dma.done.wait (%p3535_p7), [#allocation46], 208  }
 0x25c   : > { %4795 = vsyncadd (%p3535_p7), [#allocation46], 4294967088 }
 0x25d   : > { %4797 = dma.done.wait (%p3535_p7), [#allocation49], 32  }
 0x25e   : > { %4799 = vsyncadd (%p3535_p7), [#allocation49], 4294967264 }
 0x25f   : > { %4801 = dma.done.wait (%p3535_p7), [#allocation52], 208  }
 0x260   : > { %4803 = vsyncadd (%p3535_p7), [#allocation52], 4294967088 }
 0x261   : > { %4805 = dma.done.wait (%p3535_p7), [#allocation55], 32  }
 0x262   : > { %4807 = vsyncadd (%p3535_p7), [#allocation55], 4294967264 }
 0x263   : > { %4809 = dma.done.wait (%p3535_p7), [#allocation58], 32  }
 0x264   : > { %4811 = vsyncadd (%p3535_p7), [#allocation58], 4294967264 }
 0x265   : > { %4813 = dma.done.wait (%p3535_p7), [#allocation61], 32  }
 0x266   : > { %4815 = vsyncadd (%p3535_p7), [#allocation61], 4294967264 }
 0x267   : > { %4817 = dma.done.wait (%p3535_p7), [#allocation64], 144  }
 0x268   : > { %4819 = vsyncadd (%p3535_p7), [#allocation64], 4294967152 }
 0x269   : > { %4821 = dma.done.wait (%p3535_p7), [#allocation67], 16  }
 0x26a   : > { %4823 = vsyncadd (%p3535_p7), [#allocation67], 4294967280  ;;  %s6016_s18 = sld [smem:[#allocation88_spill]]  ;;  %p1907_p9 = scmp.lt.s32.totalorder %s5199_s28, 1  ;;  %vm1915_vm0 = vcmask 31744   ;;  %vm1918_vm1 = vcmask 25600  }
 0x26b   : > { %v4927_v0 = vmov 0.0   ;;  %s6017_s23 = sld [smem:[#allocation89_spill]]  ;;  %s4928_s10 = smov 4   ;;  %vm1965_vm2 = vcmask 1045504   ;;  %vm1946_vm3 = vcmask 64512   ;;  %vm1961_vm4 = vcmask 97280  }
 0x26c   : > { %1916 = vst.msk [vmem:[#allocation2] sm:$0xff] %vm1915_vm0, %v4927_v0  ;;  %s1908_s26 = scalar_select %p1907_p9, %s5199_s28, 1  ;;  %vm1999_vm5 = vcmask 58368   ;;  %vm2051_vm6 = vcmask 1043456   ;;  %vm2027_vm7 = vcmask 130048   ;;  %vm2047_vm8 = vcmask 195584  }
 0x26d   : > { %1917 = vst.msk [vmem:[#allocation2 + $0x8] sm:$0xff] %vm1915_vm0, %v4927_v0  ;;  %s4929_s1 = smov 8   ;;  %s6019_s15 = sld [smem:[#allocation90_spill]]  ;;  %vm2169_vm9 = vcmask 57344   ;;  %vm2500_vm10 = vcmask 62464   ;;  %vm2502_vm11 = vcmask 60416  }
 0x26e   : > { %1919 = vst.msk [vmem:[#allocation2 + $0x10] sm:$0x3] %vm1918_vm1, %v4927_v0  ;;  %s3344_s4 = sshll.u32 %s1908_s26, 4  ;;  %s6020_s5 = sld [smem:[#allocation91_spill]]  ;;  %vm2634_vm12 = vcmask 128000   ;;  %vm2636_vm13 = vcmask 125952  }
 0x26f   : > { %1997 = vst.msk [vmem:[#allocation3] sm:$0xff] %vm1946_vm3, %v4927_v0  ;;  %s6021_s0 = sld [smem:[#allocation92_spill]]  ;;  %vm2650_vm14 = vcmask 261120   ;;  %vm2681_vm15 = vcmask 392192   ;;  %vm2757_vm1 = vcmask 32768  }
 0x270   : > { %s1911_s3 = scalar_lea.vmem %s6016_s18, %s3344_s4  ;;  %1998 = vst.msk [vmem:[#allocation3 + $0x8] sm:$0xff] %vm1946_vm3, %v4927_v0  ;;  %s6022_s2 = sld [smem:[#allocation93_spill]] }
 0x271   : > { %s6018_s7 = smov %s6017_s23  ;;  %v1913_v1 = vld [vmem:[%s1911_s3] sm:$0xff]  ;;  %v1914_v2 = vld [vmem:[%s1911_s3 + $0x8] sm:$0xff]  ;;  %2083 = vst.msk [vmem:[#allocation4] sm:$0xff] %vm1946_vm3, %v4927_v0  ;;  %s4930_s18 = smov 16  }
 0x272   : > { %1920 = vst.msk [vmem:[#allocation2 + $0x1] sm:$0xff] %vm1915_vm0, %v1913_v1  ;;  %v3276_v9 = vld [vmem:[%s6017_s23] sm:$0xf]  ;;  %v3345_v10 = vld [vmem:[%s6018_s7] sm:$0x30]  ;;  %s6023_s26 = sld [smem:[#allocation94_spill]] }
 0x273   : > { %1921 = vst.msk [vmem:[#allocation2 + $0x9] sm:$0xff] %vm1915_vm0, %v1914_v2  ;;  %v3277_v11 = vor.u32 %v3345_v10, %v3276_v9  ;;  %v3721_v26 = vld [vmem:[%s6019_s15] ss:$0 sm:$0xff]  ;;  %s6024_s4 = sld [smem:[#allocation97_spill]] }
 0x274   : > { %2084 = vst.msk [vmem:[#allocation4 + $0x8] sm:$0xff] %vm1946_vm3, %v4927_v0  ;;  %v3722_v27 = vld [vmem:[%s6020_s5] ss:$0 sm:$0xff]  ;;  %s6025_s23 = sld [smem:[#allocation98_spill]] }
 0x275   : > { %v1967_v12 = vsel %vm1965_vm2, %v3277_v11, 0  ;;  %2167 = vst.msk [vmem:[#allocation5] sm:$0xff] %vm1946_vm3, %v4927_v0  ;;  %v3723_v30 = vld [vmem:[%s6021_s0] ss:$0 sm:$0xff]  ;;  %s6026_s3 = sld [smem:[#allocation95_spill]] }
 0x276   : > { %1976 = vmatpush.bf16.msra.mxu0 %v1967_v12  ;;  %2168 = vst.msk [vmem:[#allocation5 + $0x8] sm:$0xff] %vm1946_vm3, %v4927_v0  ;;  %v2033_v45 = vld [vmem:[%s6022_s2 + $0x8] sm:$0xf]  ;;  %v3346_v49 = vld [vmem:[%s6022_s2] sm:$0xff]  ;;  %s6027_s15 = sld [smem:[#allocation99_spill]] }
 0x277   : > { %2235 = vst.msk [vmem:[#allocation6] sm:$0xff] %vm1946_vm3, %v4927_v0  ;;  %v2043_v46 = vunpack.c.l.b16 %v2033_v45  ;;  %s6028_s5 = sld [smem:[#allocation96_spill]] }
 0x278   : > { %2287 = vst.msk [vmem:[#allocation7] sm:$0xff] %vm1946_vm3, %v4927_v0  ;;  %v3724_v63 = vld [vmem:[%s6023_s26] ss:$0 sm:$0xff]  ;;  %s6029_s0 = sld [smem:[#allocation119_spill]] }
 0x279   : > { %v1924_v3 = vld [vmem:[#allocation2 + $0x1] sm:$0xff]  ;;  %2288 = vst.msk [vmem:[#allocation7 + $0x8] sm:$0xff] %vm1946_vm3, %v4927_v0  ;;  %v2045_v47 = vpack.c.b16 %v2043_v46, %v2043_v46  ;;  %v3725_v1 = vld [vmem:[%s6024_s4] ss:$0 sm:$0xff] }
 0x27a   : > { %v1925_v4 = vld [vmem:[#allocation2 + $0x9] sm:$0xff]  ;;  %2308 = vst.msk [vmem:[#allocation8] sm:$0xff] %vm1946_vm3, %v4927_v0  ;;  %v1922_v16 = vld [vmem:[#allocation2] sm:$0xff] }
 0x27b   : > { %v3691_v5 = vpack.i.bf16 %v1925_v4, %v1924_v3  ;;  %v1926_v6 = vld [vmem:[#allocation2 + $0x2] sm:$0xff]  ;;  %v1927_v7 = vld [vmem:[#allocation2 + $0xa] sm:$0xff]  ;;  %2371 = vst.msk [vmem:[#allocation9] sm:$0xff] %vm1946_vm3, %v4927_v0  ;;  %v2053_v48 = vsel %vm2051_vm6, %v2045_v47, 0  ;;  %v3726_v4 = vld [vmem:[%s6025_s23] ss:$0 sm:$0xff] }
 0x27c   : > { %v3696_v8 = vpack.i.bf16 %v1927_v7, %v1926_v6  ;;  %2435 = vst.msk [vmem:[#allocation10] sm:$0xff] %vm1946_vm3, %v4927_v0  ;;  %v1923_v17 = vld [vmem:[#allocation2 + $0x8] sm:$0xff]  ;;  %2061 = vmatpush.bf16.msra.mxu1 %v2053_v48  ;;  %v3728_v48 = vld [vmem:[#allocation18] ss:$0 sm:$0xff] }
 0x27d   : > { %3692 = vrot.lane.b32.xlu0 %v3691_v5, %s4928_s10  ;;  %2553 = vst.msk [vmem:[#allocation12] sm:$0xff] %vm1946_vm3, %v4927_v0 }
 0x27e   : > { %2000 = vst.msk [vmem:[#allocation3 + $0x10] sm:$0x3] %vm1999_vm5, %v4927_v0  ;;  %s6030_s4 = smov %s6029_s0 }
 0x27f   : > { %2085 = vst.msk [vmem:[#allocation4 + $0x10] sm:$0x3] %vm1999_vm5, %v4927_v0 }
 0x280   : > { %2236 = vst.msk [vmem:[#allocation6 + $0x8] sm:$0x3] %vm1999_vm5, %v4927_v0  ;;  %2062 = vmatpush.bf16.msra.mxu1 %v3346_v49 }
 0x281   : > { %2309 = vst.msk [vmem:[#allocation8 + $0x8] sm:$0x3] %vm1999_vm5, %v4927_v0 }
 0x282   : > { %2372 = vst.msk [vmem:[#allocation9 + $0x8] sm:$0x3] %vm1999_vm5, %v4927_v0 }
 0x283   : > { %2170 = vst.msk [vmem:[#allocation5 + $0x10] sm:$0x1] %vm2169_vm9, %v4927_v0 }
 0x284   : > { %2436 = vst.msk [vmem:[#allocation10 + $0x8] sm:$0x1] %vm2169_vm9, %v4927_v0 }
 0x285   : > { %3697 = vrot.lane.b32.xlu0 %v3696_v8, %s4929_s1  ;;  %2501 = vst.msk [vmem:[#allocation11] sm:$0x3f] %vm2500_vm10, %v4927_v0 }
 0x286   : > { %2572 = vst.msk [vmem:[#allocation13] sm:$0x3f] %vm2500_vm10, %v4927_v0 }
 0x287   : > { %2635 = vst.msk [vmem:[#allocation14] sm:$0x3f] %vm2634_vm12, %v4927_v0  ;;  %v3357_v0 = vld [vmem:[%s6029_s0 + $0x10] sm:$0xff] }
 0x2ef   : > { %v3693_v13 = vpop.permute.xlu0 %3692 }
 0x2f0   : > { %v3695_v14 = vunpack.i.h.bf16 %v3693_v13  ;;  %v3694_v15 = vunpack.i.l.bf16 %v3693_v13 }
 0x2f2   : > { %v1944_v21 = vsel %vm1915_vm0, %v1922_v16, %v3694_v15  ;;  %v1945_v22 = vsel %vm1915_vm0, %v1923_v17, %v3695_v14 }
 0x2f7   : > { %v3698_v18 = vpop.permute.xlu0 %3697 }
 0x2f8   : > { %v3700_v19 = vunpack.i.h.bf16 %v3698_v18  ;;  %v3699_v20 = vunpack.i.l.bf16 %v3698_v18 }
 0x2fa   : > { %v1947_v23 = vsel %vm1946_vm3, %v1944_v21, %v3699_v20  ;;  %v1948_v24 = vsel %vm1946_vm3, %v1945_v22, %v3700_v19  ;;  %v2117_v19 = vld [vmem:[%s6026_s3 + $0x8] sm:$0xf] }
 0x2fb   : > { %v1949_v25 = vpack.c.bf16 %v1948_v24, %v1947_v23  ;;  %v2127_v20 = vunpack.c.l.b16 %v2117_v19  ;;  %v3347_v23 = vld [vmem:[%s6026_s3] sm:$0xff] }
 0x2fd   : > { %3278 = vmatmul.msk.bf16.vlgmr.msra.gmra.mxu0 %vm1961_vm4, %v1949_v25  ;;  %v2129_v21 = vpack.c.b16 %v2127_v20, %v2127_v20 }
 0x2ff   : > { %v2135_v22 = vsel %vm2051_vm6, %v2129_v21, 0 }
 0x300   : > { %2143 = vmatpush.bf16.msra.mxu2 %v2135_v22 }
 0x304   : > { %2144 = vmatpush.bf16.msra.mxu2 %v3347_v23 }
 0x37a   : > { %v1978_v28 = vpop.f32.mrf.mxu0 }
 0x37b   : > { %v1979_v29 = vadd.f32 %v3721_v26, %v1978_v28 }
 0x37d   : > { %v1987_v31 = vmul.f32 %v3722_v27, %v1979_v29 }
 0x37f   : > { %v5748_v32 = vadd.f32 %v3723_v30, %v1987_v31 }
 0x381   : > { %v1995_v33 = vmax.f32 %v5748_v32, 0.0 }
 0x382   : > { %v1980_v34 = vpop.f32.mrf.mxu0 }
 0x383   : > { %2001 = vst.msk [vmem:[#allocation3 + $0x1] sm:$0xff] %vm1946_vm3, %v1995_v33  ;;  %v1981_v35 = vadd.f32 %v3721_v26, %v1980_v34 }
 0x385   : > { %v1988_v36 = vmul.f32 %v3722_v27, %v1981_v35 }
 0x387   : > { %v5754_v37 = vadd.f32 %v3723_v30, %v1988_v36 }
 0x389   : > { %v1996_v38 = vmax.f32 %v5754_v37, 0.0 }
 0x38a   : > { %v2005_v39 = vld [vmem:[#allocation3 + $0x1] sm:$0xff] }
 0x38b   : > { %2002 = vst.msk [vmem:[#allocation3 + $0x9] sm:$0xff] %vm1946_vm3, %v1996_v38  ;;  %v2003_v54 = vld [vmem:[#allocation3] sm:$0xff] }
 0x392   : > { %v2006_v40 = vld [vmem:[#allocation3 + $0x9] sm:$0xff] }
 0x393   : > { %v3701_v41 = vpack.i.bf16 %v2006_v40, %v2005_v39  ;;  %v2007_v42 = vld [vmem:[#allocation3 + $0x2] sm:$0xff]  ;;  %v2008_v43 = vld [vmem:[#allocation3 + $0xa] sm:$0xff] }
 0x394   : > { %v3706_v44 = vpack.i.bf16 %v2008_v43, %v2007_v42  ;;  %v2004_v55 = vld [vmem:[#allocation3 + $0x8] sm:$0xff] }
 0x395   : > { %3702 = vrot.lane.b32.xlu1 %v3701_v41, %s4929_s1  ;;  %v2191_v41 = vld [vmem:[%s6027_s15 + $0x8] sm:$0xf]  ;;  %v3727_v43 = vld [vmem:[%s6028_s5] ss:$0 sm:$0xff] }
 0x396   : > { %v2201_v42 = vunpack.c.l.b16 %v2191_v41 }
 0x39d   : > { %3707 = vrot.lane.b32.xlu1 %v3706_v44, %s4930_s18  ;;  %v2203_v44 = vpack.c.b16 %v2201_v42, %v2201_v42 }
 0x39f   : > { %v2209_v46 = vsel %vm2051_vm6, %v2203_v44, 0 }
 0x3a0   : > { %2217 = vmatpush.bf16.msra.mxu3 %v2209_v46 }
 0x407   : > { %v3703_v50 = vpop.permute.xlu1 %3702 }
 0x408   : > { %v3705_v51 = vunpack.i.h.bf16 %v3703_v50  ;;  %v3704_v52 = vunpack.i.l.bf16 %v3703_v50  ;;  %v3729_v50 = vld [vmem:[#allocation20] ss:$0 sm:$0xff] }
 0x40a   : > { %v2025_v58 = vsel %vm1946_vm3, %v2003_v54, %v3704_v52  ;;  %v2026_v59 = vsel %vm1946_vm3, %v2004_v55, %v3705_v51 }
 0x40f   : > { %v3708_v53 = vpop.permute.xlu1 %3707 }
 0x410   : > { %v3710_v56 = vunpack.i.h.bf16 %v3708_v53  ;;  %v3709_v57 = vunpack.i.l.bf16 %v3708_v53 }
 0x412   : > { %v2028_v60 = vsel %vm2027_vm7, %v2025_v58, %v3709_v57  ;;  %v2029_v61 = vsel %vm2027_vm7, %v2026_v59, %v3710_v56 }
 0x413   : > { %v2030_v62 = vpack.c.bf16 %v2029_v61, %v2028_v60  ;;  %v3348_v60 = vld [vmem:[%s6027_s15] sm:$0xff] }
 0x414   : > { %2218 = vmatpush.bf16.msra.mxu3 %v3348_v60 }
 0x415   : > { %3283 = vmatmul.msk.bf16.vlgmr.msra.gmra.mxu1 %vm2047_vm8, %v2030_v62 }
 0x492   : > { %v2064_v2 = vpop.f32.mrf.mxu1 }
 0x493   : > { %v2065_v3 = vadd.f32 %v3724_v63, %v2064_v2  ;;  %v3730_v2 = vld [vmem:[#allocation15] ss:$0 sm:$0xff] }
 0x495   : > { %v2073_v5 = vmul.f32 %v3725_v1, %v2065_v3  ;;  %v3731_v3 = vld [vmem:[#allocation24] ss:$0 sm:$0xff] }
 0x497   : > { %v2079_v6 = vadd.f32 %v3726_v4, %v2073_v5 }
 0x499   : > { %v2081_v7 = vmax.f32 %v2079_v6, 0.0  ;;  %v3732_v6 = vld [vmem:[#allocation26] ss:$0 sm:$0xff] }
 0x49a   : > { %v2066_v8 = vpop.f32.mrf.mxu1 }
 0x49b   : > { %2086 = vst.msk [vmem:[#allocation4 + $0x1] sm:$0xff] %vm1946_vm3, %v2081_v7  ;;  %v2067_v9 = vadd.f32 %v3724_v63, %v2066_v8 }
 0x49d   : > { %v2074_v10 = vmul.f32 %v3725_v1, %v2067_v9 }
 0x49f   : > { %v2080_v11 = vadd.f32 %v3726_v4, %v2074_v10 }
 0x4a1   : > { %v2082_v12 = vmax.f32 %v2080_v11, 0.0 }
 0x4a2   : > { %v2090_v13 = vld [vmem:[#allocation4 + $0x1] sm:$0xff] }
 0x4a3   : > { %2087 = vst.msk [vmem:[#allocation4 + $0x9] sm:$0xff] %vm1946_vm3, %v2082_v12  ;;  %v2088_v28 = vld [vmem:[#allocation4] sm:$0xff] }
 0x4aa   : > { %v2091_v14 = vld [vmem:[#allocation4 + $0x9] sm:$0xff] }
 0x4ab   : > { %v3711_v15 = vpack.i.bf16 %v2091_v14, %v2090_v13  ;;  %v2092_v16 = vld [vmem:[#allocation4 + $0x2] sm:$0xff]  ;;  %v2093_v17 = vld [vmem:[#allocation4 + $0xa] sm:$0xff]  ;;  %v2254_v13 = vld [vmem:[#allocation21 + $0x8] sm:$0xf] }
 0x4ac   : > { %v3716_v18 = vpack.i.bf16 %v2093_v17, %v2092_v16  ;;  %v2089_v29 = vld [vmem:[#allocation4 + $0x8] sm:$0xff]  ;;  %v2264_v14 = vunpack.c.l.b16 %v2254_v13  ;;  %v3349_v17 = vld [vmem:[#allocation21] sm:$0xff] }
 0x4ad   : > { %3712 = vrot.lane.b32.xlu2 %v3711_v15, %s4929_s1 }
 0x4ae   : > { %v2266_v15 = vpack.c.b16 %v2264_v14, %v2264_v14  ;;  %v3741_v14 = vld [vmem:[#allocation44] ss:$0 sm:$0xff] }
 0x4b0   : > { %v2272_v16 = vsel %vm2051_vm6, %v2266_v15, 0 }
 0x4b1   : > { %2280 = vmatpush.bf16.msrb.mxu0 %v2272_v16 }
 0x4b5   : > { %3717 = vrot.lane.b32.xlu2 %v3716_v18, %s4930_s18  ;;  %2281 = vmatpush.bf16.msrb.mxu0 %v3349_v17 }
 0x507   : > { %v3713_v24 = vpop.permute.xlu2 %3712 }
 0x508   : > { %v3715_v25 = vunpack.i.h.bf16 %v3713_v24  ;;  %v3714_v26 = vunpack.i.l.bf16 %v3713_v24  ;;  %v3733_v24 = vld [vmem:[#allocation23] ss:$0 sm:$0xff] }
 0x50a   : > { %v2110_v34 = vsel %vm1946_vm3, %v2088_v28, %v3714_v26  ;;  %v2111_v35 = vsel %vm1946_vm3, %v2089_v29, %v3715_v25 }
 0x50f   : > { %v3718_v27 = vpop.permute.xlu2 %3717 }
 0x510   : > { %v3720_v30 = vunpack.i.h.bf16 %v3718_v27  ;;  %v3719_v31 = vunpack.i.l.bf16 %v3718_v27 }
 0x512   : > { %v2112_v36 = vsel %vm2027_vm7, %v2110_v34, %v3719_v31  ;;  %v2113_v39 = vsel %vm2027_vm7, %v2111_v35, %v3720_v30  ;;  %v3734_v30 = vld [vmem:[#allocation30] ss:$0 sm:$0xff]  ;;  %v3735_v34 = vld [vmem:[#allocation32] ss:$0 sm:$0xff] }
 0x513   : > { %v2114_v40 = vpack.c.bf16 %v2113_v39, %v2112_v36 }
 0x515   : > { %3288 = vmatmul.msk.bf16.vlgmr.msra.gmra.mxu2 %vm2047_vm8, %v2114_v40 }
 0x598   : > { %v2146_v45 = vpop.f32.mrf.mxu2 }
 0x599   : > { %v2147_v47 = vadd.f32 %v3727_v43, %v2146_v45 }
 0x59b   : > { %v2151_v49 = vadd.f32 %v2147_v47, %v1995_v33  ;;  %v3350_v47 = vld [vmem:[#allocation27] sm:$0xff] }
 0x59d   : > { %v2157_v51 = vmul.f32 %v3728_v48, %v2151_v49  ;;  %2290 = vst.msk [vmem:[#allocation7] sm:$0xff] %vm1946_vm3, %v2151_v49 }
 0x59f   : > { %v2163_v52 = vadd.f32 %v3729_v50, %v2157_v51 }
 0x5a0   : > { %v2148_v53 = vpop.f32.mrf.mxu2 }
 0x5a1   : > { %v2165_v54 = vmax.f32 %v2163_v52, 0.0  ;;  %v2149_v55 = vadd.f32 %v3727_v43, %v2148_v53  ;;  %v2327_v43 = vld [vmem:[#allocation27 + $0x8] sm:$0xf] }
 0x5a2   : > { %v2337_v44 = vunpack.c.l.b16 %v2327_v43 }
 0x5a3   : > { %2171 = vst.msk [vmem:[#allocation5] sm:$0xff] %vm1946_vm3, %v2165_v54  ;;  %v2152_v56 = vadd.f32 %v2149_v55, %v1996_v38  ;;  %v2390_v54 = vld [vmem:[#allocation33 + $0x8] sm:$0xf] }
 0x5a4   : > { %v2339_v45 = vpack.c.b16 %v2337_v44, %v2337_v44  ;;  %v2400_v55 = vunpack.c.l.b16 %v2390_v54 }
 0x5a5   : > { %v2158_v57 = vmul.f32 %v3728_v48, %v2152_v56  ;;  %2291 = vst.msk [vmem:[#allocation7 + $0x8] sm:$0xff] %vm1946_vm3, %v2152_v56 }
 0x5a6   : > { %v2345_v46 = vsel %vm2051_vm6, %v2339_v45, 0  ;;  %v2402_v56 = vpack.c.b16 %v2400_v55, %v2400_v55 }
 0x5a7   : > { %v2164_v58 = vadd.f32 %v3729_v50, %v2158_v57  ;;  %2353 = vmatpush.bf16.msrb.mxu1 %v2345_v46 }
 0x5a8   : > { %v2408_v57 = vsel %vm2051_vm6, %v2402_v56, 0 }
 0x5a9   : > { %v2166_v32 = vmax.f32 %v2164_v58, 0.0  ;;  %2416 = vmatpush.bf16.msrb.mxu2 %v2408_v57  ;;  %v3351_v58 = vld [vmem:[#allocation33] sm:$0xff] }
 0x5ab   : > { %2172 = vst.msk [vmem:[#allocation5 + $0x8] sm:$0xff] %vm1946_vm3, %v2166_v32  ;;  %2354 = vmatpush.bf16.msrb.mxu1 %v3350_v47  ;;  %v3736_v32 = vld [vmem:[#allocation29] ss:$0 sm:$0xff]  ;;  %v2520_v47 = vld [vmem:[#allocation45 + $0x8] sm:$0xf] }
 0x5ac   : > { %v2292_v25 = vld [vmem:[#allocation7] ss:$2 sm:$0xff]  ;;  %v2294_v26 = vld [vmem:[#allocation7 + $0x1] ss:$2 sm:$0xff] }
 0x5ad   : > { %v2295_v29 = vmax.f32 %v2292_v25, %v2294_v26  ;;  %2417 = vmatpush.bf16.msrb.mxu2 %v3351_v58  ;;  %v3352_v25 = vld [vmem:[#allocation39] sm:$0xff]  ;;  %v2590_v58 = vld [vmem:[#allocation51 + $0x8] sm:$0xf] }
 0x5b1   : > { %2690 = vmatpush.bf16.msra.mxu2 %v3357_v0 }
 0x5b2   : > { %v2177_v33 = vld [vmem:[#allocation5 + $0x2] ss:$2 sm:$0xff]  ;;  %v2175_v59 = vld [vmem:[#allocation5 + $0x1] ss:$2 sm:$0xff] }
 0x5b3   : > { %2183 = vrot.lane.b32.xlu1 %v2177_v33, %s4930_s18  ;;  %2179 = vrot.lane.b32.xlu0 %v2175_v59, %s4929_s1  ;;  %v2173_v63 = vld [vmem:[#allocation5] ss:$2 sm:$0xff]  ;;  %v3737_v33 = vld [vmem:[#allocation36] ss:$0 sm:$0xff] }
 0x625   : > { %v2184_v61 = vpop.permute.xlu1 %2183  ;;  %v2180_v62 = vpop.permute.xlu0 %2179 }
 0x626   : > { %v2186_v37 = vsel %vm1946_vm3, %v2173_v63, %v2180_v62 }
 0x627   : > { %v2187_v38 = vsel %vm2027_vm7, %v2186_v37, %v2184_v61  ;;  %v3738_v61 = vld [vmem:[#allocation38] ss:$0 sm:$0xff] }
 0x628   : > { %v2188_v1 = vpack.c.bf16 %v2187_v38, %v2187_v38 }
 0x62a   : > { %3293 = vmatmul.msk.bf16.vlgmr.msra.gmra.mxu3 %vm2047_vm8, %v2188_v1 }
 0x6ad   : > { %v2220_v4 = vpop.f32.mrf.mxu3 }
 0x6ae   : > { %v2221_v5 = vadd.f32 %v3730_v2, %v2220_v4 }
 0x6b0   : > { %v2228_v7 = vmul.f32 %v3731_v3, %v2221_v5 }
 0x6b2   : > { %v2233_v8 = vadd.f32 %v3732_v6, %v2228_v7 }
 0x6b4   : > { %v2234_v9 = vmax.f32 %v2233_v8, 0.0 }
 0x6b5   : > { %v2222_v10 = vpop.f32.mrf.mxu3 }
 0x6b6   : > { %2237 = vst.msk [vmem:[#allocation6 + $0x1] sm:$0xff] %vm1946_vm3, %v2234_v9  ;;  %v3739_v9 = vld [vmem:[#allocation35] ss:$0 sm:$0xff] }
 0x6bd   : > { %v2240_v11 = vld [vmem:[#allocation6 + $0x2] sm:$0xff] }
 0x6be   : > { %v2239_v12 = vld [vmem:[#allocation6 + $0x1] sm:$0xff]  ;;  %2246 = vrot.lane.b32.xlu0 %v2240_v11, %s4930_s18 }
 0x6bf   : > { %2242 = vrot.lane.b32.xlu2 %v2239_v12, %s4929_s1  ;;  %v2238_v19 = vld [vmem:[#allocation6] sm:$0xff]  ;;  %v3740_v12 = vld [vmem:[#allocation42] ss:$0 sm:$0xff] }
 0x719   : > { %v2243_v18 = vpop.permute.xlu2 %2242 }
 0x71a   : > { %v2249_v20 = vsel %vm1946_vm3, %v2238_v19, %v2243_v18 }
 0x730   : > { %v2247_v21 = vpop.permute.xlu0 %2246 }
 0x731   : > { %v2250_v22 = vsel %vm2027_vm7, %v2249_v20, %v2247_v21  ;;  %v2456_v21 = vld [vmem:[#allocation39 + $0x8] sm:$0xf] }
 0x732   : > { %v2251_v23 = vpack.c.bf16 %v2250_v22, %v2250_v22  ;;  %v2466_v22 = vunpack.c.l.b16 %v2456_v21  ;;  %v3750_v21 = vld [vmem:[#allocation60] ss:$0 sm:$0xff] }
 0x734   : > { %3298 = vmatmul.msk.bf16.vlgmr.msrb.gmra.mxu0 %vm2047_vm8, %v2251_v23  ;;  %v2468_v23 = vpack.c.b16 %v2466_v22, %v2466_v22 }
 0x7b1   : > { %v2283_v27 = vpop.f32.mrf.mxu0 }
 0x7b2   : > { %v2284_v28 = vadd.f32 %v3733_v24, %v2283_v27  ;;  %v2474_v24 = vsel %vm2051_vm6, %v2468_v23, 0 }
 0x7b3   : > { %2482 = vmatpush.bf16.msrb.mxu3 %v2474_v24 }
 0x7b4   : > { %v2296_v31 = vadd.f32 %v2295_v29, %v2284_v28 }
 0x7b6   : > { %v2301_v35 = vmul.f32 %v3734_v30, %v2296_v31 }
 0x7b7   : > { %2483 = vmatpush.bf16.msrb.mxu3 %v3352_v25 }
 0x7b8   : > { %v2306_v36 = vadd.f32 %v3735_v34, %v2301_v35  ;;  %v3742_v34 = vld [vmem:[#allocation41] ss:$0 sm:$0xff]  ;;  %v3743_v35 = vld [vmem:[#allocation48] ss:$0 sm:$0xff] }
 0x7b9   : > { %v2285_v39 = vpop.f32.mrf.mxu0 }
 0x7ba   : > { %v2307_v40 = vmax.f32 %v2306_v36, 0.0 }
 0x7bc   : > { %2310 = vst.msk [vmem:[#allocation8 + $0x1] sm:$0xff] %vm1946_vm3, %v2307_v40  ;;  %v3744_v40 = vld [vmem:[#allocation50] ss:$0 sm:$0xff] }
 0x7c3   : > { %v2313_v41 = vld [vmem:[#allocation8 + $0x2] sm:$0xff] }
 0x7c4   : > { %v2312_v42 = vld [vmem:[#allocation8 + $0x1] sm:$0xff]  ;;  %2319 = vrot.lane.b32.xlu2 %v2313_v41, %s4930_s18 }
 0x7c5   : > { %2315 = vrot.lane.b32.xlu1 %v2312_v42, %s4929_s1  ;;  %v2311_v49 = vld [vmem:[#allocation8] sm:$0xff] }
 0x81e   : > { %v2320_v50 = vpop.permute.xlu2 %2319 }
 0x837   : > { %v2316_v48 = vpop.permute.xlu1 %2315 }
 0x838   : > { %v2322_v51 = vsel %vm1946_vm3, %v2311_v49, %v2316_v48  ;;  %v2530_v48 = vunpack.c.l.b16 %v2520_v47  ;;  %v3752_v47 = vld [vmem:[#allocation62] ss:$0 sm:$0xff] }
 0x839   : > { %v2323_v52 = vsel %vm2027_vm7, %v2322_v51, %v2320_v50  ;;  %v3353_v51 = vld [vmem:[#allocation45] sm:$0xff] }
 0x83a   : > { %v2324_v53 = vpack.c.bf16 %v2323_v52, %v2323_v52  ;;  %v2532_v49 = vpack.c.b16 %v2530_v48, %v2530_v48 }
 0x83c   : > { %3303 = vmatmul.msk.bf16.vlgmr.msrb.gmra.mxu1 %vm2047_vm8, %v2324_v53  ;;  %v2538_v50 = vsel %vm2051_vm6, %v2532_v49, 0 }
 0x83d   : > { %2546 = vmatpush.bf16.msra.mxu0 %v2538_v50 }
 0x841   : > { %2547 = vmatpush.bf16.msra.mxu0 %v3353_v51  ;;  %v3753_v51 = vld [vmem:[#allocation63] ss:$0 sm:$0xff] }
 0x8b9   : > { %v2356_v59 = vpop.f32.mrf.mxu1 }
 0x8ba   : > { %v2357_v60 = vadd.f32 %v3736_v32, %v2356_v59  ;;  %v2600_v32 = vunpack.c.l.b16 %v2590_v58 }
 0x8bc   : > { %v2364_v62 = vmul.f32 %v3737_v33, %v2357_v60  ;;  %v3745_v33 = vld [vmem:[#allocation47] ss:$0 sm:$0xff] }
 0x8be   : > { %v2369_v63 = vadd.f32 %v3738_v61, %v2364_v62  ;;  %v2602_v61 = vpack.c.b16 %v2600_v32, %v2600_v32 }
 0x8c0   : > { %v2370_v37 = vmax.f32 %v2369_v63, 0.0  ;;  %v2608_v63 = vsel %vm2051_vm6, %v2602_v61, 0 }
 0x8c1   : > { %v2358_v38 = vpop.f32.mrf.mxu1  ;;  %2616 = vmatpush.bf16.msra.mxu1 %v2608_v63 }
 0x8c2   : > { %2373 = vst.msk [vmem:[#allocation9 + $0x1] sm:$0xff] %vm1946_vm3, %v2370_v37 }
 0x8c9   : > { %v2376_v1 = vld [vmem:[#allocation9 + $0x2] sm:$0xff] }
 0x8ca   : > { %v2375_v2 = vld [vmem:[#allocation9 + $0x1] sm:$0xff]  ;;  %2382 = vrot.lane.b32.xlu1 %v2376_v1, %s4930_s18  ;;  %v3746_v1 = vld [vmem:[#allocation54] ss:$0 sm:$0xff] }
 0x8cb   : > { %2378 = vrot.lane.b32.xlu0 %v2375_v2, %s4929_s1  ;;  %v2374_v5 = vld [vmem:[#allocation9] sm:$0xff]  ;;  %v3354_v2 = vld [vmem:[#allocation51] sm:$0xff] }
 0x8cc   : > { %2617 = vmatpush.bf16.msra.mxu1 %v3354_v2 }
 0x93c   : > { %v2383_v3 = vpop.permute.xlu1 %2382 }
 0x93d   : > { %v2379_v4 = vpop.permute.xlu0 %2378 }
 0x93e   : > { %v2385_v6 = vsel %vm1946_vm3, %v2374_v5, %v2379_v4  ;;  %v3747_v4 = vld [vmem:[#allocation56] ss:$0 sm:$0xff] }
 0x93f   : > { %v2386_v7 = vsel %vm2027_vm7, %v2385_v6, %v2383_v3 }
 0x940   : > { %v2387_v8 = vpack.c.bf16 %v2386_v7, %v2386_v7 }
 0x942   : > { %3308 = vmatmul.msk.bf16.vlgmr.msrb.gmra.mxu2 %vm2047_vm8, %v2387_v8 }
 0x9c5   : > { %v2419_v10 = vpop.f32.mrf.mxu2 }
 0x9c6   : > { %v2420_v11 = vadd.f32 %v3739_v9, %v2419_v10 }
 0x9c8   : > { %v2423_v13 = vadd.f32 %v2420_v11, %v2296_v31 }
 0x9ca   : > { %v2428_v15 = vmul.f32 %v3740_v12, %v2423_v13  ;;  %2555 = vst.msk [vmem:[#allocation12] sm:$0xff] %vm1946_vm3, %v2423_v13 }
 0x9cc   : > { %v2433_v16 = vadd.f32 %v3741_v14, %v2428_v15 }
 0x9cd   : > { %v2421_v17 = vpop.f32.mrf.mxu2 }
 0x9ce   : > { %v2434_v18 = vmax.f32 %v2433_v16, 0.0  ;;  %v3748_v17 = vld [vmem:[#allocation53] ss:$0 sm:$0xff] }
 0x9d0   : > { %2437 = vst.msk [vmem:[#allocation10] sm:$0xff] %vm1946_vm3, %v2434_v18  ;;  %v3749_v18 = vld [vmem:[#allocation59] ss:$0 sm:$0xff] }
 0x9d1   : > { %v2556_v59 = vld [vmem:[#allocation12] ss:$2 sm:$0xf]  ;;  %v2558_v60 = vld [vmem:[#allocation12 + $0x1] ss:$2 sm:$0xf] }
 0x9d2   : > { %v2559_v38 = vmax.f32 %v2556_v59, %v2558_v60 }
 0x9d7   : > { %v2442_v19 = vld [vmem:[#allocation10 + $0x2] ss:$2 sm:$0xf]  ;;  %v2440_v20 = vld [vmem:[#allocation10 + $0x1] ss:$2 sm:$0xf] }
 0x9d8   : > { %2448 = vrot.lane.b32.xlu0 %v2442_v19, %s4930_s18  ;;  %2444 = vrot.lane.b32.xlu2 %v2440_v20, %s4929_s1  ;;  %v2438_v27 = vld [vmem:[#allocation10] ss:$2 sm:$0xf] }
 0xa32   : > { %v2445_v26 = vpop.permute.xlu2 %2444 }
 0xa33   : > { %v2451_v28 = vsel %vm1946_vm3, %v2438_v27, %v2445_v26 }
 0xa4a   : > { %v2449_v29 = vpop.permute.xlu0 %2448 }
 0xa4b   : > { %v2452_v30 = vsel %vm2027_vm7, %v2451_v28, %v2449_v29  ;;  %v3356_v28 = vld [vmem:[%s6030_s4 + $0x8] sm:$0xff]  ;;  %v3355_v29 = vld [vmem:[%s6030_s4] sm:$0xff] }
 0xa4c   : > { %v2453_v31 = vpack.c.bf16 %v2452_v30, %v2452_v30  ;;  %2691 = vmatpush.bf16.msra.mxu2 %v3356_v28 }
 0xa4e   : > { %3313 = vmatmul.msk.bf16.vlgmr.msrb.gmra.mxu3 %vm2047_vm8, %v2453_v31 }
 0xa50   : > { %2692 = vmatpush.bf16.msra.mxu2 %v3355_v29 }
 0xad1   : > { %v2485_v36 = vpop.f32.mrf.mxu3 }
 0xad2   : > { %v2486_v39 = vadd.f32 %v3742_v34, %v2485_v36 }
 0xad4   : > { %v2493_v41 = vmul.f32 %v3743_v35, %v2486_v39 }
 0xad6   : > { %v2498_v42 = vadd.f32 %v3744_v40, %v2493_v41  ;;  %v3358_v40 = vld [vmem:[#allocation65] sm:$0xff] }
 0xad7   : > { %2751 = vmatpush.bf16.msra.mxu3 %v3358_v40 }
 0xad8   : > { %v2499_v43 = vmax.f32 %v2498_v42, 0.0  ;;  %v4932_v42 = vmov 4.0  }
 0xad9   : > { %v2487_v44 = vpop.f32.mrf.mxu3  ;;  %3754 = vrcp.f32 %v4932_v42 }
 0xada   : > { %2503 = vst.msk [vmem:[#allocation11 + $0x1] sm:$0xf] %vm2502_vm11, %v2499_v43  ;;  %v3751_v43 = vld [vmem:[#allocation57] ss:$0 sm:$0xff] }
 0xadf   : > { %v3755_v48 = vpop.eup %3754 }
 0xae1   : > { %v2506_v45 = vld [vmem:[#allocation11 + $0x2] sm:$0xf] }
 0xae2   : > { %v2505_v46 = vld [vmem:[#allocation11 + $0x1] sm:$0xf]  ;;  %2512 = vrot.lane.b32.xlu2 %v2506_v45, %s4930_s18 }
 0xae3   : > { %2508 = vrot.lane.b32.xlu1 %v2505_v46, %s4929_s1  ;;  %v2504_v53 = vld [vmem:[#allocation11] sm:$0xf] }
 0xb3c   : > { %v2513_v54 = vpop.permute.xlu2 %2512 }
 0xb55   : > { %v2509_v52 = vpop.permute.xlu1 %2508 }
 0xb56   : > { %v2515_v55 = vsel %vm1946_vm3, %v2504_v53, %v2509_v52  ;;  %v2724_v53 = vmul.f32 4.0, %v3755_v48 }
 0xb57   : > { %v2516_v56 = vsel %vm2027_vm7, %v2515_v55, %v2513_v54 }
 0xb58   : > { %v2517_v57 = vpack.c.bf16 %v2516_v56, %v2516_v56 }
 0xb5a   : > { %3318 = vmatmul.msk.bf16.vlgmr.msra.gmra.mxu0 %vm2047_vm8, %v2517_v57  ;;  %v2725_v57 = vsub.f32 1.0, %v2724_v53 }
 0xbd7   : > { %v2549_v62 = vpop.f32.mrf.mxu0 }
 0xbd8   : > { %v2550_v37 = vadd.f32 %v3745_v33, %v2549_v62  ;;  %v2726_v33 = vmul.f32 %v3755_v48, %v2725_v57 }
 0xbda   : > { %v2560_v3 = vadd.f32 %v2559_v38, %v2550_v37  ;;  %v2727_v61 = vadd.f32 %v3755_v48, %v2726_v33 }
 0xbdc   : > { %v2565_v5 = vmul.f32 %v3746_v1, %v2560_v3 }
 0xbde   : > { %v2570_v6 = vadd.f32 %v3747_v4, %v2565_v5 }
 0xbdf   : > { %v2551_v7 = vpop.f32.mrf.mxu0 }
 0xbe0   : > { %v2571_v8 = vmax.f32 %v2570_v6, 0.0 }
 0xbe2   : > { %2573 = vst.msk [vmem:[#allocation13 + $0x1] sm:$0xf] %vm2502_vm11, %v2571_v8 }
 0xbe9   : > { %v2576_v9 = vld [vmem:[#allocation13 + $0x2] sm:$0xf] }
 0xbea   : > { %v2575_v10 = vld [vmem:[#allocation13 + $0x1] sm:$0xf]  ;;  %2582 = vrot.lane.b32.xlu1 %v2576_v9, %s4930_s18 }
 0xbeb   : > { %2578 = vrot.lane.b32.xlu0 %v2575_v10, %s4929_s1  ;;  %v2574_v13 = vld [vmem:[#allocation13] sm:$0xf]  ;;  %s6031_s1 = sld [smem:[#allocation123_spill]] }
 0xbf1   : > { %s2768_s26 = scalar_lea.hbm %s6031_s1, %s5199_s28  ;;  %s4728_s28 = scalar_lea.hbm %s6031_s1, 2 }
 0xbf2   : > { %2699 = vrot.lane.b32.xlu1 %v2560_v3, %s4928_s10  ;;  %s4931_s10 = smov 32   ;;  %v2734_v3 = vld [vmem:[#allocation66] sm:$0x1] }
 0xc5c   : > { %v2583_v11 = vpop.permute.xlu1 %2582 }
 0xc5d   : > { %v2579_v12 = vpop.permute.xlu0 %2578 }
 0xc5e   : > { %v2585_v14 = vsel %vm1946_vm3, %v2574_v13, %v2579_v12 }
 0xc5f   : > { %v2586_v15 = vsel %vm2027_vm7, %v2585_v14, %v2583_v11 }
 0xc60   : > { %v2587_v16 = vpack.c.bf16 %v2586_v15, %v2586_v15 }
 0xc62   : > { %3323 = vmatmul.msk.bf16.vlgmr.msra.gmra.mxu1 %vm2047_vm8, %v2587_v16 }
 0xc64   : > { %v2700_v41 = vpop.permute.xlu1 %2699 }
 0xc65   : > { %v2702_v44 = vsel %vm1915_vm0, 0.0, %v2700_v41  ;;  %vm2728_vm0 = vweird.f32 %v3755_v48 }
 0xc66   : > { %v2703_v49 = vsel %vm1961_vm4, %v2702_v44, 0.0  ;;  %v2729_v37 = vsel %vm2728_vm0, %v3755_v48, %v2727_v61 }
 0xcdf   : > { %v2619_v19 = vpop.f32.mrf.mxu1 }
 0xce0   : > { %v2620_v20 = vadd.f32 %v3748_v17, %v2619_v19 }
 0xce2   : > { %v2627_v22 = vmul.f32 %v3749_v18, %v2620_v20 }
 0xce4   : > { %v2632_v23 = vadd.f32 %v3750_v21, %v2627_v22 }
 0xce6   : > { %v2633_v24 = vmax.f32 %v2632_v23, 0.0 }
 0xce7   : > { %v2621_v25 = vpop.f32.mrf.mxu1 }
 0xce8   : > { %2637 = vst.msk [vmem:[#allocation14 + $0x1] sm:$0xf] %vm2636_vm13, %v2633_v24 }
 0xcef   : > { %v2640_v26 = vld [vmem:[#allocation14 + $0x2] sm:$0xf] }
 0xcf0   : > { %v2639_v27 = vld [vmem:[#allocation14 + $0x1] sm:$0xf]  ;;  %2646 = vrot.lane.b32.xlu0 %v2640_v26, %s4931_s10  ;;  %s2772_s10 = sshll.u32 %s2768_s26, 4  ;;  %s2773_s10 = int_to_ptr.hbm [resolvable:$true] %s2772_s10 }
 0xcf1   : > { %2642 = vrot.lane.b32.xlu2 %v2639_v27, %s4930_s18  ;;  %v2638_v31 = vld [vmem:[#allocation14] sm:$0xf]  ;;  %s1905_s18 = sand.u32 1, %s4834_s22   ;;  %s4722_s3 = sshra.s32 %s2773_s10, 4  ;;  %s4723_s3 = int_to_ptr.hbm [resolvable:$true] %s4722_s3 }
 0xcf2   : > { %s1906_s5 = scalar_lea.vmem [#allocation68], %s1905_s18  ;;  %s2760_s2 = scalar_lea.sflag [#allocation17], %s1905_s18 }
 0xcf3   : > { %s2770_s0 = sshll.u32 %s1906_s5, 4  ;;  %s4724_s4 = scalar_lea.hbm %s4723_s3, 1  ;;  %s2771_s0 = int_to_ptr.vmem [resolvable:$true] %s2770_s0 }
 0xcf4   : > { %p4725_p10 = scmp.ne.s32.totalorder %s4723_s3, %s4724_s4  ;;  %p4729_p12 = scmp.lt.s32.totalorder %s4723_s3, %s6031_s1 }
 0xcf5   : > { %p4730_p13 = scmp.lt.s32.totalorder %s4728_s28, %s4724_s4 }
 0xcf6   : > { %p4726_p8 = pnand %p4725_p10, %p5216_p5 }
 0xcf7   : > { %p4731_p0 = por %p4730_p13, %p4729_p12 }
 0xcf8   : > { %p4727_p11 = pneg %p4726_p8 }
 0xcfa   : > { %p4732_p1 = pnand %p4731_p0, %p4727_p11 }
 0xd4b   : > { %v2643_v30 = vpop.permute.xlu2 %2642 }
 0xd4c   : > { %v2649_v34 = vsel %vm2027_vm7, %v2638_v31, %v2643_v30 }
 0xd62   : > { %v2647_v35 = vpop.permute.xlu0 %2646 }
 0xd63   : > { %v2651_v36 = vsel %vm2650_vm14, %v2649_v34, %v2647_v35 }
 0xd64   : > { %v2652_v39 = vpack.c.bf16 %v2651_v36, %v2651_v36 }
 0xd66   : > { %3336 = vmatmul.msk.bf16.vlgmr.msra.gmra.mxu2 %vm2681_vm15, %v2652_v39 }
 0xde9   : > { %v2694_v45 = vpop.f32.mrf.mxu2 }
 0xdea   : > { %v2695_v46 = vadd.f32 %v3751_v43, %v2694_v45 }
 0xdec   : > { %v2704_v50 = vadd.f32 %v2703_v49, %v2695_v46 }
 0xdee   : > { %v2709_v52 = vmul.f32 %v3752_v47, %v2704_v50 }
 0xdf0   : > { %v2714_v54 = vadd.f32 %v3753_v51, %v2709_v52 }
 0xdf1   : > { %v2696_v55 = vpop.f32.mrf.mxu2 }
 0xdf2   : > { %v2715_v56 = vmax.f32 %v2714_v54, 0.0 }
 0xdf4   : > { %v2716_v58 = vsel %vm2636_vm13, %v2715_v56, 0.0 }
 0xdf5   : > { %v2717_v32 = vrot.slane %v2716_v58, 4 }
 0xdf7   : > { %v2718_v59 = vadd.f32 %v2717_v32, %v2716_v58 }
 0xdf9   : > { %v2719_v60 = vrot.slane %v2718_v59, 2 }
 0xdfb   : > { %v2720_v62 = vadd.f32 %v2719_v60, %v2718_v59 }
 0xdfd   : > { %v2721_v63 = vrot.slane %v2720_v62, 1 }
 0xdff   : > { %v2722_v38 = vadd.f32 %v2721_v63, %v2720_v62 }
 0xe01   : > { %v2730_v1 = vmul.f32 %v2729_v37, %v2722_v38 }
 0xe03   : > { %v2731_v2 = vpack.c.bf16 %v2730_v1, %v2730_v1 }
 0xe05   : > { %3341 = vmatmul.msk.bf16.vlgmr.msra.gmra.mxu3 %vm2027_vm7, %v2731_v2 }
 0xe88   : > { %v2753_v4 = vpop.f32.mrf.mxu3 }
 0xe89   : > { %v2754_v5 = vadd.f32 %v2753_v4, %v2734_v3 }
 0xe8b   : > { %2758 = vst.msk [vmem:[%s1906_s5] sm:$0x1] %vm2757_vm1, %v2754_v5 }
 0xe8c   : > { %4735 = shalt.err (!%p4732_p1)
}
 0xe8d   : > { %3495 = dma.vmem_to_hbm [thread:$0]  (%p5216_p5), %s2771_s0, 16, %s2773_s10, %s2760_s2  }
 0xe90   : > { %v2755_v6 = vpop.f32.mrf.mxu3 }
 0xe91 PF: > { %s6033_s26 = sld [smem:[#allocation126_spill]] }
 0xe92   : > { %s6034_s18 = sld [smem:[#allocation124_spill]] }
 0xe97   : > { %p3569_p2 = scmp.ge.s32.totalorder %s6033_s26, 2 }
 0xe98   : > { %s2784_s6 = sand.u32 1, %s6034_s18  }
 0xe99   : > { %p3498_p3 = pnand %p3569_p2, %p5220_p6  ;;  %s2785_s7 = scalar_lea.sflag [#allocation17], %s2784_s6 }
 0xe9b   : > { %p3499_p4 = pneg %p3498_p3 }
 0xe9d   : > { %4825 = dma.done.wait (%p3499_p4), %s2785_s7, 16  }
 0xe9e   : > { %4827 = vsyncadd (%p3499_p4), %s2785_s7, 4294967280  ;;  %s6036_s26 = sld [smem:[#allocation127_spill]]  ;;  %s6039_s0 = smov %s4834_s22 }
 0xe9f   : > { %s6037_s3 = sld [smem:[#allocation125_spill]] }
 0xea0   : > { %s6038_s23 = sld [smem:[#allocation128_spill]] }
 0xea4   : > { %p123_p7 = scmp.ge.s32.totalorder %s6036_s26, 4  }
 0xea5   : > { %s6040_s22 = smov %s6037_s3 }
 0xea6   :  { %125 = sbr.rel (!%p123_p7) target bundleno = 112 (0x70), region = 433 }
 0xeab   :  { %2790 = vsyncpa [#allocation16], 1 }
 0xeac   :  { %2792 = vsyncpa [#allocation16 + $0x1], 1 }
 0xead   :  { %2793 = vsyncpa [#allocation19], 1 }
 0xeae   :  { %2794 = vsyncpa [#allocation22], 1 }
 0xeaf   :  { %2795 = vsyncpa [#allocation25], 1 }
 0xeb0   :  { %2796 = vsyncpa [#allocation28], 1 }
 0xeb1   :  { %2797 = vsyncpa [#allocation31], 1 }
 0xeb2   :  { %2798 = vsyncpa [#allocation34], 1 }
 0xeb3   :  { %2799 = vsyncpa [#allocation37], 1 }
 0xeb4   :  { %2800 = vsyncpa [#allocation40], 1 }
 0xeb5   :  { %2801 = vsyncpa [#allocation43], 1 }
 0xeb6   :  { %2802 = vsyncpa [#allocation46], 1 }
 0xeb7   :  { %2803 = vsyncpa [#allocation49], 1 }
 0xeb8   :  { %2804 = vsyncpa [#allocation52], 1 }
 0xeb9   :  { %2805 = vsyncpa [#allocation55], 1 }
 0xeba   :  { %2806 = vsyncpa [#allocation58], 1 }
 0xebb   :  { %2807 = vsyncpa [#allocation61], 1 }
 0xebc   :  { %2808 = vsyncpa [#allocation64], 1 }
 0xebd   :  { %2809 = vsyncpa [#allocation67], 1 }
 0xebe   :  { %2810 = vsyncpa [#allocation17], 1 }
 0xebf   :  { %2812 = vsyncpa [#allocation17 + $0x1], 1 }

</bundles_post_ra>
